<compile_context>
chip_gen: v5e
topology: v5e:2x2
jax: 0.10.0
libtpu: 0.0.40
codegen_flags: <defaults>
</compile_context>

<pallas_src>
import functools

import jax
import jax.numpy as jnp
from jax.experimental import pallas as pl
from jax.experimental.pallas import tpu as pltpu


# ----------------------------------------------------------------------------- kernel

def _fused_hetgat_kernel(
    p_ref, a_ref, s_ref,                         # ones-augmented features (N, F+1)
    wp_ref, wa_ref, ws_ref,                      # packed extended weights (F+1, C)
    adj_p2p_ref, adj_a2p_ref, adj_p2a_ref,
    adj_a2a_ref, adj_p2s_ref, adj_a2s_ref,       # dense {0,1} masks (Nd, Ns)
    hp_ref, ha_ref, hs_ref,                      # outputs, 128-lane padded head blocks
    *, num_heads, dpp, dpa, dps, neg_slope, use_relu,
):
    H = num_heads
    HPp, HAp, HSp = H * dpp, H * dpa, H * dps

    # One lane-dense matmul per source node type computes, in a single MXU pass:
    #   - every Wh_* feature transform (bias folded in via the ones column), zero-padded so
    #     each head block is dpp/dpa/dps wide and each segment starts on a 128-lane boundary,
    #   - every per-head attention logit (attn src/dst vectors folded into the weights).
    p_all = jnp.dot(p_ref[...], wp_ref[...], preferred_element_type=jnp.float32)
    a_all = jnp.dot(a_ref[...], wa_ref[...], preferred_element_type=jnp.float32)
    s_all = jnp.dot(s_ref[...], ws_ref[...], preferred_element_type=jnp.float32)

    # ---- column layout of the packed matmul results (must mirror pack_params) ----
    whp   = p_all[:, 0:HPp]
    whp2p = p_all[:, HPp:2 * HPp]
    whp2a = p_all[:, 2 * HPp:2 * HPp + HAp]
    whp2s = p_all[:, 2 * HPp + HAp:2 * HPp + HAp + HSp]
    pb = 2 * HPp + HAp + HSp
    asrc_p2p = p_all[:, pb + 0 * H:pb + 1 * H]
    asrc_p2a = p_all[:, pb + 1 * H:pb + 2 * H]
    asrc_p2s = p_all[:, pb + 2 * H:pb + 3 * H]
    adst_p2p = p_all[:, pb + 3 * H:pb + 4 * H]
    adst_a2p = p_all[:, pb + 4 * H:pb + 5 * H]

    wha   = a_all[:, 0:HAp]
    wha2p = a_all[:, HAp:HAp + HPp]
    wha2a = a_all[:, HAp + HPp:2 * HAp + HPp]
    wha2s = a_all[:, 2 * HAp + HPp:2 * HAp + HPp + HSp]
    ab = 2 * HAp + HPp + HSp
    asrc_a2p = a_all[:, ab + 0 * H:ab + 1 * H]
    asrc_a2a = a_all[:, ab + 1 * H:ab + 2 * H]
    asrc_a2s = a_all[:, ab + 2 * H:ab + 3 * H]
    adst_p2a = a_all[:, ab + 3 * H:ab + 4 * H]
    adst_a2a = a_all[:, ab + 4 * H:ab + 5 * H]

    whin = s_all[:, 0:HSp]
    adst_p2s = s_all[:, HSp:HSp + H]
    adst_a2s = s_all[:, HSp + H:HSp + 2 * H]

    # ---- dense GAT edge-softmax + aggregation, all heads vectorized per edge type ----
    def aggregate(wh_src, a_src, a_dst, adj, d_out):
        # wh_src: (Ns, H*d_out), a_src: (Ns, H), a_dst: (Nd, H), adj: (Nd, Ns) in {0,1}
        a_src_t = a_src.T                                           # (H, Ns)
        a_dst_t = a_dst.T                                           # (H, Nd)
        e = a_dst_t[:, :, None] + a_src_t[:, None, :]               # (H, Nd, Ns), all heads at once
        e = jnp.where(e > 0, e, neg_slope * e)                      # LeakyReLU
        nonedge = jnp.where(adj > 0, jnp.float32(0.0), jnp.float32(-1e30))  # hoisted, once/edge type
        e = e + nonedge[None, :, :]
        m = jnp.max(e, axis=2, keepdims=True)                       # (H, Nd, 1)
        p = jnp.exp(e - m) * adj[None, :, :]                        # zero out non-edges exactly
        denom = jnp.maximum(jnp.sum(p, axis=2, keepdims=True), jnp.float32(1e-30))
        # exact reciprocal keeps 1e-4 parity with the reference; approx=True would move it to EUP.
        inv = pl.reciprocal(denom, approx=False)                    # (H, Nd, 1)
        parts = []
        for h in range(H):
            agg_h = jnp.dot(p[h], wh_src[:, h * d_out:(h + 1) * d_out],
                            preferred_element_type=jnp.float32)     # (Nd, d_out), unnormalized
            parts.append(agg_h * inv[h])                            # scale after the matmul
        return jnp.concatenate(parts, axis=-1)                      # (Nd, H*d_out)

    ft_p2p = aggregate(whp2p, asrc_p2p, adst_p2p, adj_p2p_ref[...], dpp)
    ft_a2p = aggregate(wha2p, asrc_a2p, adst_a2p, adj_a2p_ref[...], dpp)
    ft_p2a = aggregate(whp2a, asrc_p2a, adst_p2a, adj_p2a_ref[...], dpa)
    ft_a2a = aggregate(wha2a, asrc_a2a, adst_a2a, adj_a2a_ref[...], dpa)
    ft_p2s = aggregate(whp2s, asrc_p2s, adst_p2s, adj_p2s_ref[...], dps)
    ft_a2s = aggregate(wha2s, asrc_a2s, adst_a2s, adj_a2s_ref[...], dps)

    # ---- combine + ReLU, one full-128-lane store per node type ----
    hp = whp + ft_p2p + ft_a2p
    ha = wha + ft_p2a + ft_a2a
    hs = whin + ft_p2s + ft_a2s
    if use_relu:
        hp = jnp.maximum(hp, 0.0)
        ha = jnp.maximum(ha, 0.0)
        hs = jnp.maximum(hs, 0.0)
    hp_ref[...] = hp
    ha_ref[...] = ha
    hs_ref[...] = hs


# ----------------------------------------------------------------------------- params

def init_params(key, in_dim, out_dim, num_heads):
    """Deterministic synthetic parameters matching the module's shapes."""
    fcs = [
        ('P',   in_dim['P'],     out_dim['P']),
        ('A',   in_dim['A'],     out_dim['A']),
        ('p2p', in_dim['P'],     out_dim['P']),
        ('p2a', in_dim['P'],     out_dim['A']),
        ('a2p', in_dim['A'],     out_dim['P']),
        ('a2a', in_dim['A'],     out_dim['A']),
        ('p2s', in_dim['P'],     out_dim['state']),
        ('a2s', in_dim['A'],     out_dim['state']),
        ('in',  in_dim['state'], out_dim['state']),
    ]
    attn = [
        ('p2p', out_dim['P']), ('p2a', out_dim['A']),
        ('a2p', out_dim['P']), ('a2a', out_dim['A']),
        ('p2s', out_dim['state']), ('a2s', out_dim['state']),
    ]
    keys = jax.random.split(key, 2 * len(fcs) + 2 * len(attn))
    params = {}
    ki = 0
    for name, fin, fout in fcs:
        scale = 1.0 / jnp.sqrt(jnp.float32(fin))
        params[name + '_w'] = scale * jax.random.normal(
            keys[ki], (fin, fout * num_heads), jnp.float32); ki += 1
        params[name + '_b'] = scale * jax.random.normal(
            keys[ki], (fout * num_heads,), jnp.float32); ki += 1
    gain = jnp.sqrt(2.0)  # nn.init.calculate_gain('relu')
    for name, d in attn:
        std = gain * jnp.sqrt(2.0 / (num_heads * d + d))  # xavier-normal-ish
        params[name + '_src'] = std * jax.random.normal(
            keys[ki], (1, num_heads * d), jnp.float32); ki += 1
        params[name + '_dst'] = std * jax.random.normal(
            keys[ki], (1, num_heads * d), jnp.float32); ki += 1
    return params


def _blockdiag(vec, num_heads, d_out):
    """(1, H*D) attention vector -> (H*D, H) block-diagonal matrix so that
    wh @ mat == per-head (wh * vec).sum(-1)."""
    v = vec.reshape(num_heads, d_out)
    eye = jnp.eye(num_heads, dtype=vec.dtype)
    return (v[:, :, None] * eye[:, None, :]).reshape(num_heads * d_out, num_heads)


def _padded_head_dim(num_heads, d):
    """Pad per-head dim so each head block group is a multiple of 128 lanes (if divisible)."""
    hd = num_heads * d
    hd_pad = ((hd + 127) // 128) * 128
    return hd_pad // num_heads if hd_pad % num_heads == 0 else d


def pack_params(params, num_heads, out_dim):
    """One-time packing: biases folded in as an extra weight row (ones-augmented features),
    attention src/dst projections folded in as extra weight columns, per-head zero padding
    so every feature segment is 128-lane aligned."""
    H = num_heads
    d_p, d_a, d_s = out_dim['P'], out_dim['A'], out_dim['state']
    dpp, dpa, dps = (_padded_head_dim(H, d_p), _padded_head_dim(H, d_a),
                     _padded_head_dim(H, d_s))

    def ext(name):  # weight with bias folded in as last row: (fin+1, H*d)
        return jnp.concatenate([params[name + '_w'], params[name + '_b'][None, :]], axis=0)

    def pad_heads(w, d, d_pad):
        if d_pad == d:
            return w
        fin = w.shape[0]
        w3 = w.reshape(fin, H, d)
        w3 = jnp.pad(w3, ((0, 0), (0, 0), (0, d_pad - d)))
        return w3.reshape(fin, H * d_pad)

    def attn_cols(fc_name, vec_name, d):  # (fin+1, H): per-head attention logits
        return ext(fc_name) @ _blockdiag(params[vec_name], H, d)

    wP = jnp.concatenate([
        pad_heads(ext('P'),   d_p, dpp),
        pad_heads(ext('p2p'), d_p, dpp),
        pad_heads(ext('p2a'), d_a, dpa),
        pad_heads(ext('p2s'), d_s, dps),
        attn_cols('p2p', 'p2p_src', d_p),
        attn_cols('p2a', 'p2a_src', d_a),
        attn_cols('p2s', 'p2s_src', d_s),
        attn_cols('P',   'p2p_dst', d_p),
        attn_cols('P',   'a2p_dst', d_p),
    ], axis=1)
    wA = jnp.concatenate([
        pad_heads(ext('A'),   d_a, dpa),
        pad_heads(ext('a2p'), d_p, dpp),
        pad_heads(ext('a2a'), d_a, dpa),
        pad_heads(ext('a2s'), d_s, dps),
        attn_cols('a2p', 'a2p_src', d_p),
        attn_cols('a2a', 'a2a_src', d_a),
        attn_cols('a2s', 'a2s_src', d_s),
        attn_cols('A',   'p2a_dst', d_a),
        attn_cols('A',   'a2a_dst', d_a),
    ], axis=1)
    wS = jnp.concatenate([
        pad_heads(ext('in'), d_s, dps),
        attn_cols('in', 'p2s_dst', d_s),
        attn_cols('in', 'a2s_dst', d_s),
    ], axis=1)
    return {'wP': wP, 'wA': wA, 'wS': wS, 'dims': (dpp, dpa, dps)}


# ----------------------------------------------------------------------------- forward

def hetero_gat_forward(packed, feat, adj, num_heads, out_dim,
                       l_alpha=0.2, use_relu=True):
    """Batched forward: feat[nt] is (B, N_nt, in_dim[nt]); adj[et] is (B, Nd, Ns) {0,1} mask."""
    H = num_heads
    dpp, dpa, dps = packed['dims']
    d_p, d_a, d_s = out_dim['P'], out_dim['A'], out_dim['state']
    B, NP = feat['P'].shape[:2]
    NA, NS = feat['A'].shape[1], feat['state'].shape[1]

    def aug(x):  # append ones column -> bias handled by the extra weight row
        return jnp.concatenate([x, jnp.ones(x.shape[:-1] + (1,), x.dtype)], axis=-1)

    inputs = [
        aug(feat['P']), aug(feat['A']), aug(feat['state']),
        packed['wP'], packed['wA'], packed['wS'],
        adj['p2p'], adj['a2p'], adj['p2a'], adj['a2a'], adj['p2s'], adj['a2s'],
    ]

    def batched_spec(x):   # squeeze the batch axis; per-graph block over the grid
        return pl.BlockSpec((None,) + x.shape[1:], lambda b: (b, 0, 0))

    def shared_spec(x):    # weights: same full block for every grid step
        return pl.BlockSpec(x.shape, lambda b: (0, 0))

    in_specs = ([batched_spec(x) for x in inputs[:3]]
                + [shared_spec(x) for x in inputs[3:6]]
                + [batched_spec(x) for x in inputs[6:]])

    out_shape = (
        jax.ShapeDtypeStruct((B, NP, H * dpp), jnp.float32),
        jax.ShapeDtypeStruct((B, NA, H * dpa), jnp.float32),
        jax.ShapeDtypeStruct((B, NS, H * dps), jnp.float32),
    )
    out_specs = tuple(pl.BlockSpec((None,) + s.shape[1:], lambda b: (b, 0, 0))
                      for s in out_shape)

    kernel = functools.partial(
        _fused_hetgat_kernel, num_heads=H, dpp=dpp, dpa=dpa, dps=dps,
        neg_slope=l_alpha, use_relu=use_relu)

    hP_pad, hA_pad, hS_pad = pl.pallas_call(
        kernel,
        out_shape=out_shape,
        grid=(B,),
        in_specs=in_specs,
        out_specs=out_specs,
        compiler_params=pltpu.CompilerParams(
            # batch axis is embarrassingly parallel -> shards across v7x's 2 TensorCores
            dimension_semantics=("parallel",),
            # above the 16/32 MiB scoped defaults, under v7x's 64 MiB physical cap
            vmem_limit_bytes=64 * 1024 * 1024),
    )(*inputs)

    # slice away the per-head zero padding (kernel stores are full 128-lane wide)
    return {
        'P': hP_pad.reshape(B, NP, H, dpp)[..., :d_p],
        'A': hA_pad.reshape(B, NA, H, dpa)[..., :d_a],
        'state': hS_pad.reshape(B, NS, H, dps)[..., :d_s],
    }
    # TODO(synk): for large graphs, tile the grid additionally over destination-node blocks
    # and feed bf16 MXU operands (keep softmax math in f32); not needed at these sizes.


# ----------------------------------------------------------------------------- reference

def _ref_aggregate(wh_src, wh_dst, src_vec, dst_vec, adj, H, D, slope):
    ws = wh_src.reshape(-1, H, D)
    wd = wh_dst.reshape(-1, H, D)
    sv = src_vec.reshape(1, H, D)
    dv = dst_vec.reshape(1, H, D)
    a_src = (ws * sv).sum(-1)                       # (Ns, H)
    a_dst = (wd * dv).sum(-1)                       # (Nd, H)
    e = a_dst[:, None, :] + a_src[None, :, :]       # (Nd, Ns, H)
    e = jnp.where(e > 0, e, slope * e)
    e = jnp.where(adj[:, :, None] > 0, e, -1e30)
    m = e.max(axis=1, keepdims=True)
    p = jnp.exp(e - m) * adj[:, :, None]
    denom = p.sum(axis=1, keepdims=True)
    attn = p / jnp.maximum(denom, 1e-30)
    ft = jnp.einsum('dsh,shk->dhk', attn, ws)
    return ft.reshape(-1, H * D)


def ref_forward(params, feat, adj, num_heads, out_dim, l_alpha=0.2):
    def lin(name, x):
        return x @ params[name + '_w'] + params[name + '_b']

    Whp, Wha, Whin = lin('P', feat['P']), lin('A', feat['A']), lin('in', feat['state'])
    Whp2p, Whp2a = lin('p2p', feat['P']), lin('p2a', feat['P'])
    Wha2p, Wha2a = lin('a2p', feat['A']), lin('a2a', feat['A'])
    Whp2s, Wha2s = lin('p2s', feat['P']), lin('a2s', feat['A'])
    H = num_heads
    hP = (Whp
          + _ref_aggregate(Whp2p, Whp, params['p2p_src'], params['p2p_dst'],
                           adj['p2p'], H, out_dim['P'], l_alpha)
          + _ref_aggregate(Wha2p, Whp, params['a2p_src'], params['a2p_dst'],
                           adj['a2p'], H, out_dim['P'], l_alpha))
    hA = (Wha
          + _ref_aggregate(Whp2a, Wha, params['p2a_src'], params['p2a_dst'],
                           adj['p2a'], H, out_dim['A'], l_alpha)
          + _ref_aggregate(Wha2a, Wha, params['a2a_src'], params['a2a_dst'],
                           adj['a2a'], H, out_dim['A'], l_alpha))
    hS = (Whin
          + _ref_aggregate(Whp2s, Whin, params['p2s_src'], params['p2s_dst'],
                           adj['p2s'], H, out_dim['state'], l_alpha)
          + _ref_aggregate(Wha2s, Whin, params['a2s_src'], params['a2s_dst'],
                           adj['a2s'], H, out_dim['state'], l_alpha))
    return {
        'P': jax.nn.relu(hP).reshape(-1, H, out_dim['P']),
        'A': jax.nn.relu(hA).reshape(-1, H, out_dim['A']),
        'state': jax.nn.relu(hS).reshape(-1, H, out_dim['state']),
    }


# ----------------------------------------------------------------------------- main

if __name__ == "__main__":
    in_dim = {'P': 18, 'A': 14, 'state': 26}
    out_dim = {'P': 16, 'A': 16, 'state': 32}
    num_heads = 4
    B, NP, NA, NS = 4, 5, 3, 1

    key = jax.random.PRNGKey(0)
    k_par, k_p, k_a, k_s, k_adj = jax.random.split(key, 5)
    params = init_params(k_par, in_dim, out_dim, num_heads)
    packed = pack_params(params, num_heads, out_dim)

    feat = {
        'P': jax.random.normal(k_p, (B, NP, in_dim['P']), jnp.float32),
        'A': jax.random.normal(k_a, (B, NA, in_dim['A']), jnp.float32),
        'state': jax.random.normal(k_s, (B, NS, in_dim['state']), jnp.float32),
    }

    # dense {0,1} adjacency masks [B, num_dst, num_src]; guarantee every edge type non-empty
    adj_keys = jax.random.split(k_adj, 6)
    def mk_adj(k, nd, ns):
        m = (jax.random.uniform(k, (B, nd, ns)) < 0.7).astype(jnp.float32)
        return m.at[:, 0, 0].set(1.0)
    adj = {
        'p2p': mk_adj(adj_keys[0], NP, NP),
        'a2p': mk_adj(adj_keys[1], NP, NA),
        'p2a': mk_adj(adj_keys[2], NA, NP),
        'a2a': mk_adj(adj_keys[3], NA, NA),
        'p2s': mk_adj(adj_keys[4], NS, NP),
        'a2s': mk_adj(adj_keys[5], NS, NA),
    }

    out = hetero_gat_forward(packed, feat, adj, num_heads, out_dim,
                             l_alpha=0.2, use_relu=True)
    out = jax.block_until_ready(out)

    ref = jax.vmap(lambda f, a: ref_forward(params, f, a, num_heads, out_dim,
                                            l_alpha=0.2))(feat, adj)
    for nt in ('P', 'A', 'state'):
        assert out[nt].shape == ref[nt].shape, (nt, out[nt].shape, ref[nt].shape)
        assert jnp.allclose(out[nt], ref[nt], atol=1e-4, rtol=1e-4), nt

    # TODO(synk): edge types with zero edges contribute exact zeros here (denom clamp),
    # matching the reference's "skip if number_of_edges()==0" behavior; weighted (non-binary)
    # adjacency values would silently reweight the softmax, same as the dense reference.
    print("KERNEL_OK")
</pallas_src>

<mosaic_0001>
module attributes {stable_mosaic.version = 11 : i64} {
  func.func @_fused_hetgat_kernel(%arg0: i32, %arg1: memref<1x5x19xf32, #tpu.memory_space<vmem>>, %arg2: memref<1x3x15xf32, #tpu.memory_space<vmem>>, %arg3: memref<1x1x27xf32, #tpu.memory_space<vmem>>, %arg4: memref<19x532xf32, #tpu.memory_space<vmem>>, %arg5: memref<15x532xf32, #tpu.memory_space<vmem>>, %arg6: memref<27x136xf32, #tpu.memory_space<vmem>>, %arg7: memref<1x5x5xf32, #tpu.memory_space<vmem>>, %arg8: memref<1x5x3xf32, #tpu.memory_space<vmem>>, %arg9: memref<1x3x5xf32, #tpu.memory_space<vmem>>, %arg10: memref<1x3x3xf32, #tpu.memory_space<vmem>>, %arg11: memref<1x1x5xf32, #tpu.memory_space<vmem>>, %arg12: memref<1x1x3xf32, #tpu.memory_space<vmem>>, %arg13: memref<1x5x128xf32, #tpu.memory_space<vmem>>, %arg14: memref<1x3x128xf32, #tpu.memory_space<vmem>>, %arg15: memref<1x1x128xf32, #tpu.memory_space<vmem>>) attributes {dimension_semantics = [#tpu.dimension_semantics<parallel>], iteration_bounds = array<i64: 4>, scalar_prefetch = 0 : i64, scratch_operands = 0 : i64, tpu.core_type = #tpu.core_type<tc>, window_params = [{transform_indices = @transform_0, window_bounds = array<i64: 1, 5, 19>}, {transform_indices = @transform_1, window_bounds = array<i64: 1, 3, 15>}, {transform_indices = @transform_2, window_bounds = array<i64: 1, 1, 27>}, {pipeline_mode = #tpu.pipeline_mode<synchronous>, transform_indices = @transform_3, window_bounds = array<i64: 19, 532>}, {pipeline_mode = #tpu.pipeline_mode<synchronous>, transform_indices = @transform_4, window_bounds = array<i64: 15, 532>}, {pipeline_mode = #tpu.pipeline_mode<synchronous>, transform_indices = @transform_5, window_bounds = array<i64: 27, 136>}, {transform_indices = @transform_6, window_bounds = array<i64: 1, 5, 5>}, {transform_indices = @transform_7, window_bounds = array<i64: 1, 5, 3>}, {transform_indices = @transform_8, window_bounds = array<i64: 1, 3, 5>}, {transform_indices = @transform_9, window_bounds = array<i64: 1, 3, 3>}, {transform_indices = @transform_10, window_bounds = array<i64: 1, 1, 5>}, {transform_indices = @transform_11, window_bounds = array<i64: 1, 1, 3>}, {transform_indices = @transform_12, window_bounds = array<i64: 1, 5, 128>}, {transform_indices = @transform_13, window_bounds = array<i64: 1, 3, 128>}, {transform_indices = @transform_14, window_bounds = array<i64: 1, 1, 128>}]} {
    %c0 = arith.constant 0 : index
    %c0_0 = arith.constant 0 : index
    %c0_1 = arith.constant 0 : index
    %0 = vector.load %arg1[%c0, %c0_0, %c0_1] : memref<1x5x19xf32, #tpu.memory_space<vmem>>, vector<1x5x19xf32>
    %1 = vector.shape_cast %0 : vector<1x5x19xf32> to vector<5x19xf32>
    %c0_2 = arith.constant 0 : index
    %c0_3 = arith.constant 0 : index
    %2 = vector.load %arg4[%c0_2, %c0_3] : memref<19x532xf32, #tpu.memory_space<vmem>>, vector<19x532xf32>
    %cst = arith.constant dense<0.000000e+00> : vector<5x532xf32>
    %3 = tpu.matmul %1, %2, %cst {dimension_numbers = #tpu.dot_dimension_numbers<[1], [0], [0], [1], [0, 0, 1, 1], [], []>} : vector<5x19xf32>, vector<19x532xf32>, vector<5x532xf32> -> vector<5x532xf32>
    %c0_4 = arith.constant 0 : index
    %c0_5 = arith.constant 0 : index
    %c0_6 = arith.constant 0 : index
    %4 = vector.load %arg2[%c0_4, %c0_5, %c0_6] : memref<1x3x15xf32, #tpu.memory_space<vmem>>, vector<1x3x15xf32>
    %5 = vector.shape_cast %4 : vector<1x3x15xf32> to vector<3x15xf32>
    %c0_7 = arith.constant 0 : index
    %c0_8 = arith.constant 0 : index
    %6 = vector.load %arg5[%c0_7, %c0_8] : memref<15x532xf32, #tpu.memory_space<vmem>>, vector<15x532xf32>
    %cst_9 = arith.constant dense<0.000000e+00> : vector<3x532xf32>
    %7 = tpu.matmul %5, %6, %cst_9 {dimension_numbers = #tpu.dot_dimension_numbers<[1], [0], [0], [1], [0, 0, 1, 1], [], []>} : vector<3x15xf32>, vector<15x532xf32>, vector<3x532xf32> -> vector<3x532xf32>
    %c0_10 = arith.constant 0 : index
    %c0_11 = arith.constant 0 : index
    %c0_12 = arith.constant 0 : index
    %8 = vector.load %arg3[%c0_10, %c0_11, %c0_12] : memref<1x1x27xf32, #tpu.memory_space<vmem>>, vector<1x1x27xf32>
    %9 = vector.shape_cast %8 : vector<1x1x27xf32> to vector<1x27xf32>
    %c0_13 = arith.constant 0 : index
    %c0_14 = arith.constant 0 : index
    %10 = vector.load %arg6[%c0_13, %c0_14] : memref<27x136xf32, #tpu.memory_space<vmem>>, vector<27x136xf32>
    %cst_15 = arith.constant dense<0.000000e+00> : vector<1x136xf32>
    %11 = tpu.matmul %9, %10, %cst_15 {dimension_numbers = #tpu.dot_dimension_numbers<[1], [0], [0], [1], [0, 0, 1, 1], [], []>} : vector<1x27xf32>, vector<27x136xf32>, vector<1x136xf32> -> vector<1x136xf32>
    %12 = vector.extract_strided_slice %3 {offsets = [0, 0], sizes = [5, 128], strides = [1, 1]} : vector<5x532xf32> to vector<5x128xf32>
    %13 = vector.extract_strided_slice %3 {offsets = [0, 128], sizes = [5, 128], strides = [1, 1]} : vector<5x532xf32> to vector<5x128xf32>
    %14 = vector.extract_strided_slice %3 {offsets = [0, 256], sizes = [5, 128], strides = [1, 1]} : vector<5x532xf32> to vector<5x128xf32>
    %15 = vector.extract_strided_slice %3 {offsets = [0, 384], sizes = [5, 128], strides = [1, 1]} : vector<5x532xf32> to vector<5x128xf32>
    %16 = vector.extract_strided_slice %3 {offsets = [0, 512], sizes = [5, 4], strides = [1, 1]} : vector<5x532xf32> to vector<5x4xf32>
    %17 = vector.extract_strided_slice %3 {offsets = [0, 516], sizes = [5, 4], strides = [1, 1]} : vector<5x532xf32> to vector<5x4xf32>
    %18 = vector.extract_strided_slice %3 {offsets = [0, 520], sizes = [5, 4], strides = [1, 1]} : vector<5x532xf32> to vector<5x4xf32>
    %19 = vector.extract_strided_slice %3 {offsets = [0, 524], sizes = [5, 4], strides = [1, 1]} : vector<5x532xf32> to vector<5x4xf32>
    %20 = vector.extract_strided_slice %3 {offsets = [0, 528], sizes = [5, 4], strides = [1, 1]} : vector<5x532xf32> to vector<5x4xf32>
    %21 = vector.extract_strided_slice %7 {offsets = [0, 0], sizes = [3, 128], strides = [1, 1]} : vector<3x532xf32> to vector<3x128xf32>
    %22 = vector.extract_strided_slice %7 {offsets = [0, 128], sizes = [3, 128], strides = [1, 1]} : vector<3x532xf32> to vector<3x128xf32>
    %23 = vector.extract_strided_slice %7 {offsets = [0, 256], sizes = [3, 128], strides = [1, 1]} : vector<3x532xf32> to vector<3x128xf32>
    %24 = vector.extract_strided_slice %7 {offsets = [0, 384], sizes = [3, 128], strides = [1, 1]} : vector<3x532xf32> to vector<3x128xf32>
    %25 = vector.extract_strided_slice %7 {offsets = [0, 512], sizes = [3, 4], strides = [1, 1]} : vector<3x532xf32> to vector<3x4xf32>
    %26 = vector.extract_strided_slice %7 {offsets = [0, 516], sizes = [3, 4], strides = [1, 1]} : vector<3x532xf32> to vector<3x4xf32>
    %27 = vector.extract_strided_slice %7 {offsets = [0, 520], sizes = [3, 4], strides = [1, 1]} : vector<3x532xf32> to vector<3x4xf32>
    %28 = vector.extract_strided_slice %7 {offsets = [0, 524], sizes = [3, 4], strides = [1, 1]} : vector<3x532xf32> to vector<3x4xf32>
    %29 = vector.extract_strided_slice %7 {offsets = [0, 528], sizes = [3, 4], strides = [1, 1]} : vector<3x532xf32> to vector<3x4xf32>
    %30 = vector.extract_strided_slice %11 {offsets = [0, 0], sizes = [1, 128], strides = [1, 1]} : vector<1x136xf32> to vector<1x128xf32>
    %31 = vector.extract_strided_slice %11 {offsets = [0, 128], sizes = [1, 4], strides = [1, 1]} : vector<1x136xf32> to vector<1x4xf32>
    %32 = vector.extract_strided_slice %11 {offsets = [0, 132], sizes = [1, 4], strides = [1, 1]} : vector<1x136xf32> to vector<1x4xf32>
    %c0_16 = arith.constant 0 : index
    %c0_17 = arith.constant 0 : index
    %c0_18 = arith.constant 0 : index
    %33 = vector.load %arg7[%c0_16, %c0_17, %c0_18] : memref<1x5x5xf32, #tpu.memory_space<vmem>>, vector<1x5x5xf32>
    %34 = vector.shape_cast %33 : vector<1x5x5xf32> to vector<5x5xf32>
    %35 = tpu.transpose %16, [1, 0] : vector<5x4xf32> -> vector<4x5xf32>
    %36 = tpu.transpose %19, [1, 0] : vector<5x4xf32> -> vector<4x5xf32>
    %37 = vector.shape_cast %36 : vector<4x5xf32> to vector<4x5x1xf32>
    %38 = vector.shape_cast %35 : vector<4x5xf32> to vector<4x1x5xf32>
    %39 = vector.broadcast %37 : vector<4x5x1xf32> to vector<4x5x5xf32>
    %40 = vector.broadcast %38 : vector<4x1x5xf32> to vector<4x5x5xf32>
    %41 = arith.addf %39, %40 : vector<4x5x5xf32>
    %cst_19 = arith.constant 0.000000e+00 : f32
    %42 = vector.broadcast %cst_19 : f32 to vector<4x5x5xf32>
    %43 = arith.cmpf ogt, %41, %42 : vector<4x5x5xf32>
    %cst_20 = arith.constant 2.000000e-01 : f32
    %44 = vector.broadcast %cst_20 : f32 to vector<4x5x5xf32>
    %45 = arith.mulf %44, %41 : vector<4x5x5xf32>
    %46 = arith.select %43, %41, %45 : vector<4x5x5xi1>, vector<4x5x5xf32>
    %cst_21 = arith.constant 0.000000e+00 : f32
    %47 = vector.broadcast %cst_21 : f32 to vector<5x5xf32>
    %48 = arith.cmpf ogt, %34, %47 : vector<5x5xf32>
    %cst_22 = arith.constant 0.000000e+00 : f32
    %cst_23 = arith.constant -1.000000e+30 : f32
    %49 = vector.broadcast %cst_22 : f32 to vector<5x5xf32>
    %50 = vector.broadcast %cst_23 : f32 to vector<5x5xf32>
    %51 = arith.select %48, %49, %50 : vector<5x5xi1>, vector<5x5xf32>
    %52 = vector.shape_cast %51 : vector<5x5xf32> to vector<1x5x5xf32>
    %53 = vector.broadcast %52 : vector<1x5x5xf32> to vector<4x5x5xf32>
    %54 = arith.addf %46, %53 : vector<4x5x5xf32>
    %cst_24 = arith.constant dense<0xFF800000> : vector<4x5xf32>
    %55 = vector.multi_reduction <maximumf>, %54, %cst_24 [2] : vector<4x5x5xf32> to vector<4x5xf32>
    %56 = vector.shape_cast %55 : vector<4x5xf32> to vector<4x5x1xf32>
    %57 = vector.broadcast %56 : vector<4x5x1xf32> to vector<4x5x5xf32>
    %58 = arith.subf %54, %57 : vector<4x5x5xf32>
    %59 = math.exp %58 : vector<4x5x5xf32>
    %60 = vector.shape_cast %34 : vector<5x5xf32> to vector<1x5x5xf32>
    %61 = vector.broadcast %60 : vector<1x5x5xf32> to vector<4x5x5xf32>
    %62 = arith.mulf %59, %61 : vector<4x5x5xf32>
    %cst_25 = arith.constant dense<0.000000e+00> : vector<4x5xf32>
    %63 = vector.multi_reduction <add>, %62, %cst_25 [2] : vector<4x5x5xf32> to vector<4x5xf32>
    %64 = vector.shape_cast %63 : vector<4x5xf32> to vector<4x5x1xf32>
    %cst_26 = arith.constant 1.000000e-30 : f32
    %65 = vector.broadcast %cst_26 : f32 to vector<4x5x1xf32>
    %66 = arith.maximumf %64, %65 : vector<4x5x1xf32>
    %67 = tpu.reciprocal %66 : vector<4x5x1xf32> -> vector<4x5x1xf32>
    %68 = vector.extract_strided_slice %62 {offsets = [0, 0, 0], sizes = [1, 5, 5], strides = [1, 1, 1]} : vector<4x5x5xf32> to vector<1x5x5xf32>
    %69 = vector.shape_cast %68 : vector<1x5x5xf32> to vector<5x5xf32>
    %70 = vector.extract_strided_slice %13 {offsets = [0, 0], sizes = [5, 32], strides = [1, 1]} : vector<5x128xf32> to vector<5x32xf32>
    %cst_27 = arith.constant dense<0.000000e+00> : vector<5x32xf32>
    %71 = tpu.matmul %69, %70, %cst_27 {dimension_numbers = #tpu.dot_dimension_numbers<[1], [0], [0], [1], [0, 0, 1, 1], [], []>} : vector<5x5xf32>, vector<5x32xf32>, vector<5x32xf32> -> vector<5x32xf32>
    %72 = vector.extract_strided_slice %67 {offsets = [0, 0, 0], sizes = [1, 5, 1], strides = [1, 1, 1]} : vector<4x5x1xf32> to vector<1x5x1xf32>
    %73 = vector.shape_cast %72 : vector<1x5x1xf32> to vector<5x1xf32>
    %74 = vector.broadcast %73 : vector<5x1xf32> to vector<5x32xf32>
    %75 = arith.mulf %71, %74 : vector<5x32xf32>
    %76 = vector.extract_strided_slice %62 {offsets = [1, 0, 0], sizes = [1, 5, 5], strides = [1, 1, 1]} : vector<4x5x5xf32> to vector<1x5x5xf32>
    %77 = vector.shape_cast %76 : vector<1x5x5xf32> to vector<5x5xf32>
    %78 = vector.extract_strided_slice %13 {offsets = [0, 32], sizes = [5, 32], strides = [1, 1]} : vector<5x128xf32> to vector<5x32xf32>
    %cst_28 = arith.constant dense<0.000000e+00> : vector<5x32xf32>
    %79 = tpu.matmul %77, %78, %cst_28 {dimension_numbers = #tpu.dot_dimension_numbers<[1], [0], [0], [1], [0, 0, 1, 1], [], []>} : vector<5x5xf32>, vector<5x32xf32>, vector<5x32xf32> -> vector<5x32xf32>
    %80 = vector.extract_strided_slice %67 {offsets = [1, 0, 0], sizes = [1, 5, 1], strides = [1, 1, 1]} : vector<4x5x1xf32> to vector<1x5x1xf32>
    %81 = vector.shape_cast %80 : vector<1x5x1xf32> to vector<5x1xf32>
    %82 = vector.broadcast %81 : vector<5x1xf32> to vector<5x32xf32>
    %83 = arith.mulf %79, %82 : vector<5x32xf32>
    %84 = vector.extract_strided_slice %62 {offsets = [2, 0, 0], sizes = [1, 5, 5], strides = [1, 1, 1]} : vector<4x5x5xf32> to vector<1x5x5xf32>
    %85 = vector.shape_cast %84 : vector<1x5x5xf32> to vector<5x5xf32>
    %86 = vector.extract_strided_slice %13 {offsets = [0, 64], sizes = [5, 32], strides = [1, 1]} : vector<5x128xf32> to vector<5x32xf32>
    %cst_29 = arith.constant dense<0.000000e+00> : vector<5x32xf32>
    %87 = tpu.matmul %85, %86, %cst_29 {dimension_numbers = #tpu.dot_dimension_numbers<[1], [0], [0], [1], [0, 0, 1, 1], [], []>} : vector<5x5xf32>, vector<5x32xf32>, vector<5x32xf32> -> vector<5x32xf32>
    %88 = vector.extract_strided_slice %67 {offsets = [2, 0, 0], sizes = [1, 5, 1], strides = [1, 1, 1]} : vector<4x5x1xf32> to vector<1x5x1xf32>
    %89 = vector.shape_cast %88 : vector<1x5x1xf32> to vector<5x1xf32>
    %90 = vector.broadcast %89 : vector<5x1xf32> to vector<5x32xf32>
    %91 = arith.mulf %87, %90 : vector<5x32xf32>
    %92 = vector.extract_strided_slice %62 {offsets = [3, 0, 0], sizes = [1, 5, 5], strides = [1, 1, 1]} : vector<4x5x5xf32> to vector<1x5x5xf32>
    %93 = vector.shape_cast %92 : vector<1x5x5xf32> to vector<5x5xf32>
    %94 = vector.extract_strided_slice %13 {offsets = [0, 96], sizes = [5, 32], strides = [1, 1]} : vector<5x128xf32> to vector<5x32xf32>
    %cst_30 = arith.constant dense<0.000000e+00> : vector<5x32xf32>
    %95 = tpu.matmul %93, %94, %cst_30 {dimension_numbers = #tpu.dot_dimension_numbers<[1], [0], [0], [1], [0, 0, 1, 1], [], []>} : vector<5x5xf32>, vector<5x32xf32>, vector<5x32xf32> -> vector<5x32xf32>
    %96 = vector.extract_strided_slice %67 {offsets = [3, 0, 0], sizes = [1, 5, 1], strides = [1, 1, 1]} : vector<4x5x1xf32> to vector<1x5x1xf32>
    %97 = vector.shape_cast %96 : vector<1x5x1xf32> to vector<5x1xf32>
    %98 = vector.broadcast %97 : vector<5x1xf32> to vector<5x32xf32>
    %99 = arith.mulf %95, %98 : vector<5x32xf32>
    %100 = tpu.concatenate %75, %83, %91, %99 in 1 : vector<5x32xf32>, vector<5x32xf32>, vector<5x32xf32>, vector<5x32xf32> -> vector<5x128xf32>
    %c0_31 = arith.constant 0 : index
    %c0_32 = arith.constant 0 : index
    %c0_33 = arith.constant 0 : index
    %101 = vector.load %arg8[%c0_31, %c0_32, %c0_33] : memref<1x5x3xf32, #tpu.memory_space<vmem>>, vector<1x5x3xf32>
    %102 = vector.shape_cast %101 : vector<1x5x3xf32> to vector<5x3xf32>
    %103 = tpu.transpose %25, [1, 0] : vector<3x4xf32> -> vector<4x3xf32>
    %104 = tpu.transpose %20, [1, 0] : vector<5x4xf32> -> vector<4x5xf32>
    %105 = vector.shape_cast %104 : vector<4x5xf32> to vector<4x5x1xf32>
    %106 = vector.shape_cast %103 : vector<4x3xf32> to vector<4x1x3xf32>
    %107 = vector.broadcast %105 : vector<4x5x1xf32> to vector<4x5x3xf32>
    %108 = vector.broadcast %106 : vector<4x1x3xf32> to vector<4x5x3xf32>
    %109 = arith.addf %107, %108 : vector<4x5x3xf32>
    %cst_34 = arith.constant 0.000000e+00 : f32
    %110 = vector.broadcast %cst_34 : f32 to vector<4x5x3xf32>
    %111 = arith.cmpf ogt, %109, %110 : vector<4x5x3xf32>
    %cst_35 = arith.constant 2.000000e-01 : f32
    %112 = vector.broadcast %cst_35 : f32 to vector<4x5x3xf32>
    %113 = arith.mulf %112, %109 : vector<4x5x3xf32>
    %114 = arith.select %111, %109, %113 : vector<4x5x3xi1>, vector<4x5x3xf32>
    %cst_36 = arith.constant 0.000000e+00 : f32
    %115 = vector.broadcast %cst_36 : f32 to vector<5x3xf32>
    %116 = arith.cmpf ogt, %102, %115 : vector<5x3xf32>
    %cst_37 = arith.constant 0.000000e+00 : f32
    %cst_38 = arith.constant -1.000000e+30 : f32
    %117 = vector.broadcast %cst_37 : f32 to vector<5x3xf32>
    %118 = vector.broadcast %cst_38 : f32 to vector<5x3xf32>
    %119 = arith.select %116, %117, %118 : vector<5x3xi1>, vector<5x3xf32>
    %120 = vector.shape_cast %119 : vector<5x3xf32> to vector<1x5x3xf32>
    %121 = vector.broadcast %120 : vector<1x5x3xf32> to vector<4x5x3xf32>
    %122 = arith.addf %114, %121 : vector<4x5x3xf32>
    %cst_39 = arith.constant dense<0xFF800000> : vector<4x5xf32>
    %123 = vector.multi_reduction <maximumf>, %122, %cst_39 [2] : vector<4x5x3xf32> to vector<4x5xf32>
    %124 = vector.shape_cast %123 : vector<4x5xf32> to vector<4x5x1xf32>
    %125 = vector.broadcast %124 : vector<4x5x1xf32> to vector<4x5x3xf32>
    %126 = arith.subf %122, %125 : vector<4x5x3xf32>
    %127 = math.exp %126 : vector<4x5x3xf32>
    %128 = vector.shape_cast %102 : vector<5x3xf32> to vector<1x5x3xf32>
    %129 = vector.broadcast %128 : vector<1x5x3xf32> to vector<4x5x3xf32>
    %130 = arith.mulf %127, %129 : vector<4x5x3xf32>
    %cst_40 = arith.constant dense<0.000000e+00> : vector<4x5xf32>
    %131 = vector.multi_reduction <add>, %130, %cst_40 [2] : vector<4x5x3xf32> to vector<4x5xf32>
    %132 = vector.shape_cast %131 : vector<4x5xf32> to vector<4x5x1xf32>
    %cst_41 = arith.constant 1.000000e-30 : f32
    %133 = vector.broadcast %cst_41 : f32 to vector<4x5x1xf32>
    %134 = arith.maximumf %132, %133 : vector<4x5x1xf32>
    %135 = tpu.reciprocal %134 : vector<4x5x1xf32> -> vector<4x5x1xf32>
    %136 = vector.extract_strided_slice %130 {offsets = [0, 0, 0], sizes = [1, 5, 3], strides = [1, 1, 1]} : vector<4x5x3xf32> to vector<1x5x3xf32>
    %137 = vector.shape_cast %136 : vector<1x5x3xf32> to vector<5x3xf32>
    %138 = vector.extract_strided_slice %22 {offsets = [0, 0], sizes = [3, 32], strides = [1, 1]} : vector<3x128xf32> to vector<3x32xf32>
    %cst_42 = arith.constant dense<0.000000e+00> : vector<5x32xf32>
    %139 = tpu.matmul %137, %138, %cst_42 {dimension_numbers = #tpu.dot_dimension_numbers<[1], [0], [0], [1], [0, 0, 1, 1], [], []>} : vector<5x3xf32>, vector<3x32xf32>, vector<5x32xf32> -> vector<5x32xf32>
    %140 = vector.extract_strided_slice %135 {offsets = [0, 0, 0], sizes = [1, 5, 1], strides = [1, 1, 1]} : vector<4x5x1xf32> to vector<1x5x1xf32>
    %141 = vector.shape_cast %140 : vector<1x5x1xf32> to vector<5x1xf32>
    %142 = vector.broadcast %141 : vector<5x1xf32> to vector<5x32xf32>
    %143 = arith.mulf %139, %142 : vector<5x32xf32>
    %144 = vector.extract_strided_slice %130 {offsets = [1, 0, 0], sizes = [1, 5, 3], strides = [1, 1, 1]} : vector<4x5x3xf32> to vector<1x5x3xf32>
    %145 = vector.shape_cast %144 : vector<1x5x3xf32> to vector<5x3xf32>
    %146 = vector.extract_strided_slice %22 {offsets = [0, 32], sizes = [3, 32], strides = [1, 1]} : vector<3x128xf32> to vector<3x32xf32>
    %cst_43 = arith.constant dense<0.000000e+00> : vector<5x32xf32>
    %147 = tpu.matmul %145, %146, %cst_43 {dimension_numbers = #tpu.dot_dimension_numbers<[1], [0], [0], [1], [0, 0, 1, 1], [], []>} : vector<5x3xf32>, vector<3x32xf32>, vector<5x32xf32> -> vector<5x32xf32>
    %148 = vector.extract_strided_slice %135 {offsets = [1, 0, 0], sizes = [1, 5, 1], strides = [1, 1, 1]} : vector<4x5x1xf32> to vector<1x5x1xf32>
    %149 = vector.shape_cast %148 : vector<1x5x1xf32> to vector<5x1xf32>
    %150 = vector.broadcast %149 : vector<5x1xf32> to vector<5x32xf32>
    %151 = arith.mulf %147, %150 : vector<5x32xf32>
    %152 = vector.extract_strided_slice %130 {offsets = [2, 0, 0], sizes = [1, 5, 3], strides = [1, 1, 1]} : vector<4x5x3xf32> to vector<1x5x3xf32>
    %153 = vector.shape_cast %152 : vector<1x5x3xf32> to vector<5x3xf32>
    %154 = vector.extract_strided_slice %22 {offsets = [0, 64], sizes = [3, 32], strides = [1, 1]} : vector<3x128xf32> to vector<3x32xf32>
    %cst_44 = arith.constant dense<0.000000e+00> : vector<5x32xf32>
    %155 = tpu.matmul %153, %154, %cst_44 {dimension_numbers = #tpu.dot_dimension_numbers<[1], [0], [0], [1], [0, 0, 1, 1], [], []>} : vector<5x3xf32>, vector<3x32xf32>, vector<5x32xf32> -> vector<5x32xf32>
    %156 = vector.extract_strided_slice %135 {offsets = [2, 0, 0], sizes = [1, 5, 1], strides = [1, 1, 1]} : vector<4x5x1xf32> to vector<1x5x1xf32>
    %157 = vector.shape_cast %156 : vector<1x5x1xf32> to vector<5x1xf32>
    %158 = vector.broadcast %157 : vector<5x1xf32> to vector<5x32xf32>
    %159 = arith.mulf %155, %158 : vector<5x32xf32>
    %160 = vector.extract_strided_slice %130 {offsets = [3, 0, 0], sizes = [1, 5, 3], strides = [1, 1, 1]} : vector<4x5x3xf32> to vector<1x5x3xf32>
    %161 = vector.shape_cast %160 : vector<1x5x3xf32> to vector<5x3xf32>
    %162 = vector.extract_strided_slice %22 {offsets = [0, 96], sizes = [3, 32], strides = [1, 1]} : vector<3x128xf32> to vector<3x32xf32>
    %cst_45 = arith.constant dense<0.000000e+00> : vector<5x32xf32>
    %163 = tpu.matmul %161, %162, %cst_45 {dimension_numbers = #tpu.dot_dimension_numbers<[1], [0], [0], [1], [0, 0, 1, 1], [], []>} : vector<5x3xf32>, vector<3x32xf32>, vector<5x32xf32> -> vector<5x32xf32>
    %164 = vector.extract_strided_slice %135 {offsets = [3, 0, 0], sizes = [1, 5, 1], strides = [1, 1, 1]} : vector<4x5x1xf32> to vector<1x5x1xf32>
    %165 = vector.shape_cast %164 : vector<1x5x1xf32> to vector<5x1xf32>
    %166 = vector.broadcast %165 : vector<5x1xf32> to vector<5x32xf32>
    %167 = arith.mulf %163, %166 : vector<5x32xf32>
    %168 = tpu.concatenate %143, %151, %159, %167 in 1 : vector<5x32xf32>, vector<5x32xf32>, vector<5x32xf32>, vector<5x32xf32> -> vector<5x128xf32>
    %c0_46 = arith.constant 0 : index
    %c0_47 = arith.constant 0 : index
    %c0_48 = arith.constant 0 : index
    %169 = vector.load %arg9[%c0_46, %c0_47, %c0_48] : memref<1x3x5xf32, #tpu.memory_space<vmem>>, vector<1x3x5xf32>
    %170 = vector.shape_cast %169 : vector<1x3x5xf32> to vector<3x5xf32>
    %171 = tpu.transpose %17, [1, 0] : vector<5x4xf32> -> vector<4x5xf32>
    %172 = tpu.transpose %28, [1, 0] : vector<3x4xf32> -> vector<4x3xf32>
    %173 = vector.shape_cast %172 : vector<4x3xf32> to vector<4x3x1xf32>
    %174 = vector.shape_cast %171 : vector<4x5xf32> to vector<4x1x5xf32>
    %175 = vector.broadcast %173 : vector<4x3x1xf32> to vector<4x3x5xf32>
    %176 = vector.broadcast %174 : vector<4x1x5xf32> to vector<4x3x5xf32>
    %177 = arith.addf %175, %176 : vector<4x3x5xf32>
    %cst_49 = arith.constant 0.000000e+00 : f32
    %178 = vector.broadcast %cst_49 : f32 to vector<4x3x5xf32>
    %179 = arith.cmpf ogt, %177, %178 : vector<4x3x5xf32>
    %cst_50 = arith.constant 2.000000e-01 : f32
    %180 = vector.broadcast %cst_50 : f32 to vector<4x3x5xf32>
    %181 = arith.mulf %180, %177 : vector<4x3x5xf32>
    %182 = arith.select %179, %177, %181 : vector<4x3x5xi1>, vector<4x3x5xf32>
    %cst_51 = arith.constant 0.000000e+00 : f32
    %183 = vector.broadcast %cst_51 : f32 to vector<3x5xf32>
    %184 = arith.cmpf ogt, %170, %183 : vector<3x5xf32>
    %cst_52 = arith.constant 0.000000e+00 : f32
    %cst_53 = arith.constant -1.000000e+30 : f32
    %185 = vector.broadcast %cst_52 : f32 to vector<3x5xf32>
    %186 = vector.broadcast %cst_53 : f32 to vector<3x5xf32>
    %187 = arith.select %184, %185, %186 : vector<3x5xi1>, vector<3x5xf32>
    %188 = vector.shape_cast %187 : vector<3x5xf32> to vector<1x3x5xf32>
    %189 = vector.broadcast %188 : vector<1x3x5xf32> to vector<4x3x5xf32>
    %190 = arith.addf %182, %189 : vector<4x3x5xf32>
    %cst_54 = arith.constant dense<0xFF800000> : vector<4x3xf32>
    %191 = vector.multi_reduction <maximumf>, %190, %cst_54 [2] : vector<4x3x5xf32> to vector<4x3xf32>
    %192 = vector.shape_cast %191 : vector<4x3xf32> to vector<4x3x1xf32>
    %193 = vector.broadcast %192 : vector<4x3x1xf32> to vector<4x3x5xf32>
    %194 = arith.subf %190, %193 : vector<4x3x5xf32>
    %195 = math.exp %194 : vector<4x3x5xf32>
    %196 = vector.shape_cast %170 : vector<3x5xf32> to vector<1x3x5xf32>
    %197 = vector.broadcast %196 : vector<1x3x5xf32> to vector<4x3x5xf32>
    %198 = arith.mulf %195, %197 : vector<4x3x5xf32>
    %cst_55 = arith.constant dense<0.000000e+00> : vector<4x3xf32>
    %199 = vector.multi_reduction <add>, %198, %cst_55 [2] : vector<4x3x5xf32> to vector<4x3xf32>
    %200 = vector.shape_cast %199 : vector<4x3xf32> to vector<4x3x1xf32>
    %cst_56 = arith.constant 1.000000e-30 : f32
    %201 = vector.broadcast %cst_56 : f32 to vector<4x3x1xf32>
    %202 = arith.maximumf %200, %201 : vector<4x3x1xf32>
    %203 = tpu.reciprocal %202 : vector<4x3x1xf32> -> vector<4x3x1xf32>
    %204 = vector.extract_strided_slice %198 {offsets = [0, 0, 0], sizes = [1, 3, 5], strides = [1, 1, 1]} : vector<4x3x5xf32> to vector<1x3x5xf32>
    %205 = vector.shape_cast %204 : vector<1x3x5xf32> to vector<3x5xf32>
    %206 = vector.extract_strided_slice %14 {offsets = [0, 0], sizes = [5, 32], strides = [1, 1]} : vector<5x128xf32> to vector<5x32xf32>
    %cst_57 = arith.constant dense<0.000000e+00> : vector<3x32xf32>
    %207 = tpu.matmul %205, %206, %cst_57 {dimension_numbers = #tpu.dot_dimension_numbers<[1], [0], [0], [1], [0, 0, 1, 1], [], []>} : vector<3x5xf32>, vector<5x32xf32>, vector<3x32xf32> -> vector<3x32xf32>
    %208 = vector.extract_strided_slice %203 {offsets = [0, 0, 0], sizes = [1, 3, 1], strides = [1, 1, 1]} : vector<4x3x1xf32> to vector<1x3x1xf32>
    %209 = vector.shape_cast %208 : vector<1x3x1xf32> to vector<3x1xf32>
    %210 = vector.broadcast %209 : vector<3x1xf32> to vector<3x32xf32>
    %211 = arith.mulf %207, %210 : vector<3x32xf32>
    %212 = vector.extract_strided_slice %198 {offsets = [1, 0, 0], sizes = [1, 3, 5], strides = [1, 1, 1]} : vector<4x3x5xf32> to vector<1x3x5xf32>
    %213 = vector.shape_cast %212 : vector<1x3x5xf32> to vector<3x5xf32>
    %214 = vector.extract_strided_slice %14 {offsets = [0, 32], sizes = [5, 32], strides = [1, 1]} : vector<5x128xf32> to vector<5x32xf32>
    %cst_58 = arith.constant dense<0.000000e+00> : vector<3x32xf32>
    %215 = tpu.matmul %213, %214, %cst_58 {dimension_numbers = #tpu.dot_dimension_numbers<[1], [0], [0], [1], [0, 0, 1, 1], [], []>} : vector<3x5xf32>, vector<5x32xf32>, vector<3x32xf32> -> vector<3x32xf32>
    %216 = vector.extract_strided_slice %203 {offsets = [1, 0, 0], sizes = [1, 3, 1], strides = [1, 1, 1]} : vector<4x3x1xf32> to vector<1x3x1xf32>
    %217 = vector.shape_cast %216 : vector<1x3x1xf32> to vector<3x1xf32>
    %218 = vector.broadcast %217 : vector<3x1xf32> to vector<3x32xf32>
    %219 = arith.mulf %215, %218 : vector<3x32xf32>
    %220 = vector.extract_strided_slice %198 {offsets = [2, 0, 0], sizes = [1, 3, 5], strides = [1, 1, 1]} : vector<4x3x5xf32> to vector<1x3x5xf32>
    %221 = vector.shape_cast %220 : vector<1x3x5xf32> to vector<3x5xf32>
    %222 = vector.extract_strided_slice %14 {offsets = [0, 64], sizes = [5, 32], strides = [1, 1]} : vector<5x128xf32> to vector<5x32xf32>
    %cst_59 = arith.constant dense<0.000000e+00> : vector<3x32xf32>
    %223 = tpu.matmul %221, %222, %cst_59 {dimension_numbers = #tpu.dot_dimension_numbers<[1], [0], [0], [1], [0, 0, 1, 1], [], []>} : vector<3x5xf32>, vector<5x32xf32>, vector<3x32xf32> -> vector<3x32xf32>
    %224 = vector.extract_strided_slice %203 {offsets = [2, 0, 0], sizes = [1, 3, 1], strides = [1, 1, 1]} : vector<4x3x1xf32> to vector<1x3x1xf32>
    %225 = vector.shape_cast %224 : vector<1x3x1xf32> to vector<3x1xf32>
    %226 = vector.broadcast %225 : vector<3x1xf32> to vector<3x32xf32>
    %227 = arith.mulf %223, %226 : vector<3x32xf32>
    %228 = vector.extract_strided_slice %198 {offsets = [3, 0, 0], sizes = [1, 3, 5], strides = [1, 1, 1]} : vector<4x3x5xf32> to vector<1x3x5xf32>
    %229 = vector.shape_cast %228 : vector<1x3x5xf32> to vector<3x5xf32>
    %230 = vector.extract_strided_slice %14 {offsets = [0, 96], sizes = [5, 32], strides = [1, 1]} : vector<5x128xf32> to vector<5x32xf32>
    %cst_60 = arith.constant dense<0.000000e+00> : vector<3x32xf32>
    %231 = tpu.matmul %229, %230, %cst_60 {dimension_numbers = #tpu.dot_dimension_numbers<[1], [0], [0], [1], [0, 0, 1, 1], [], []>} : vector<3x5xf32>, vector<5x32xf32>, vector<3x32xf32> -> vector<3x32xf32>
    %232 = vector.extract_strided_slice %203 {offsets = [3, 0, 0], sizes = [1, 3, 1], strides = [1, 1, 1]} : vector<4x3x1xf32> to vector<1x3x1xf32>
    %233 = vector.shape_cast %232 : vector<1x3x1xf32> to vector<3x1xf32>
    %234 = vector.broadcast %233 : vector<3x1xf32> to vector<3x32xf32>
    %235 = arith.mulf %231, %234 : vector<3x32xf32>
    %236 = tpu.concatenate %211, %219, %227, %235 in 1 : vector<3x32xf32>, vector<3x32xf32>, vector<3x32xf32>, vector<3x32xf32> -> vector<3x128xf32>
    %c0_61 = arith.constant 0 : index
    %c0_62 = arith.constant 0 : index
    %c0_63 = arith.constant 0 : index
    %237 = vector.load %arg10[%c0_61, %c0_62, %c0_63] : memref<1x3x3xf32, #tpu.memory_space<vmem>>, vector<1x3x3xf32>
    %238 = vector.shape_cast %237 : vector<1x3x3xf32> to vector<3x3xf32>
    %239 = tpu.transpose %26, [1, 0] : vector<3x4xf32> -> vector<4x3xf32>
    %240 = tpu.transpose %29, [1, 0] : vector<3x4xf32> -> vector<4x3xf32>
    %241 = vector.shape_cast %240 : vector<4x3xf32> to vector<4x3x1xf32>
    %242 = vector.shape_cast %239 : vector<4x3xf32> to vector<4x1x3xf32>
    %243 = vector.broadcast %241 : vector<4x3x1xf32> to vector<4x3x3xf32>
    %244 = vector.broadcast %242 : vector<4x1x3xf32> to vector<4x3x3xf32>
    %245 = arith.addf %243, %244 : vector<4x3x3xf32>
    %cst_64 = arith.constant 0.000000e+00 : f32
    %246 = vector.broadcast %cst_64 : f32 to vector<4x3x3xf32>
    %247 = arith.cmpf ogt, %245, %246 : vector<4x3x3xf32>
    %cst_65 = arith.constant 2.000000e-01 : f32
    %248 = vector.broadcast %cst_65 : f32 to vector<4x3x3xf32>
    %249 = arith.mulf %248, %245 : vector<4x3x3xf32>
    %250 = arith.select %247, %245, %249 : vector<4x3x3xi1>, vector<4x3x3xf32>
    %cst_66 = arith.constant 0.000000e+00 : f32
    %251 = vector.broadcast %cst_66 : f32 to vector<3x3xf32>
    %252 = arith.cmpf ogt, %238, %251 : vector<3x3xf32>
    %cst_67 = arith.constant 0.000000e+00 : f32
    %cst_68 = arith.constant -1.000000e+30 : f32
    %253 = vector.broadcast %cst_67 : f32 to vector<3x3xf32>
    %254 = vector.broadcast %cst_68 : f32 to vector<3x3xf32>
    %255 = arith.select %252, %253, %254 : vector<3x3xi1>, vector<3x3xf32>
    %256 = vector.shape_cast %255 : vector<3x3xf32> to vector<1x3x3xf32>
    %257 = vector.broadcast %256 : vector<1x3x3xf32> to vector<4x3x3xf32>
    %258 = arith.addf %250, %257 : vector<4x3x3xf32>
    %cst_69 = arith.constant dense<0xFF800000> : vector<4x3xf32>
    %259 = vector.multi_reduction <maximumf>, %258, %cst_69 [2] : vector<4x3x3xf32> to vector<4x3xf32>
    %260 = vector.shape_cast %259 : vector<4x3xf32> to vector<4x3x1xf32>
    %261 = vector.broadcast %260 : vector<4x3x1xf32> to vector<4x3x3xf32>
    %262 = arith.subf %258, %261 : vector<4x3x3xf32>
    %263 = math.exp %262 : vector<4x3x3xf32>
    %264 = vector.shape_cast %238 : vector<3x3xf32> to vector<1x3x3xf32>
    %265 = vector.broadcast %264 : vector<1x3x3xf32> to vector<4x3x3xf32>
    %266 = arith.mulf %263, %265 : vector<4x3x3xf32>
    %cst_70 = arith.constant dense<0.000000e+00> : vector<4x3xf32>
    %267 = vector.multi_reduction <add>, %266, %cst_70 [2] : vector<4x3x3xf32> to vector<4x3xf32>
    %268 = vector.shape_cast %267 : vector<4x3xf32> to vector<4x3x1xf32>
    %cst_71 = arith.constant 1.000000e-30 : f32
    %269 = vector.broadcast %cst_71 : f32 to vector<4x3x1xf32>
    %270 = arith.maximumf %268, %269 : vector<4x3x1xf32>
    %271 = tpu.reciprocal %270 : vector<4x3x1xf32> -> vector<4x3x1xf32>
    %272 = vector.extract_strided_slice %266 {offsets = [0, 0, 0], sizes = [1, 3, 3], strides = [1, 1, 1]} : vector<4x3x3xf32> to vector<1x3x3xf32>
    %273 = vector.shape_cast %272 : vector<1x3x3xf32> to vector<3x3xf32>
    %274 = vector.extract_strided_slice %23 {offsets = [0, 0], sizes = [3, 32], strides = [1, 1]} : vector<3x128xf32> to vector<3x32xf32>
    %cst_72 = arith.constant dense<0.000000e+00> : vector<3x32xf32>
    %275 = tpu.matmul %273, %274, %cst_72 {dimension_numbers = #tpu.dot_dimension_numbers<[1], [0], [0], [1], [0, 0, 1, 1], [], []>} : vector<3x3xf32>, vector<3x32xf32>, vector<3x32xf32> -> vector<3x32xf32>
    %276 = vector.extract_strided_slice %271 {offsets = [0, 0, 0], sizes = [1, 3, 1], strides = [1, 1, 1]} : vector<4x3x1xf32> to vector<1x3x1xf32>
    %277 = vector.shape_cast %276 : vector<1x3x1xf32> to vector<3x1xf32>
    %278 = vector.broadcast %277 : vector<3x1xf32> to vector<3x32xf32>
    %279 = arith.mulf %275, %278 : vector<3x32xf32>
    %280 = vector.extract_strided_slice %266 {offsets = [1, 0, 0], sizes = [1, 3, 3], strides = [1, 1, 1]} : vector<4x3x3xf32> to vector<1x3x3xf32>
    %281 = vector.shape_cast %280 : vector<1x3x3xf32> to vector<3x3xf32>
    %282 = vector.extract_strided_slice %23 {offsets = [0, 32], sizes = [3, 32], strides = [1, 1]} : vector<3x128xf32> to vector<3x32xf32>
    %cst_73 = arith.constant dense<0.000000e+00> : vector<3x32xf32>
    %283 = tpu.matmul %281, %282, %cst_73 {dimension_numbers = #tpu.dot_dimension_numbers<[1], [0], [0], [1], [0, 0, 1, 1], [], []>} : vector<3x3xf32>, vector<3x32xf32>, vector<3x32xf32> -> vector<3x32xf32>
    %284 = vector.extract_strided_slice %271 {offsets = [1, 0, 0], sizes = [1, 3, 1], strides = [1, 1, 1]} : vector<4x3x1xf32> to vector<1x3x1xf32>
    %285 = vector.shape_cast %284 : vector<1x3x1xf32> to vector<3x1xf32>
    %286 = vector.broadcast %285 : vector<3x1xf32> to vector<3x32xf32>
    %287 = arith.mulf %283, %286 : vector<3x32xf32>
    %288 = vector.extract_strided_slice %266 {offsets = [2, 0, 0], sizes = [1, 3, 3], strides = [1, 1, 1]} : vector<4x3x3xf32> to vector<1x3x3xf32>
    %289 = vector.shape_cast %288 : vector<1x3x3xf32> to vector<3x3xf32>
    %290 = vector.extract_strided_slice %23 {offsets = [0, 64], sizes = [3, 32], strides = [1, 1]} : vector<3x128xf32> to vector<3x32xf32>
    %cst_74 = arith.constant dense<0.000000e+00> : vector<3x32xf32>
    %291 = tpu.matmul %289, %290, %cst_74 {dimension_numbers = #tpu.dot_dimension_numbers<[1], [0], [0], [1], [0, 0, 1, 1], [], []>} : vector<3x3xf32>, vector<3x32xf32>, vector<3x32xf32> -> vector<3x32xf32>
    %292 = vector.extract_strided_slice %271 {offsets = [2, 0, 0], sizes = [1, 3, 1], strides = [1, 1, 1]} : vector<4x3x1xf32> to vector<1x3x1xf32>
    %293 = vector.shape_cast %292 : vector<1x3x1xf32> to vector<3x1xf32>
    %294 = vector.broadcast %293 : vector<3x1xf32> to vector<3x32xf32>
    %295 = arith.mulf %291, %294 : vector<3x32xf32>
    %296 = vector.extract_strided_slice %266 {offsets = [3, 0, 0], sizes = [1, 3, 3], strides = [1, 1, 1]} : vector<4x3x3xf32> to vector<1x3x3xf32>
    %297 = vector.shape_cast %296 : vector<1x3x3xf32> to vector<3x3xf32>
    %298 = vector.extract_strided_slice %23 {offsets = [0, 96], sizes = [3, 32], strides = [1, 1]} : vector<3x128xf32> to vector<3x32xf32>
    %cst_75 = arith.constant dense<0.000000e+00> : vector<3x32xf32>
    %299 = tpu.matmul %297, %298, %cst_75 {dimension_numbers = #tpu.dot_dimension_numbers<[1], [0], [0], [1], [0, 0, 1, 1], [], []>} : vector<3x3xf32>, vector<3x32xf32>, vector<3x32xf32> -> vector<3x32xf32>
    %300 = vector.extract_strided_slice %271 {offsets = [3, 0, 0], sizes = [1, 3, 1], strides = [1, 1, 1]} : vector<4x3x1xf32> to vector<1x3x1xf32>
    %301 = vector.shape_cast %300 : vector<1x3x1xf32> to vector<3x1xf32>
    %302 = vector.broadcast %301 : vector<3x1xf32> to vector<3x32xf32>
    %303 = arith.mulf %299, %302 : vector<3x32xf32>
    %304 = tpu.concatenate %279, %287, %295, %303 in 1 : vector<3x32xf32>, vector<3x32xf32>, vector<3x32xf32>, vector<3x32xf32> -> vector<3x128xf32>
    %c0_76 = arith.constant 0 : index
    %c0_77 = arith.constant 0 : index
    %c0_78 = arith.constant 0 : index
    %305 = vector.load %arg11[%c0_76, %c0_77, %c0_78] : memref<1x1x5xf32, #tpu.memory_space<vmem>>, vector<1x1x5xf32>
    %306 = vector.shape_cast %305 : vector<1x1x5xf32> to vector<1x5xf32>
    %307 = tpu.transpose %18, [1, 0] : vector<5x4xf32> -> vector<4x5xf32>
    %308 = tpu.transpose %31, [1, 0] : vector<1x4xf32> -> vector<4x1xf32>
    %309 = vector.shape_cast %308 : vector<4x1xf32> to vector<4x1x1xf32>
    %310 = vector.shape_cast %307 : vector<4x5xf32> to vector<4x1x5xf32>
    %311 = vector.broadcast %309 : vector<4x1x1xf32> to vector<4x1x5xf32>
    %312 = arith.addf %311, %310 : vector<4x1x5xf32>
    %cst_79 = arith.constant 0.000000e+00 : f32
    %313 = vector.broadcast %cst_79 : f32 to vector<4x1x5xf32>
    %314 = arith.cmpf ogt, %312, %313 : vector<4x1x5xf32>
    %cst_80 = arith.constant 2.000000e-01 : f32
    %315 = vector.broadcast %cst_80 : f32 to vector<4x1x5xf32>
    %316 = arith.mulf %315, %312 : vector<4x1x5xf32>
    %317 = arith.select %314, %312, %316 : vector<4x1x5xi1>, vector<4x1x5xf32>
    %cst_81 = arith.constant 0.000000e+00 : f32
    %318 = vector.broadcast %cst_81 : f32 to vector<1x5xf32>
    %319 = arith.cmpf ogt, %306, %318 : vector<1x5xf32>
    %cst_82 = arith.constant 0.000000e+00 : f32
    %cst_83 = arith.constant -1.000000e+30 : f32
    %320 = vector.broadcast %cst_82 : f32 to vector<1x5xf32>
    %321 = vector.broadcast %cst_83 : f32 to vector<1x5xf32>
    %322 = arith.select %319, %320, %321 : vector<1x5xi1>, vector<1x5xf32>
    %323 = vector.shape_cast %322 : vector<1x5xf32> to vector<1x1x5xf32>
    %324 = vector.broadcast %323 : vector<1x1x5xf32> to vector<4x1x5xf32>
    %325 = arith.addf %317, %324 : vector<4x1x5xf32>
    %cst_84 = arith.constant dense<0xFF800000> : vector<4x1xf32>
    %326 = vector.multi_reduction <maximumf>, %325, %cst_84 [2] : vector<4x1x5xf32> to vector<4x1xf32>
    %327 = vector.shape_cast %326 : vector<4x1xf32> to vector<4x1x1xf32>
    %328 = vector.broadcast %327 : vector<4x1x1xf32> to vector<4x1x5xf32>
    %329 = arith.subf %325, %328 : vector<4x1x5xf32>
    %330 = math.exp %329 : vector<4x1x5xf32>
    %331 = vector.shape_cast %306 : vector<1x5xf32> to vector<1x1x5xf32>
    %332 = vector.broadcast %331 : vector<1x1x5xf32> to vector<4x1x5xf32>
    %333 = arith.mulf %330, %332 : vector<4x1x5xf32>
    %cst_85 = arith.constant dense<0.000000e+00> : vector<4x1xf32>
    %334 = vector.multi_reduction <add>, %333, %cst_85 [2] : vector<4x1x5xf32> to vector<4x1xf32>
    %335 = vector.shape_cast %334 : vector<4x1xf32> to vector<4x1x1xf32>
    %cst_86 = arith.constant 1.000000e-30 : f32
    %336 = vector.broadcast %cst_86 : f32 to vector<4x1x1xf32>
    %337 = arith.maximumf %335, %336 : vector<4x1x1xf32>
    %338 = tpu.reciprocal %337 : vector<4x1x1xf32> -> vector<4x1x1xf32>
    %339 = vector.extract_strided_slice %333 {offsets = [0, 0, 0], sizes = [1, 1, 5], strides = [1, 1, 1]} : vector<4x1x5xf32> to vector<1x1x5xf32>
    %340 = vector.shape_cast %339 : vector<1x1x5xf32> to vector<1x5xf32>
    %341 = vector.extract_strided_slice %15 {offsets = [0, 0], sizes = [5, 32], strides = [1, 1]} : vector<5x128xf32> to vector<5x32xf32>
    %cst_87 = arith.constant dense<0.000000e+00> : vector<1x32xf32>
    %342 = tpu.matmul %340, %341, %cst_87 {dimension_numbers = #tpu.dot_dimension_numbers<[1], [0], [0], [1], [0, 0, 1, 1], [], []>} : vector<1x5xf32>, vector<5x32xf32>, vector<1x32xf32> -> vector<1x32xf32>
    %343 = vector.extract_strided_slice %338 {offsets = [0, 0, 0], sizes = [1, 1, 1], strides = [1, 1, 1]} : vector<4x1x1xf32> to vector<1x1x1xf32>
    %344 = vector.shape_cast %343 : vector<1x1x1xf32> to vector<1x1xf32>
    %345 = vector.broadcast %344 : vector<1x1xf32> to vector<1x32xf32>
    %346 = arith.mulf %342, %345 : vector<1x32xf32>
    %347 = vector.extract_strided_slice %333 {offsets = [1, 0, 0], sizes = [1, 1, 5], strides = [1, 1, 1]} : vector<4x1x5xf32> to vector<1x1x5xf32>
    %348 = vector.shape_cast %347 : vector<1x1x5xf32> to vector<1x5xf32>
    %349 = vector.extract_strided_slice %15 {offsets = [0, 32], sizes = [5, 32], strides = [1, 1]} : vector<5x128xf32> to vector<5x32xf32>
    %cst_88 = arith.constant dense<0.000000e+00> : vector<1x32xf32>
    %350 = tpu.matmul %348, %349, %cst_88 {dimension_numbers = #tpu.dot_dimension_numbers<[1], [0], [0], [1], [0, 0, 1, 1], [], []>} : vector<1x5xf32>, vector<5x32xf32>, vector<1x32xf32> -> vector<1x32xf32>
    %351 = vector.extract_strided_slice %338 {offsets = [1, 0, 0], sizes = [1, 1, 1], strides = [1, 1, 1]} : vector<4x1x1xf32> to vector<1x1x1xf32>
    %352 = vector.shape_cast %351 : vector<1x1x1xf32> to vector<1x1xf32>
    %353 = vector.broadcast %352 : vector<1x1xf32> to vector<1x32xf32>
    %354 = arith.mulf %350, %353 : vector<1x32xf32>
    %355 = vector.extract_strided_slice %333 {offsets = [2, 0, 0], sizes = [1, 1, 5], strides = [1, 1, 1]} : vector<4x1x5xf32> to vector<1x1x5xf32>
    %356 = vector.shape_cast %355 : vector<1x1x5xf32> to vector<1x5xf32>
    %357 = vector.extract_strided_slice %15 {offsets = [0, 64], sizes = [5, 32], strides = [1, 1]} : vector<5x128xf32> to vector<5x32xf32>
    %cst_89 = arith.constant dense<0.000000e+00> : vector<1x32xf32>
    %358 = tpu.matmul %356, %357, %cst_89 {dimension_numbers = #tpu.dot_dimension_numbers<[1], [0], [0], [1], [0, 0, 1, 1], [], []>} : vector<1x5xf32>, vector<5x32xf32>, vector<1x32xf32> -> vector<1x32xf32>
    %359 = vector.extract_strided_slice %338 {offsets = [2, 0, 0], sizes = [1, 1, 1], strides = [1, 1, 1]} : vector<4x1x1xf32> to vector<1x1x1xf32>
    %360 = vector.shape_cast %359 : vector<1x1x1xf32> to vector<1x1xf32>
    %361 = vector.broadcast %360 : vector<1x1xf32> to vector<1x32xf32>
    %362 = arith.mulf %358, %361 : vector<1x32xf32>
    %363 = vector.extract_strided_slice %333 {offsets = [3, 0, 0], sizes = [1, 1, 5], strides = [1, 1, 1]} : vector<4x1x5xf32> to vector<1x1x5xf32>
    %364 = vector.shape_cast %363 : vector<1x1x5xf32> to vector<1x5xf32>
    %365 = vector.extract_strided_slice %15 {offsets = [0, 96], sizes = [5, 32], strides = [1, 1]} : vector<5x128xf32> to vector<5x32xf32>
    %cst_90 = arith.constant dense<0.000000e+00> : vector<1x32xf32>
    %366 = tpu.matmul %364, %365, %cst_90 {dimension_numbers = #tpu.dot_dimension_numbers<[1], [0], [0], [1], [0, 0, 1, 1], [], []>} : vector<1x5xf32>, vector<5x32xf32>, vector<1x32xf32> -> vector<1x32xf32>
    %367 = vector.extract_strided_slice %338 {offsets = [3, 0, 0], sizes = [1, 1, 1], strides = [1, 1, 1]} : vector<4x1x1xf32> to vector<1x1x1xf32>
    %368 = vector.shape_cast %367 : vector<1x1x1xf32> to vector<1x1xf32>
    %369 = vector.broadcast %368 : vector<1x1xf32> to vector<1x32xf32>
    %370 = arith.mulf %366, %369 : vector<1x32xf32>
    %371 = tpu.concatenate %346, %354, %362, %370 in 1 : vector<1x32xf32>, vector<1x32xf32>, vector<1x32xf32>, vector<1x32xf32> -> vector<1x128xf32>
    %c0_91 = arith.constant 0 : index
    %c0_92 = arith.constant 0 : index
    %c0_93 = arith.constant 0 : index
    %372 = vector.load %arg12[%c0_91, %c0_92, %c0_93] : memref<1x1x3xf32, #tpu.memory_space<vmem>>, vector<1x1x3xf32>
    %373 = vector.shape_cast %372 : vector<1x1x3xf32> to vector<1x3xf32>
    %374 = tpu.transpose %27, [1, 0] : vector<3x4xf32> -> vector<4x3xf32>
    %375 = tpu.transpose %32, [1, 0] : vector<1x4xf32> -> vector<4x1xf32>
    %376 = vector.shape_cast %375 : vector<4x1xf32> to vector<4x1x1xf32>
    %377 = vector.shape_cast %374 : vector<4x3xf32> to vector<4x1x3xf32>
    %378 = vector.broadcast %376 : vector<4x1x1xf32> to vector<4x1x3xf32>
    %379 = arith.addf %378, %377 : vector<4x1x3xf32>
    %cst_94 = arith.constant 0.000000e+00 : f32
    %380 = vector.broadcast %cst_94 : f32 to vector<4x1x3xf32>
    %381 = arith.cmpf ogt, %379, %380 : vector<4x1x3xf32>
    %cst_95 = arith.constant 2.000000e-01 : f32
    %382 = vector.broadcast %cst_95 : f32 to vector<4x1x3xf32>
    %383 = arith.mulf %382, %379 : vector<4x1x3xf32>
    %384 = arith.select %381, %379, %383 : vector<4x1x3xi1>, vector<4x1x3xf32>
    %cst_96 = arith.constant 0.000000e+00 : f32
    %385 = vector.broadcast %cst_96 : f32 to vector<1x3xf32>
    %386 = arith.cmpf ogt, %373, %385 : vector<1x3xf32>
    %cst_97 = arith.constant 0.000000e+00 : f32
    %cst_98 = arith.constant -1.000000e+30 : f32
    %387 = vector.broadcast %cst_97 : f32 to vector<1x3xf32>
    %388 = vector.broadcast %cst_98 : f32 to vector<1x3xf32>
    %389 = arith.select %386, %387, %388 : vector<1x3xi1>, vector<1x3xf32>
    %390 = vector.shape_cast %389 : vector<1x3xf32> to vector<1x1x3xf32>
    %391 = vector.broadcast %390 : vector<1x1x3xf32> to vector<4x1x3xf32>
    %392 = arith.addf %384, %391 : vector<4x1x3xf32>
    %cst_99 = arith.constant dense<0xFF800000> : vector<4x1xf32>
    %393 = vector.multi_reduction <maximumf>, %392, %cst_99 [2] : vector<4x1x3xf32> to vector<4x1xf32>
    %394 = vector.shape_cast %393 : vector<4x1xf32> to vector<4x1x1xf32>
    %395 = vector.broadcast %394 : vector<4x1x1xf32> to vector<4x1x3xf32>
    %396 = arith.subf %392, %395 : vector<4x1x3xf32>
    %397 = math.exp %396 : vector<4x1x3xf32>
    %398 = vector.shape_cast %373 : vector<1x3xf32> to vector<1x1x3xf32>
    %399 = vector.broadcast %398 : vector<1x1x3xf32> to vector<4x1x3xf32>
    %400 = arith.mulf %397, %399 : vector<4x1x3xf32>
    %cst_100 = arith.constant dense<0.000000e+00> : vector<4x1xf32>
    %401 = vector.multi_reduction <add>, %400, %cst_100 [2] : vector<4x1x3xf32> to vector<4x1xf32>
    %402 = vector.shape_cast %401 : vector<4x1xf32> to vector<4x1x1xf32>
    %cst_101 = arith.constant 1.000000e-30 : f32
    %403 = vector.broadcast %cst_101 : f32 to vector<4x1x1xf32>
    %404 = arith.maximumf %402, %403 : vector<4x1x1xf32>
    %405 = tpu.reciprocal %404 : vector<4x1x1xf32> -> vector<4x1x1xf32>
    %406 = vector.extract_strided_slice %400 {offsets = [0, 0, 0], sizes = [1, 1, 3], strides = [1, 1, 1]} : vector<4x1x3xf32> to vector<1x1x3xf32>
    %407 = vector.shape_cast %406 : vector<1x1x3xf32> to vector<1x3xf32>
    %408 = vector.extract_strided_slice %24 {offsets = [0, 0], sizes = [3, 32], strides = [1, 1]} : vector<3x128xf32> to vector<3x32xf32>
    %cst_102 = arith.constant dense<0.000000e+00> : vector<1x32xf32>
    %409 = tpu.matmul %407, %408, %cst_102 {dimension_numbers = #tpu.dot_dimension_numbers<[1], [0], [0], [1], [0, 0, 1, 1], [], []>} : vector<1x3xf32>, vector<3x32xf32>, vector<1x32xf32> -> vector<1x32xf32>
    %410 = vector.extract_strided_slice %405 {offsets = [0, 0, 0], sizes = [1, 1, 1], strides = [1, 1, 1]} : vector<4x1x1xf32> to vector<1x1x1xf32>
    %411 = vector.shape_cast %410 : vector<1x1x1xf32> to vector<1x1xf32>
    %412 = vector.broadcast %411 : vector<1x1xf32> to vector<1x32xf32>
    %413 = arith.mulf %409, %412 : vector<1x32xf32>
    %414 = vector.extract_strided_slice %400 {offsets = [1, 0, 0], sizes = [1, 1, 3], strides = [1, 1, 1]} : vector<4x1x3xf32> to vector<1x1x3xf32>
    %415 = vector.shape_cast %414 : vector<1x1x3xf32> to vector<1x3xf32>
    %416 = vector.extract_strided_slice %24 {offsets = [0, 32], sizes = [3, 32], strides = [1, 1]} : vector<3x128xf32> to vector<3x32xf32>
    %cst_103 = arith.constant dense<0.000000e+00> : vector<1x32xf32>
    %417 = tpu.matmul %415, %416, %cst_103 {dimension_numbers = #tpu.dot_dimension_numbers<[1], [0], [0], [1], [0, 0, 1, 1], [], []>} : vector<1x3xf32>, vector<3x32xf32>, vector<1x32xf32> -> vector<1x32xf32>
    %418 = vector.extract_strided_slice %405 {offsets = [1, 0, 0], sizes = [1, 1, 1], strides = [1, 1, 1]} : vector<4x1x1xf32> to vector<1x1x1xf32>
    %419 = vector.shape_cast %418 : vector<1x1x1xf32> to vector<1x1xf32>
    %420 = vector.broadcast %419 : vector<1x1xf32> to vector<1x32xf32>
    %421 = arith.mulf %417, %420 : vector<1x32xf32>
    %422 = vector.extract_strided_slice %400 {offsets = [2, 0, 0], sizes = [1, 1, 3], strides = [1, 1, 1]} : vector<4x1x3xf32> to vector<1x1x3xf32>
    %423 = vector.shape_cast %422 : vector<1x1x3xf32> to vector<1x3xf32>
    %424 = vector.extract_strided_slice %24 {offsets = [0, 64], sizes = [3, 32], strides = [1, 1]} : vector<3x128xf32> to vector<3x32xf32>
    %cst_104 = arith.constant dense<0.000000e+00> : vector<1x32xf32>
    %425 = tpu.matmul %423, %424, %cst_104 {dimension_numbers = #tpu.dot_dimension_numbers<[1], [0], [0], [1], [0, 0, 1, 1], [], []>} : vector<1x3xf32>, vector<3x32xf32>, vector<1x32xf32> -> vector<1x32xf32>
    %426 = vector.extract_strided_slice %405 {offsets = [2, 0, 0], sizes = [1, 1, 1], strides = [1, 1, 1]} : vector<4x1x1xf32> to vector<1x1x1xf32>
    %427 = vector.shape_cast %426 : vector<1x1x1xf32> to vector<1x1xf32>
    %428 = vector.broadcast %427 : vector<1x1xf32> to vector<1x32xf32>
    %429 = arith.mulf %425, %428 : vector<1x32xf32>
    %430 = vector.extract_strided_slice %400 {offsets = [3, 0, 0], sizes = [1, 1, 3], strides = [1, 1, 1]} : vector<4x1x3xf32> to vector<1x1x3xf32>
    %431 = vector.shape_cast %430 : vector<1x1x3xf32> to vector<1x3xf32>
    %432 = vector.extract_strided_slice %24 {offsets = [0, 96], sizes = [3, 32], strides = [1, 1]} : vector<3x128xf32> to vector<3x32xf32>
    %cst_105 = arith.constant dense<0.000000e+00> : vector<1x32xf32>
    %433 = tpu.matmul %431, %432, %cst_105 {dimension_numbers = #tpu.dot_dimension_numbers<[1], [0], [0], [1], [0, 0, 1, 1], [], []>} : vector<1x3xf32>, vector<3x32xf32>, vector<1x32xf32> -> vector<1x32xf32>
    %434 = vector.extract_strided_slice %405 {offsets = [3, 0, 0], sizes = [1, 1, 1], strides = [1, 1, 1]} : vector<4x1x1xf32> to vector<1x1x1xf32>
    %435 = vector.shape_cast %434 : vector<1x1x1xf32> to vector<1x1xf32>
    %436 = vector.broadcast %435 : vector<1x1xf32> to vector<1x32xf32>
    %437 = arith.mulf %433, %436 : vector<1x32xf32>
    %438 = tpu.concatenate %413, %421, %429, %437 in 1 : vector<1x32xf32>, vector<1x32xf32>, vector<1x32xf32>, vector<1x32xf32> -> vector<1x128xf32>
    %439 = arith.addf %12, %100 : vector<5x128xf32>
    %440 = arith.addf %439, %168 : vector<5x128xf32>
    %441 = arith.addf %21, %236 : vector<3x128xf32>
    %442 = arith.addf %441, %304 : vector<3x128xf32>
    %443 = arith.addf %30, %371 : vector<1x128xf32>
    %444 = arith.addf %443, %438 : vector<1x128xf32>
    %cst_106 = arith.constant 0.000000e+00 : f32
    %445 = vector.broadcast %cst_106 : f32 to vector<5x128xf32>
    %446 = arith.maximumf %440, %445 : vector<5x128xf32>
    %cst_107 = arith.constant 0.000000e+00 : f32
    %447 = vector.broadcast %cst_107 : f32 to vector<3x128xf32>
    %448 = arith.maximumf %442, %447 : vector<3x128xf32>
    %cst_108 = arith.constant 0.000000e+00 : f32
    %449 = vector.broadcast %cst_108 : f32 to vector<1x128xf32>
    %450 = arith.maximumf %444, %449 : vector<1x128xf32>
    %c0_109 = arith.constant 0 : index
    %c0_110 = arith.constant 0 : index
    %c0_111 = arith.constant 0 : index
    %451 = vector.load %arg13[%c0_109, %c0_110, %c0_111] : memref<1x5x128xf32, #tpu.memory_space<vmem>>, vector<1x5x128xf32>
    %452 = vector.shape_cast %451 : vector<1x5x128xf32> to vector<5x128xf32>
    %453 = vector.shape_cast %446 : vector<5x128xf32> to vector<1x5x128xf32>
    tpu.vector_store %arg13[%c0_109, %c0_110, %c0_111], %453 {strides = array<i32>} : memref<1x5x128xf32, #tpu.memory_space<vmem>>, vector<1x5x128xf32>,
    %c0_112 = arith.constant 0 : index
    %c0_113 = arith.constant 0 : index
    %c0_114 = arith.constant 0 : index
    %454 = vector.load %arg14[%c0_112, %c0_113, %c0_114] : memref<1x3x128xf32, #tpu.memory_space<vmem>>, vector<1x3x128xf32>
    %455 = vector.shape_cast %454 : vector<1x3x128xf32> to vector<3x128xf32>
    %456 = vector.shape_cast %448 : vector<3x128xf32> to vector<1x3x128xf32>
    tpu.vector_store %arg14[%c0_112, %c0_113, %c0_114], %456 {strides = array<i32>} : memref<1x3x128xf32, #tpu.memory_space<vmem>>, vector<1x3x128xf32>,
    %c0_115 = arith.constant 0 : index
    %c0_116 = arith.constant 0 : index
    %c0_117 = arith.constant 0 : index
    %457 = vector.load %arg15[%c0_115, %c0_116, %c0_117] : memref<1x1x128xf32, #tpu.memory_space<vmem>>, vector<1x1x128xf32>
    %458 = vector.shape_cast %457 : vector<1x1x128xf32> to vector<1x128xf32>
    %459 = vector.shape_cast %450 : vector<1x128xf32> to vector<1x1x128xf32>
    tpu.vector_store %arg15[%c0_115, %c0_116, %c0_117], %459 {strides = array<i32>} : memref<1x1x128xf32, #tpu.memory_space<vmem>>, vector<1x1x128xf32>,
    return
  }
  func.func @transform_0(%arg0: i32) -> (i32, i32, i32) {
    %c0_i32 = arith.constant 0 : i32
    %c0_i32_0 = arith.constant 0 : i32
    %c0_i32_1 = arith.constant 0 : i32
    return %arg0, %c0_i32, %c0_i32_0 : i32, i32, i32
  }
  func.func @transform_1(%arg0: i32) -> (i32, i32, i32) {
    %c0_i32 = arith.constant 0 : i32
    %c0_i32_0 = arith.constant 0 : i32
    %c0_i32_1 = arith.constant 0 : i32
    return %arg0, %c0_i32, %c0_i32_0 : i32, i32, i32
  }
  func.func @transform_2(%arg0: i32) -> (i32, i32, i32) {
    %c0_i32 = arith.constant 0 : i32
    %c0_i32_0 = arith.constant 0 : i32
    %c0_i32_1 = arith.constant 0 : i32
    return %arg0, %c0_i32, %c0_i32_0 : i32, i32, i32
  }
  func.func @transform_3(%arg0: i32) -> (i32, i32) {
    %c0_i32 = arith.constant 0 : i32
    %c0_i32_0 = arith.constant 0 : i32
    %c0_i32_1 = arith.constant 0 : i32
    return %c0_i32, %c0_i32_0 : i32, i32
  }
  func.func @transform_4(%arg0: i32) -> (i32, i32) {
    %c0_i32 = arith.constant 0 : i32
    %c0_i32_0 = arith.constant 0 : i32
    %c0_i32_1 = arith.constant 0 : i32
    return %c0_i32, %c0_i32_0 : i32, i32
  }
  func.func @transform_5(%arg0: i32) -> (i32, i32) {
    %c0_i32 = arith.constant 0 : i32
    %c0_i32_0 = arith.constant 0 : i32
    %c0_i32_1 = arith.constant 0 : i32
    return %c0_i32, %c0_i32_0 : i32, i32
  }
  func.func @transform_6(%arg0: i32) -> (i32, i32, i32) {
    %c0_i32 = arith.constant 0 : i32
    %c0_i32_0 = arith.constant 0 : i32
    %c0_i32_1 = arith.constant 0 : i32
    return %arg0, %c0_i32, %c0_i32_0 : i32, i32, i32
  }
  func.func @transform_7(%arg0: i32) -> (i32, i32, i32) {
    %c0_i32 = arith.constant 0 : i32
    %c0_i32_0 = arith.constant 0 : i32
    %c0_i32_1 = arith.constant 0 : i32
    return %arg0, %c0_i32, %c0_i32_0 : i32, i32, i32
  }
  func.func @transform_8(%arg0: i32) -> (i32, i32, i32) {
    %c0_i32 = arith.constant 0 : i32
    %c0_i32_0 = arith.constant 0 : i32
    %c0_i32_1 = arith.constant 0 : i32
    return %arg0, %c0_i32, %c0_i32_0 : i32, i32, i32
  }
  func.func @transform_9(%arg0: i32) -> (i32, i32, i32) {
    %c0_i32 = arith.constant 0 : i32
    %c0_i32_0 = arith.constant 0 : i32
    %c0_i32_1 = arith.constant 0 : i32
    return %arg0, %c0_i32, %c0_i32_0 : i32, i32, i32
  }
  func.func @transform_10(%arg0: i32) -> (i32, i32, i32) {
    %c0_i32 = arith.constant 0 : i32
    %c0_i32_0 = arith.constant 0 : i32
    %c0_i32_1 = arith.constant 0 : i32
    return %arg0, %c0_i32, %c0_i32_0 : i32, i32, i32
  }
  func.func @transform_11(%arg0: i32) -> (i32, i32, i32) {
    %c0_i32 = arith.constant 0 : i32
    %c0_i32_0 = arith.constant 0 : i32
    %c0_i32_1 = arith.constant 0 : i32
    return %arg0, %c0_i32, %c0_i32_0 : i32, i32, i32
  }
  func.func @transform_12(%arg0: i32) -> (i32, i32, i32) {
    %c0_i32 = arith.constant 0 : i32
    %c0_i32_0 = arith.constant 0 : i32
    %c0_i32_1 = arith.constant 0 : i32
    return %arg0, %c0_i32, %c0_i32_0 : i32, i32, i32
  }
  func.func @transform_13(%arg0: i32) -> (i32, i32, i32) {
    %c0_i32 = arith.constant 0 : i32
    %c0_i32_0 = arith.constant 0 : i32
    %c0_i32_1 = arith.constant 0 : i32
    return %arg0, %c0_i32, %c0_i32_0 : i32, i32, i32
  }
  func.func @transform_14(%arg0: i32) -> (i32, i32, i32) {
    %c0_i32 = arith.constant 0 : i32
    %c0_i32_0 = arith.constant 0 : i32
    %c0_i32_1 = arith.constant 0 : i32
    return %arg0, %c0_i32, %c0_i32_0 : i32, i32, i32
  }
}

</mosaic_0001>

<bundles_post_ra>
// kernel: tpu_custom_call.1
= control target key start
LH: loop header
LB: loop body
LE: loop exit
PB: predicated region body
PF: predicated region fallthrough
CT: control target
= control target key end

     0   :  { %s4592_s0 = inlined_call_operand.vmem [shape: f32[4,5,19], index: 0, kind: input, shape index: {}]   ;;  %s4593_s1 = inlined_call_operand.vmem [shape: f32[4,3,15], index: 1, kind: input, shape index: {}]   ;;  %s4594_s2 = inlined_call_operand.vmem [shape: f32[4,1,27], index: 2, kind: input, shape index: {}]   ;;  %s4595_s3 = inlined_call_operand.hbm [shape: f32[19,532], index: 3, kind: input, shape index: {}]   ;;  %s4596_s4 = inlined_call_operand.vmem [shape: f32[15,532], index: 4, kind: input, shape index: {}]   ;;  %s4597_s5 = inlined_call_operand.hbm [shape: f32[27,136], index: 5, kind: input, shape index: {}]   ;;  %s4598_s6 = inlined_call_operand.vmem [shape: f32[4,5,5], index: 6, kind: input, shape index: {}]   ;;  %s4599_s7 = inlined_call_operand.vmem [shape: f32[4,5,3], index: 7, kind: input, shape index: {}]   ;;  %s4600_s8 = inlined_call_operand.vmem [shape: f32[4,3,5], index: 8, kind: input, shape index: {}]   ;;  %s4601_s9 = inlined_call_operand.vmem [shape: f32[4,3,3], index: 9, kind: input, shape index: {}]   ;;  %s4602_s10 = inlined_call_operand.vmem [shape: f32[4,1,5], index: 10, kind: input, shape index: {}]   ;;  %s4603_s11 = inlined_call_operand.vmem [shape: f32[4,1,3], index: 11, kind: input, shape index: {}]   ;;  %s4604_s12 = inlined_call_operand.vmem [shape: f32[4,5,128], index: 12, kind: output, shape index: {0}]   ;;  %s4605_s13 = inlined_call_operand.vmem [shape: f32[4,3,128], index: 13, kind: output, shape index: {1}]   ;;  %s4606_s14 = inlined_call_operand.hbm [shape: f32[4,1,128], index: 14, kind: output, shape index: {2}]  }
   0x1   :  { %4616 = sst [smem:[#allocation16_spill]] %s4595_s3 }
   0x2   :  { %20 = vsyncpa [#allocation3], 0 }
   0x3   :  { %21 = vsyncpa [#allocation6], 0 }
   0x4   :  { %22 = vsyncpa [#allocation4], 0 }
   0x5   :  { %24 = vsyncpa [#allocation4 + $0x1], 0  ;;  %s3851_s29 = smov 0   ;;  %s3853_s30 = smov 0  }
   0x6   :  { %s3855_s15 = smov 0   ;;  %s3857_s16 = smov 0  }
   0x7 LB: > { %4617 = sst [smem:[#allocation11_spill]] %s3747_s29  ;;  %s3872_s17 = sadd.s32 4294967295, %s3759_s16   ;;  %s3759_s16 = sphi %s3857_s16, %s4636_s16   ;;  %s3755_s15 = sphi %s3855_s15, %s4638_s15   ;;  %s3751_s30 = sphi %s3853_s30, %s4640_s30   ;;  %s3747_s29 = sphi %s3851_s29, %s4639_s29  }
   0x8   : > { %4618 = sst [smem:[#allocation12_spill]] %s3755_s15  ;;  %s3363_s18 = sadd.s32 4294967294, %s3759_s16  }
   0x9   : > { %s3876_s19 = sadd.s32 1, %s3759_s16   ;;  %s386_s20 = sadd.s32 1, %s3755_s15 }
   0xa   : > { %4619 = sst [smem:[#allocation13_spill]] %s3876_s19  ;;  %s383_s21 = ssub.s32 %s3759_s16, %s3876_s19 }
   0xb   : > { %p396_p0 = scmp.ne.s32.totalorder %s3755_s15, %s3751_s30  ;;  %p384_p1 = scmp.eq.s32.totalorder %s383_s21, 0 }
   0xc   : > { %p397_p2 = scmp.eq.s32.totalorder %s3872_s17, 3  ;;  %p402_p3 = scmp.ne.s32.totalorder %s3751_s30, %s3747_s29 }
   0xd   : > { %p403_p4 = scmp.eq.s32.totalorder %s3363_s18, 3  ;;  %p3364_p7 = scmp.ge.s32.totalorder %s3759_s16, 1 }
   0xe   : > { %s3887_s22 = scalar_select %p384_p1, %s3755_s15, %s386_s20  }
   0xf   : > { %p3889_p5 = por %p397_p2, %p396_p0  ;;  %p3893_p6 = por %p403_p4, %p402_p3 }
  0x10   : > { %4620 = sst [smem:[#allocation14_spill]] %s3887_s22  ;;  %p410_p8 = scmp.lt.s32.totalorder %s3759_s16, 5 }
  0x11   : > { %s4622_s24 = scalar_select %p3893_p6, 1, 0 }
  0x12   : > { %p3474_p9 = scmp.eq.s32.totalorder %s3872_s17, 0  ;;  %p3900_p10 = pnand %p3364_p7, %p410_p8 }
  0x13   : > { %4623 = sst [smem:[#allocation15_spill]] %s4622_s24  ;;  %s3761_s18 = smov [#allocation2]  }
  0x14   : > { %s4625_s3 = sld [smem:[#allocation16_spill]]  ;;  %p3463_p11 = pneg %p3900_p10 }
  0x15   : > { %s423_s20 = sshll.u32 %s3761_s18, 4  ;;  %s438_s15 = sshll.u32 %s4597_s5, 4  ;;  %s424_s20 = int_to_ptr.vmem [resolvable:$true] %s423_s20  ;;  %s439_s15 = int_to_ptr.hbm [resolvable:$true] %s438_s15 }
  0x16   : > { %p3464_p12 = pnand %p3474_p9, %p3463_p11  ;;  %s3762_s19 = smov 640  }
  0x17   : > { %s3763_s24 = smov 40   ;;  %s3764_s29 = smov [#allocation5]  }
  0x18   : > { %s440_s26 = sshll.u32 %s3764_s29, 4  ;;  %s3765_s27 = smov 256   ;;  %s441_s26 = int_to_ptr.vmem [resolvable:$true] %s440_s26 }
  0x19   : > { %516 = sbr.rel (%p3900_p10) target bundleno = 2196 (0x894), region = 68 }
  0x1a   : > { %s421_s28 = sshll.u32 %s4625_s3, 4  ;;  %s3766_s3 = smov 16   ;;  %s422_s28 = int_to_ptr.hbm [resolvable:$true] %s421_s28 }
  0x1b   : > { %3466 = dma.hbm_to_vmem [thread:$0]  (!%p3464_p12), %s422_s28, 1920, %s424_s20, [#allocation3], %s3762_s19, %s3762_s19, %s3763_s24  }
  0x1c   : > { %3469 = dma.hbm_to_vmem [thread:$0]  (!%p3464_p12), %s439_s15, 1024, %s441_s26, [#allocation6], %s3765_s27, %s3765_s27, %s3766_s3  }
  0x1e   : > { %3734 = dma.done.wait (%p3474_p9), [#allocation3], 1920  }
  0x1f   : > { %3736 = vsyncadd (%p3474_p9), [#allocation3], 4294965376 }
  0x20   : > { %3738 = dma.done.wait (%p3474_p9), [#allocation6], 1024  }
  0x21   : > { %3740 = vsyncadd (%p3474_p9), [#allocation6], 4294966272  ;;  %p603_p13 = scmp.lt.s32.totalorder %s3872_s17, 3  ;;  %vm664_vm0 = vcmask 1042432   ;;  %v656_v0 = vld [vmem:[#allocation2 + $0x58] sm:$0x7]  ;;  %v1040_v53 = vlaneseq }
  0x22   : > { %v651_v1 = vld [vmem:[#allocation2 + $0x30] sm:$0xff]  ;;  %3381 = vmatpush.msk.msra.mxu1 %vm664_vm0, %v656_v0  ;;  %v650_v3 = vld [vmem:[#allocation2 + $0x28] sm:$0xff]  ;;  %vm660_vm1 = vcmask 154624   ;;  %v645_v6 = vld [vmem:[#allocation2] sm:$0xff]  ;;  %vm795_vm2 = vcmask 1046528   ;;  %vm791_vm3 = vcmask 121856  }
  0x23   : > { %s3926_s29 = scalar_select %p603_p13, %s3872_s17, 3  ;;  %v655_v2 = vld [vmem:[#allocation2 + $0x50] sm:$0x7]  ;;  %v646_v4 = vld [vmem:[#allocation2 + $0x8] sm:$0xff]  ;;  %v657_v7 = vld [vmem:[#allocation2 + $0x60] sm:$0x7] }
  0x24   : > { %3379 = vmatpush.msk.msra.mxu0 %vm664_vm0, %v655_v2  ;;  %714 = vmatpush.msra.mxu1 %v651_v1  ;;  %v652_v8 = vld [vmem:[#allocation2 + $0x38] sm:$0xff]  ;;  %v659_v9 = vld [vmem:[#allocation2 + $0x70] sm:$0x7]  ;;  %v786_v10 = vld [vmem:[%s4596_s4 + $0x28] sm:$0x7f]  ;;  %vm1206_vm4 = vcmask 1044480  }
  0x25   : > { %s3929_s3 = sshll.u32 %s3926_s29, 3  ;;  %3383 = vmatpush.msk.msra.mxu2 %vm664_vm0, %v657_v7  ;;  %v647_v11 = vld [vmem:[#allocation2 + $0x10] sm:$0xff]  ;;  %v654_v12 = vld [vmem:[#allocation2 + $0x48] sm:$0xff]  ;;  %s3948_s28 = sshll.u32 %s3926_s29, 2  ;;  %v781_v14 = vld [vmem:[%s4596_s4] sm:$0xff]  ;;  %vm920_vm5 = vcmask 220160  }
  0x26   : > { %s606_s22 = scalar_lea.vmem %s4592_s0, %s3929_s3  ;;  %694 = vmatpush.msra.mxu0 %v650_v3  ;;  %715 = vmatpush.msra.mxu1 %v646_v4  ;;  %v787_v13 = vld [vmem:[%s4596_s4 + $0x30] sm:$0x7f]  ;;  %v649_v15 = vld [vmem:[#allocation2 + $0x20] sm:$0xff]  ;;  %v790_v16 = vld [vmem:[%s4596_s4 + $0x48] sm:$0x7f]  ;;  %s610_s18 = scalar_lea.vmem %s4593_s1, %s3948_s28  ;;  %v1041_v54 = vshrl.u32 %v1040_v53, 7 }
  0x27   : > { %v3937_v5 = vld [vmem:[%s606_s22] sm:$0x1f]  ;;  %734 = vmatpush.msra.mxu2 %v652_v8  ;;  %v782_v17 = vld [vmem:[%s4596_s4 + $0x8] sm:$0xff]  ;;  %v784_v21 = vld [vmem:[%s4596_s4 + $0x18] sm:$0xff]  ;;  %s3767_s22 = smov 64   ;;  %s4614_s24 = smov 96  }
  0x28   : > { %3382 = vmatmul.msk.f32.vlgmr.msra.gmra.mxu1 %vm660_vm1, %v3937_v5  ;;  %695 = vmatpush.msra.mxu0 %v645_v6  ;;  %v789_v18 = vld [vmem:[%s4596_s4 + $0x40] sm:$0x7f]  ;;  %s4612_s25 = smov 32   ;;  %s3771_s20 = smov 116   ;;  %v658_v29 = vld [vmem:[#allocation2 + $0x68] sm:$0x7] }
  0x29   : > { %3380 = vmatmul.msk.f32.vlgmr.msra.gmra.mxu0 %vm660_vm1, %v3937_v5  ;;  %3389 = vmatpush.msk.msrb.mxu1 %vm795_vm2, %v786_v10  ;;  %v785_v19 = vld [vmem:[%s4596_s4 + $0x20] sm:$0xff]  ;;  %s3772_s21 = smov 124   ;;  %v918_v30 = vld [vmem:[#allocation5 + $0x30] sm:$0x7]  ;;  %v916_v32 = vld [vmem:[#allocation5 + $0x20] sm:$0xff]  ;;  %s613_s27 = scalar_lea.vmem %s4594_s2, %s3926_s29  ;;  %vm1101_vm9 = vcmask 36864  }
  0x2a   : > { %3387 = vmatpush.msk.msrb.mxu0 %vm664_vm0, %v659_v9  ;;  %735 = vmatpush.msra.mxu2 %v647_v11  ;;  %v780_v20 = vld [vmem:[%s610_s18] sm:$0x7]  ;;  %s3770_s18 = smov 112   ;;  %v648_v33 = vld [vmem:[#allocation2 + $0x18] sm:$0xff]  ;;  %v914_v34 = vld [vmem:[#allocation5 + $0x10] sm:$0xff]  ;;  %s621_s19 = scalar_lea.vmem %s4599_s7, %s3929_s3  ;;  %vm1825_vm14 = vcmask 34816  }
  0x2b   : > { %3384 = vmatmul.msk.f32.vlgmr.msra.gmra.mxu2 %vm660_vm1, %v3937_v5  ;;  %826 = vmatpush.msrb.mxu1 %v781_v14  ;;  %v653_v31 = vld [vmem:[#allocation2 + $0x40] sm:$0xff]  ;;  %v788_v35 = vld [vmem:[%s4596_s4 + $0x38] sm:$0x7f]  ;;  %v783_v37 = vld [vmem:[%s4596_s4 + $0x10] sm:$0xff]  ;;  %s629_s26 = scalar_lea.vmem %s4601_s9, %s3948_s28 }
  0x2c   : > { %774 = vmatpush.msrb.mxu0 %v654_v12  ;;  %3391 = vmatpush.msk.msrb.mxu2 %vm795_vm2, %v787_v13  ;;  %v912_v36 = vld [vmem:[#allocation5] sm:$0xff]  ;;  %v919_v38 = vld [vmem:[#allocation5 + $0x38] sm:$0x7]  ;;  %v917_v39 = vld [vmem:[#allocation5 + $0x28] sm:$0xff] }
  0x2d   : > { %3397 = vmatpush.msk.msra.mxu1 %vm795_vm2, %v790_v16  ;;  %3385 = vmatpush.msk.msra.mxu3 %vm664_vm0, %v658_v29  ;;  %v915_v40 = vld [vmem:[#allocation5 + $0x18] sm:$0xff]  ;;  %v913_v41 = vld [vmem:[#allocation5 + $0x8] sm:$0xff] }
  0x2e   : > { %775 = vmatpush.msrb.mxu0 %v649_v15  ;;  %846 = vmatpush.msrb.mxu2 %v782_v17  ;;  %v911_v47 = vld [vmem:[%s613_s27] sm:$0x1]  ;;  %s632_s27 = scalar_lea.vmem %s4602_s10, %s3926_s29 }
  0x2f   : > { %906 = vmatpush.msra.mxu1 %v785_v19  ;;  %754 = vmatpush.msra.mxu3 %v653_v31 }
  0x30   : > { %3395 = vmatpush.msk.msra.mxu0 %vm795_vm2, %v789_v18  ;;  %3390 = vmatmul.msk.f32.vlgmr.msrb.gmra.mxu1 %vm791_vm3, %v780_v20 }
  0x31   : > { %3388 = vmatmul.msk.f32.vlgmr.msrb.gmra.mxu0 %vm660_vm1, %v3937_v5  ;;  %3399 = vmatpush.msk.msra.mxu2 %vm664_vm0, %v918_v30  ;;  %v3773_v30 = vmov -1e+30  }
  0x32   : > { %886 = vmatpush.msra.mxu0 %v784_v21  ;;  %755 = vmatpush.msra.mxu3 %v648_v33 }
  0x33   : > { %3392 = vmatmul.msk.f32.vlgmr.msrb.gmra.mxu2 %vm791_vm3, %v780_v20  ;;  %3386 = vmatmul.msk.f32.vlgmr.msra.gmra.mxu3 %vm660_vm1, %v3937_v5 }
  0x34   : > { %943 = vmatpush.msra.mxu2 %v916_v32  ;;  %3393 = vmatpush.msk.msrb.mxu3 %vm795_vm2, %v788_v35  ;;  %v4065_v32 = vld [vmem:[%s621_s19] sm:$0x1f]  ;;  %vm1463_vm2 = vcmask 20480   ;;  %s639_s19 = scalar_lea.vmem %s4604_s12, %s3929_s3 }
  0x35   : > { %vm1457_vm11 = vcmp.gt.f32.partialorder %v4065_v32, 0.0 }
  0x36   : > { %944 = vmatpush.msra.mxu2 %v914_v34  ;;  %866 = vmatpush.msrb.mxu3 %v783_v37 }
  0x38   : > { %3398 = vmatmul.msk.f32.vlgmr.msra.gmra.mxu1 %vm791_vm3, %v780_v20  ;;  %945 = vmatpush.msra.mxu2 %v912_v36 }
  0x39   : > { %3396 = vmatmul.msk.f32.vlgmr.msra.gmra.mxu0 %vm791_vm3, %v780_v20  ;;  %3401 = vmatpush.msk.msra.mxu3 %vm664_vm0, %v919_v38 }
  0x3b   : > { %3394 = vmatmul.msk.f32.vlgmr.msrb.gmra.mxu3 %vm791_vm3, %v780_v20  ;;  %3400 = vmatmul.msk.f32.vlgmr.msra.gmra.mxu2 %vm920_vm5, %v911_v47 }
  0x3c   : > { %963 = vmatpush.msra.mxu3 %v917_v39 }
  0x3e   : > { %964 = vmatpush.msra.mxu3 %v915_v40 }
  0x40   : > { %965 = vmatpush.msra.mxu3 %v913_v41 }
  0x43   : > { %3402 = vmatmul.msk.f32.vlgmr.msra.gmra.mxu3 %vm920_vm5, %v911_v47 }
  0xa5   : > { %v717_v22 = vpop.f32.mrf.mxu1 }
  0xa6   : > { %1259 = vrot.lane.b32.xlu0 %v717_v22, %s3767_s22  ;;  %1231 = vrot.lane.b32.xlu2 %v717_v22, %s4614_s24  ;;  %v3990_v23 = vpop.f32.mrf.mxu0 }
  0xa7   : > { %3403 = vmatpush.msk.msrb.mxu0 %vm1206_vm4, %v717_v22 }
  0xad   : > { %v4006_v27 = vpop.f32.mrf.mxu1 }
  0xae   : > { %1287 = vrot.lane.b32.xlu0 %v717_v22, %s4612_s25  ;;  %v3994_v24 = vpop.f32.mrf.mxu0  ;;  %v3998_v25 = vpop.f32.mrf.mxu2 }
  0xaf   : > { %1366 = vrot.lane.b32.xlu2 %v3994_v24, %s3770_s18 }
  0xb5   : > { %v4009_v28 = vpop.f32.mrf.mxu1 }
  0xb6   : > { %1004 = vrot.lane.b32.xlu0 %v3994_v24, %s3771_s20  ;;  %v848_v26 = vpop.f32.mrf.mxu2 }
  0xb7   : > { %1592 = vrot.lane.b32.xlu1 %v848_v26, %s4614_s24  ;;  %3411 = vmatpush.msk.msra.mxu0 %vm664_vm0, %v848_v26  ;;  %s4626_s24 = smov 96  }
  0xbe   : > { %1692 = vrot.lane.b32.xlu0 %v3994_v24, %s3772_s21 }
  0xc6   : > { %1620 = vrot.lane.b32.xlu0 %v848_v26, %s3767_s22 }
  0xce   : > { %1648 = vrot.lane.b32.xlu0 %v848_v26, %s4612_s25  ;;  %s625_s25 = scalar_lea.vmem %s4600_s8, %s3948_s28 }
  0xcf   : > { %v4060_v20 = vld [vmem:[%s625_s25] sm:$0x7]  ;;  %s4627_s25 = smov 32  }
  0xd0   : > { %vm1819_vm10 = vcmp.gt.f32.partialorder %v4060_v20, 0.0 }
  0xd6   : > { %1728 = vrot.lane.b32.xlu0 %v4009_v28, %s3771_s20  ;;  %s617_s20 = scalar_lea.vmem %s4598_s6, %s3929_s3 }
  0xd7   : > { %v4048_v11 = vld [vmem:[%s617_s20] sm:$0x1f]  ;;  %s635_s20 = scalar_lea.vmem %s4603_s11, %s3926_s29  ;;  %s601_s29 = sand.u32 1, %s3751_s30  }
  0xd8   : > { %vm1095_vm6 = vcmp.gt.f32.partialorder %v4048_v11, 0.0  ;;  %s602_s15 = scalar_lea.vmem [#allocation7], %s601_s29 }
  0xd9   : > { %v4063_v31 = vsel %vm1095_vm6, 0.0, %v3773_v30 }
  0xf8   : > { %971 = vxpose.xlu0.b32.start.end [1/1] (short) (narrow) %v3994_v24, 8 }
 0x100   : > { %v1232_v42 = vpop.permute.xlu2 %1231  ;;  %1334 = vxpose.xlu0.b32.start.end [1/1] (short) (narrow) %v4009_v28, 8 }
 0x101   : > { %3405 = vmatpush.msk.msrb.mxu1 %vm1206_vm4, %v1232_v42 }
 0x109   : > { %v1367_v43 = vpop.permute.xlu2 %1366 }
 0x10a   : > { %1369 = vxpose.xlu2.b32.start.end [1/1] (short) (narrow) %v1367_v43, 8 }
 0x118   : > { %v1260_v44 = vpop.permute.xlu0 %1259 }
 0x119   : > { %3407 = vmatpush.msk.msrb.mxu2 %vm1206_vm4, %v1260_v44 }
 0x120   : > { %v1288_v45 = vpop.permute.xlu0 %1287 }
 0x121   : > { %3409 = vmatpush.msk.msrb.mxu3 %vm1206_vm4, %v1288_v45  ;;  %v4078_v45 = vsel %vm1819_vm10, 0.0, %v3773_v30 }
 0x128   : > { %v1005_v46 = vpop.permute.xlu0 %1004 }
 0x129   : > { %1007 = vxpose.xlu1.b32.start.end [1/1] (short) (narrow) %v1005_v46, 8  ;;  %v1593_v48 = vpop.permute.xlu1 %1592 }
 0x12a   : > { %3413 = vmatpush.msk.msra.mxu1 %vm664_vm0, %v1593_v48 }
 0x130   : > { %v1693_v49 = vpop.permute.xlu0 %1692 }
 0x131   : > { %1695 = vxpose.xlu1.b32.start.end [1/1] (short) (narrow) %v1693_v49, 8 }
 0x138   : > { %v1621_v50 = vpop.permute.xlu0 %1620 }
 0x139   : > { %3415 = vmatpush.msk.msra.mxu2 %vm664_vm0, %v1621_v50  ;;  %v1458_v50 = vsel %vm1457_vm11, 0.0, %v3773_v30 }
 0x140   : > { %v1649_v51 = vpop.permute.xlu0 %1648 }
 0x141   : > { %3417 = vmatpush.msk.msra.mxu3 %vm664_vm0, %v1649_v51 }
 0x148   : > { %v1729_v52 = vpop.permute.xlu0 %1728 }
 0x149   : > { %1731 = vxpose.xlu0.b32.start.end [1/1] (short) (narrow) %v1729_v52, 8 }
 0x16c   : > { %3528 = vset.pattern.permute.xlu2 %v1041_v54 }
 0x184   : > { %3527 = vset.pattern.permute.xlu1 %v1041_v54 }
 0x19c   : > { %v987_v62 = vpop.trf.xlu0 }
 0x19d   : > { %v1068_v8 = vrot.slane %v987_v62, 1  ;;  %v1071_v10 = vperm.slane %v987_v62, 0  ;;  %v1069_v16 = vrot.slane %v987_v62, 2  ;;  %v1070_v36 = vrot.slane %v987_v62, 3 }
 0x19f   : > { %v1072_v9 = vperm.slane %v1068_v8, 0  ;;  %v1073_v22 = vperm.slane %v1069_v16, 0  ;;  %v1074_v48 = vperm.slane %v1070_v36, 0 }
 0x1a3   : > { %v1385_v55 = vpop.trf.xlu2 }
 0x1a4   : > { %v1415_v56 = vperm.slane %v1385_v55, 2  ;;  %v1401_v60 = vperm.slane %v1385_v55, 0  ;;  %v1408_v0 = vperm.slane %v1385_v55, 1  ;;  %v4037_v1 = vpop.trf.xlu0  ;;  %v1422_v2 = vperm.slane %v1385_v55, 3 }
 0x1a5   : > { %v1431_v14 = vrot.slane %v4037_v1, 2  ;;  %v1433_v34 = vperm.slane %v4037_v1, 0 }
 0x1a7   : > { %v1435_v19 = vperm.slane %v1431_v14, 0 }
 0x1b0   : > { %3529 = vset.pattern.permute.xlu0 %v1041_v54 }
 0x1b8   : > { %1420 = vperm.xlu0 %3529, %v1415_v56  }
 0x1cd   : > { %v1023_v57 = vpop.trf.xlu1 }
 0x1ce   : > { %v1046_v58 = vperm.slane %v1023_v57, 1  ;;  %v1039_v59 = vperm.slane %v1023_v57, 0  ;;  %v1053_v61 = vperm.slane %v1023_v57, 2  ;;  %v1060_v63 = vperm.slane %v1023_v57, 3 }
 0x1d0   : > { %1051 = vperm.xlu2 %3528, %v1046_v58   ;;  %1044 = vperm.xlu1 %3527, %v1039_v59  }
 0x1d5   : > { %v4042_v7 = vpop.trf.xlu1 }
 0x1d6   : > { %v1795_v35 = vperm.slane %v4042_v7, 0 }
 0x1d8   : > { %1058 = vperm.xlu2 %3528, %v1053_v61   ;;  %1406 = vperm.xlu1 %3527, %v1401_v60  }
 0x1e0   : > { %1065 = vperm.xlu2 %3528, %v1060_v63   ;;  %1413 = vperm.xlu1 %3527, %v1408_v0   ;;  %v1430_v0 = vrot.slane %v4037_v1, 1 }
 0x1e2   : > { %v1434_v8 = vperm.slane %v1430_v0, 0 }
 0x1e8   : > { %1427 = vperm.xlu1 %3527, %v1422_v2   ;;  %v1432_v2 = vrot.slane %v4037_v1, 3 }
 0x1ed   : > { %v4039_v3 = vpop.trf.xlu0 }
 0x1ee   : > { %v1763_v4 = vperm.slane %v4039_v3, 0 }
 0x1f0   : > { %1768 = vperm.xlu2 %3528, %v1763_v4  }
 0x22a   : > { %v1052_v5 = vpop.permute.xlu2 %1051  ;;  %v1421_v26 = vpop.permute.xlu0 %1420 }
 0x22b   : > { %v1080_v15 = vadd.f32 %v1072_v9, %v1052_v5  ;;  %v1443_v37 = vadd.f32 %v1435_v19, %v1421_v26  ;;  %v1436_v9 = vperm.slane %v1432_v2, 0 }
 0x22d   : > { %v1088_v21 = vmul.f32 0.2, %v1080_v15  ;;  %vm1084_vm8 = vcmp.gt.f32.partialorder %v1080_v15, 0.0  ;;  %v1451_v49 = vmul.f32 0.2, %v1443_v37  ;;  %vm1447_vm1 = vcmp.gt.f32.partialorder %v1443_v37, 0.0 }
 0x22f   : > { %v1092_v44 = vsel %vm1084_vm8, %v1080_v15, %v1088_v21  ;;  %v1455_v63 = vsel %vm1447_vm1, %v1443_v37, %v1451_v49  ;;  %vm1564_vm8 = vcmask 23552   ;;  %vm2185_vm1 = vcmask 18432  }
 0x230   : > { %v4082_v51 = vadd.f32 %v4063_v31, %v1092_v44  ;;  %v4095_v5 = vadd.f32 %v1458_v50, %v1455_v63 }
 0x232   : > { %v1059_v6 = vpop.permute.xlu2 %1058  ;;  %v1105_v59 = vsel %vm1101_vm9, %v4082_v51, -inf }
 0x233   : > { %v1081_v41 = vadd.f32 %v1073_v22, %v1059_v6 }
 0x235   : > { %v1089_v52 = vmul.f32 0.2, %v1081_v41  ;;  %vm1085_vm15 = vcmp.gt.f32.partialorder %v1081_v41, 0.0 }
 0x237   : > { %v1093_v62 = vsel %vm1085_vm15, %v1081_v41, %v1089_v52 }
 0x238   : > { %v1099_v4 = vadd.f32 %v4063_v31, %v1093_v62 }
 0x23a   : > { %v1066_v12 = vpop.permute.xlu2 %1065 }
 0x23b   : > { %v1082_v61 = vadd.f32 %v1074_v48, %v1066_v12  ;;  %v1108_v12 = vsel %vm1101_vm9, %v1099_v4, -inf }
 0x23d   : > { %v1090_v6 = vmul.f32 0.2, %v1082_v61  ;;  %vm1086_vm3 = vcmp.gt.f32.partialorder %v1082_v61, 0.0 }
 0x23f   : > { %v1094_v16 = vsel %vm1086_vm3, %v1082_v61, %v1090_v6 }
 0x242   : > { %v1045_v13 = vpop.permute.xlu1 %1044 }
 0x243   : > { %v1079_v17 = vadd.f32 %v1071_v10, %v1045_v13  ;;  %v1470_v13 = vsel %vm1463_vm2, %v4095_v5, -inf }
 0x245   : > { %vm1083_vm7 = vcmp.gt.f32.partialorder %v1079_v17, 0.0  ;;  %v1087_v18 = vmul.f32 0.2, %v1079_v17 }
 0x247   : > { %v1091_v29 = vsel %vm1083_vm7, %v1079_v17, %v1087_v18  ;;  %v1100_v17 = vadd.f32 %v4063_v31, %v1094_v16  ;;  %vm1202_vm7 = vcmask 39936  }
 0x248   : > { %v4068_v33 = vadd.f32 %v4063_v31, %v1091_v29 }
 0x249   : > { %v1111_v22 = vsel %vm1101_vm9, %v1100_v17, -inf }
 0x24a   : > { %v1407_v38 = vpop.permute.xlu1 %1406  ;;  %v1769_v39 = vpop.permute.xlu2 %1768  ;;  %v1102_v40 = vsel %vm1101_vm9, %v4068_v33, -inf }
 0x24b   : > { %v1441_v42 = vadd.f32 %v1433_v34, %v1407_v38  ;;  %v1803_v43 = vadd.f32 %v1795_v35, %v1769_v39  ;;  %1103 = vmax.xlane.f32.xlu2 %v1102_v40 }
 0x24d   : > { %vm1445_vm12 = vcmp.gt.f32.partialorder %v1441_v42, 0.0  ;;  %v1449_v46 = vmul.f32 0.2, %v1441_v42  ;;  %vm1807_vm13 = vcmp.gt.f32.partialorder %v1803_v43, 0.0  ;;  %v1811_v47 = vmul.f32 0.2, %v1803_v43 }
 0x24f   : > { %v1453_v53 = vsel %vm1445_vm12, %v1441_v42, %v1449_v46  ;;  %v1815_v54 = vsel %vm1807_vm13, %v1803_v43, %v1811_v47 }
 0x250   : > { %v1459_v55 = vadd.f32 %v1458_v50, %v1453_v53  ;;  %v4085_v56 = vadd.f32 %v4078_v45, %v1815_v54 }
 0x252   : > { %v1414_v57 = vpop.permute.xlu1 %1413  ;;  %v1464_v58 = vsel %vm1463_vm2, %v1459_v55, -inf  ;;  %v1826_v60 = vsel %vm1825_vm14, %v4085_v56, -inf }
 0x253   : > { %1465 = vmax.xlane.f32.xlu1 %v1464_v58  ;;  %1106 = vmax.xlane.f32.xlu2 %v1105_v59  ;;  %v1442_v14 = vadd.f32 %v1434_v8, %v1414_v57 }
 0x254   : > { %1827 = vmax.xlane.f32.xlu0 %v1826_v60 }
 0x255   : > { %v1450_v18 = vmul.f32 0.2, %v1442_v14  ;;  %vm1446_vm6 = vcmp.gt.f32.partialorder %v1442_v14, 0.0 }
 0x257   : > { %v1454_v29 = vsel %vm1446_vm6, %v1442_v14, %v1450_v18 }
 0x258   : > { %v1460_v34 = vadd.f32 %v1458_v50, %v1454_v29  ;;  %v1777_v29 = vperm.slane %v4039_v3, 2 }
 0x25a   : > { %v1428_v10 = vpop.permute.xlu1 %1427  ;;  %v1467_v35 = vsel %vm1463_vm2, %v1460_v34, -inf }
 0x25b   : > { %v1444_v15 = vadd.f32 %v1436_v9, %v1428_v10  ;;  %1109 = vmax.xlane.f32.xlu2 %v1108_v12  ;;  %1471 = vmax.xlane.f32.xlu1 %v1470_v13 }
 0x25d   : > { %vm1448_vm5 = vcmp.gt.f32.partialorder %v1444_v15, 0.0  ;;  %v1452_v1 = vmul.f32 0.2, %v1444_v15 }
 0x25f   : > { %v1456_v19 = vsel %vm1448_vm5, %v1444_v15, %v1452_v1 }
 0x260   : > { %v1462_v21 = vadd.f32 %v1458_v50, %v1456_v19 }
 0x262   : > { %v1473_v26 = vsel %vm1463_vm2, %v1462_v21, -inf }
 0x263   : > { %1112 = vmax.xlane.f32.xlu2 %v1111_v22  ;;  %1474 = vmax.xlane.f32.xlu1 %v1473_v26  ;;  %v4162_v22 = vpop.f32.mrf.mxu3 }
 0x268   : > { %2088 = vrot.lane.b32.xlu0 %v4009_v28, %s3770_s18 }
 0x26b   : > { %1468 = vmax.xlane.f32.xlu2 %v1467_v35  ;;  %v4164_v26 = vpop.f32.mrf.mxu3 }
 0x27c   : > { %1981 = vrot.lane.b32.xlu1 %v3998_v25, %s3767_s22 }
 0x284   : > { %2053 = vrot.lane.b32.xlu1 %v4009_v28, %s3772_s21 }
 0x2be   : > { %v1104_v31 = vpop.xlane.xlu2 %1103 }
 0x2bf   : > { %v1114_v36 = vsub.f32 %v4068_v33, %v1104_v31 }
 0x2c1   : > { %v1118_v37 = vmul.f32 1.442695, %v1114_v36 }
 0x2c3   : > { %3533 = vpow2.f32 %v1118_v37 }
 0x2c6   : > { %v1466_v38 = vpop.xlane.xlu1 %1465  ;;  %v1107_v39 = vpop.xlane.xlu2 %1106 }
 0x2c7   : > { %v1476_v40 = vsub.f32 %v1459_v55, %v1466_v38  ;;  %v1115_v41 = vsub.f32 %v4082_v51, %v1107_v39  ;;  %v1828_v42 = vpop.xlane.xlu0 %1827 }
 0x2c8   : > { %v1838_v47 = vsub.f32 %v4085_v56, %v1828_v42 }
 0x2c9   : > { %v3534_v43 = vpop.eup %3533  ;;  %v1480_v44 = vmul.f32 1.442695, %v1476_v40  ;;  %v1120_v46 = vmul.f32 1.442695, %v1115_v41 }
 0x2ca   : > { %v4114_v48 = vmul.f32 %v3534_v43, %v4048_v11  ;;  %v1842_v33 = vmul.f32 1.442695, %v1838_v47 }
 0x2cb   : > { %3535 = vpow2.f32 %v1480_v44  ;;  %v1793_v44 = vrot.slane %v4042_v7, 2 }
 0x2cc   : > { %3537 = vpow2.f32 %v1120_v46  ;;  %3404 = vmatmul.msk.f32.vlgmr.msrb.gmra.mxu0 %vm1202_vm7, %v4114_v48 }
 0x2cd   : > { %3419 = vmatpush.msk.msrb.mxu0 %vm1206_vm4, %v3998_v25  ;;  %3539 = vpow2.f32 %v1842_v33  ;;  %v1797_v47 = vperm.slane %v1793_v44, 0 }
 0x2ce   : > { %v1110_v49 = vpop.xlane.xlu2 %1109  ;;  %v1472_v50 = vpop.xlane.xlu1 %1471 }
 0x2cf   : > { %v1116_v51 = vsub.f32 %v1099_v4, %v1110_v49  ;;  %v1478_v54 = vsub.f32 %v4095_v5, %v1472_v50 }
 0x2d1   : > { %v3536_v52 = vpop.eup %3535  ;;  %v1122_v53 = vmul.f32 1.442695, %v1116_v51  ;;  %v1484_v58 = vmul.f32 1.442695, %v1478_v54 }
 0x2d2   : > { %v3538_v55 = vpop.eup %3537  ;;  %v4122_v56 = vmul.f32 %v3536_v52, %v4065_v32  ;;  %v1794_v52 = vrot.slane %v4042_v7, 3 }
 0x2d3   : > { %v4125_v57 = vmul.f32 %v3538_v55, %v4048_v11  ;;  %3541 = vpow2.f32 %v1122_v53  ;;  %v3540_v61 = vpop.eup %3539 }
 0x2d4   : > { %3412 = vmatmul.msk.f32.vlgmr.msra.gmra.mxu0 %vm1564_vm8, %v4122_v56  ;;  %3543 = vpow2.f32 %v1484_v58  ;;  %v4132_v4 = vmul.f32 %v3540_v61, %v4060_v20  ;;  %v1798_v55 = vperm.slane %v1794_v52, 0  ;;  %v967_v52 = vpop.f32.mrf.mxu3 }
 0x2d5   : > { %3406 = vmatmul.msk.f32.vlgmr.msrb.gmra.mxu1 %vm1202_vm7, %v4125_v57  ;;  %3427 = vmatpush.msk.msra.mxu0 %vm664_vm0, %v4164_v26 }
 0x2d6   : > { %v1113_v59 = vpop.xlane.xlu2 %1112  ;;  %v1475_v60 = vpop.xlane.xlu1 %1474 }
 0x2d7   : > { %v1117_v62 = vsub.f32 %v1100_v17, %v1113_v59  ;;  %v1479_v2 = vsub.f32 %v1462_v21, %v1475_v60 }
 0x2d9   : > { %v3542_v63 = vpop.eup %3541  ;;  %v1124_v0 = vmul.f32 1.442695, %v1117_v62  ;;  %v1486_v8 = vmul.f32 1.442695, %v1479_v2 }
 0x2da   : > { %v4135_v5 = vmul.f32 %v3542_v63, %v4048_v11  ;;  %v2089_v6 = vpop.permute.xlu0 %2088  ;;  %v3544_v10 = vpop.eup %3543 }
 0x2db   : > { %3545 = vpow2.f32 %v1124_v0  ;;  %2091 = vxpose.xlu1.b32.start.end [1/1] (short) (narrow) %v2089_v6, 8  ;;  %v4142_v15 = vmul.f32 %v3544_v10, %v4065_v32 }
 0x2dc   : > { %3408 = vmatmul.msk.f32.vlgmr.msrb.gmra.mxu2 %vm1202_vm7, %v4135_v5  ;;  %3420 = vmatmul.msk.f32.vlgmr.msrb.gmra.mxu0 %vm1202_vm7, %v4132_v4  ;;  %3547 = vpow2.f32 %v1486_v8  ;;  %v1136_v2 = vsel %vm1101_vm9, %v4135_v5, 0.0  ;;  %v1130_v8 = vsel %vm1101_vm9, %v4114_v48, 0.0 }
 0x2dd   : > { %3435 = vmatpush.msk.msrb.mxu0 %vm1206_vm4, %v4162_v22  ;;  %v1498_v48 = vsel %vm1463_vm2, %v4142_v15, 0.0 }
 0x2de   : > { %v1469_v9 = vpop.xlane.xlu2 %1468 }
 0x2df   : > { %v1477_v12 = vsub.f32 %v1460_v34, %v1469_v9  ;;  %v1784_v34 = vperm.slane %v4039_v3, 3  ;;  %v1133_v9 = vsel %vm1101_vm9, %v4125_v57, 0.0  ;;  %v1854_v57 = vsel %vm1825_vm14, %v4132_v4, 0.0 }
 0x2e1   : > { %v3546_v13 = vpop.eup %3545  ;;  %v1482_v14 = vmul.f32 1.442695, %v1477_v12 }
 0x2e2   : > { %v4145_v16 = vmul.f32 %v3546_v13, %v4048_v11  ;;  %v3548_v1 = vpop.eup %3547 }
 0x2e3   : > { %3549 = vpow2.f32 %v1482_v14  ;;  %v4152_v18 = vmul.f32 %v3548_v1, %v4065_v32 }
 0x2e4   : > { %3410 = vmatmul.msk.f32.vlgmr.msrb.gmra.mxu3 %vm1202_vm7, %v4145_v16  ;;  %3416 = vmatmul.msk.f32.vlgmr.msra.gmra.mxu2 %vm1564_vm8, %v4142_v15  ;;  %v1139_v10 = vsel %vm1101_vm9, %v4145_v16, 0.0 }
 0x2e5   : > { %v1501_v12 = vsel %vm1463_vm2, %v4152_v18, 0.0 }
 0x2e9   : > { %v3550_v17 = vpop.eup %3549 }
 0x2ea   : > { %v4155_v19 = vmul.f32 %v3550_v17, %v4065_v32  ;;  %v1770_v32 = vperm.slane %v4039_v3, 1  ;;  %v1792_v3 = vrot.slane %v4042_v7, 1 }
 0x2ec   : > { %3414 = vmatmul.msk.f32.vlgmr.msra.gmra.mxu1 %vm1564_vm8, %v4155_v19  ;;  %3418 = vmatmul.msk.f32.vlgmr.msra.gmra.mxu3 %vm1564_vm8, %v4152_v18  ;;  %v1796_v40 = vperm.slane %v1792_v3, 0  ;;  %v1495_v5 = vsel %vm1463_vm2, %v4155_v19, 0.0 }
 0x2ee   : > { %v1982_v11 = vpop.permute.xlu1 %1981 }
 0x2ef   : > { %3423 = vmatpush.msk.msrb.mxu2 %vm1206_vm4, %v1982_v11 }
 0x2f6   : > { %v2054_v21 = vpop.permute.xlu1 %2053 }
 0x2f7   : > { %2056 = vxpose.xlu2.b32.start.end [1/1] (short) (narrow) %v2054_v21, 8 }
 0x360   : > { %1775 = vperm.xlu2 %3528, %v1770_v32  }
 0x368   : > { %1782 = vperm.xlu2 %3528, %v1777_v29  }
 0x370   : > { %1789 = vperm.xlu2 %3528, %v1784_v34  }
 0x378   : > { %1953 = vrot.lane.b32.xlu2 %v3998_v25, %s4626_s24 }
 0x37f   : > { %v2107_v35 = vpop.trf.xlu1 }
 0x380   : > { %2009 = vrot.lane.b32.xlu2 %v3998_v25, %s4627_s25  ;;  %v2123_v31 = vperm.slane %v2107_v35, 0  ;;  %v2130_v36 = vperm.slane %v2107_v35, 1  ;;  %v2137_v37 = vperm.slane %v2107_v35, 2  ;;  %v2144_v38 = vperm.slane %v2107_v35, 3 }
 0x382   : > { %2128 = vperm.xlu0 %3529, %v2123_v31  }
 0x38a   : > { %2135 = vperm.xlu0 %3529, %v2130_v36  }
 0x390   : > { %v4177_v39 = vpop.trf.xlu2 }
 0x391   : > { %v2155_v13 = vperm.slane %v4177_v39, 0  ;;  %v2152_v1 = vrot.slane %v4177_v39, 1  ;;  %v2153_v29 = vrot.slane %v4177_v39, 2 }
 0x392   : > { %2142 = vperm.xlu0 %3529, %v2137_v37  }
 0x393   : > { %v2156_v4 = vperm.slane %v2152_v1, 0  ;;  %v2157_v31 = vperm.slane %v2153_v29, 0 }
 0x39a   : > { %2149 = vperm.xlu0 %3529, %v2144_v38  }
 0x3ba   : > { %v1776_v41 = vpop.permute.xlu2 %1775 }
 0x3bb   : > { %v1804_v42 = vadd.f32 %v1796_v40, %v1776_v41  ;;  %v2154_v40 = vrot.slane %v4177_v39, 3 }
 0x3bd   : > { %vm1808_vm10 = vcmp.gt.f32.partialorder %v1804_v42, 0.0  ;;  %v1812_v43 = vmul.f32 0.2, %v1804_v42 }
 0x3bf   : > { %v1816_v25 = vsel %vm1808_vm10, %v1804_v42, %v1812_v43  ;;  %v2158_v43 = vperm.slane %v2154_v40, 0 }
 0x3c0   : > { %v4182_v46 = vadd.f32 %v4078_v45, %v1816_v25 }
 0x3c2   : > { %v1783_v33 = vpop.permute.xlu2 %1782  ;;  %v1829_v49 = vsel %vm1825_vm14, %v4182_v46, -inf }
 0x3c3   : > { %v1805_v50 = vadd.f32 %v1797_v47, %v1783_v33  ;;  %1830 = vmax.xlane.f32.xlu2 %v1829_v49 }
 0x3c5   : > { %vm1809_vm11 = vcmp.gt.f32.partialorder %v1805_v50, 0.0  ;;  %v1813_v51 = vmul.f32 0.2, %v1805_v50 }
 0x3c7   : > { %v1817_v53 = vsel %vm1809_vm11, %v1805_v50, %v1813_v51 }
 0x3c8   : > { %v4188_v54 = vadd.f32 %v4078_v45, %v1817_v53 }
 0x3ca   : > { %v1790_v58 = vpop.permute.xlu2 %1789  ;;  %v1832_v59 = vsel %vm1825_vm14, %v4188_v54, -inf }
 0x3cb   : > { %v1806_v60 = vadd.f32 %v1798_v55, %v1790_v58  ;;  %1833 = vmax.xlane.f32.xlu1 %v1832_v59 }
 0x3cd   : > { %vm1810_vm12 = vcmp.gt.f32.partialorder %v1806_v60, 0.0  ;;  %v1814_v61 = vmul.f32 0.2, %v1806_v60 }
 0x3cf   : > { %v1818_v62 = vsel %vm1810_vm12, %v1806_v60, %v1814_v61 }
 0x3d0   : > { %v4193_v63 = vadd.f32 %v4078_v45, %v1818_v62  ;;  %v1492_v45 = vsel %vm1463_vm2, %v4122_v56, 0.0  ;;  %v4217_v56 = vld [vmem:[%s629_s26] sm:$0x7] }
 0x3d1   : > { %vm2179_vm9 = vcmp.gt.f32.partialorder %v4217_v56, 0.0 }
 0x3d2   : > { %v1954_v0 = vpop.permute.xlu2 %1953  ;;  %v1835_v7 = vsel %vm1825_vm14, %v4193_v63, -inf  ;;  %v2180_v17 = vsel %vm2179_vm9, 0.0, %v3773_v30 }
 0x3d3   : > { %1836 = vmax.xlane.f32.xlu2 %v1835_v7  ;;  %3421 = vmatpush.msk.msrb.mxu1 %vm1206_vm4, %v1954_v0 }
 0x3d4   : > { %1137 = vadd.xlane.f32.xlu1 %v1136_v2 }
 0x3da   : > { %v2010_v6 = vpop.permute.xlu2 %2009 }
 0x3db   : > { %1131 = vadd.xlane.f32.xlu2 %v1130_v8  ;;  %3425 = vmatpush.msk.msrb.mxu3 %vm1206_vm4, %v2010_v6 }
 0x3dc   : > { %1493 = vadd.xlane.f32.xlu1 %v1492_v45 }
 0x3e3   : > { %1134 = vadd.xlane.f32.xlu2 %v1133_v9 }
 0x3e4   : > { %1496 = vadd.xlane.f32.xlu1 %v1495_v5 }
 0x3eb   : > { %1140 = vadd.xlane.f32.xlu2 %v1139_v10 }
 0x3ec   : > { %1499 = vadd.xlane.f32.xlu1 %v1498_v48 }
 0x3f3   : > { %1855 = vadd.xlane.f32.xlu2 %v1854_v57 }
 0x3f4   : > { %1502 = vadd.xlane.f32.xlu1 %v1501_v12  ;;  %v2129_v14 = vpop.permute.xlu0 %2128 }
 0x3f5   : > { %v2163_v15 = vadd.f32 %v2155_v13, %v2129_v14 }
 0x3f7   : > { %vm2167_vm13 = vcmp.gt.f32.partialorder %v2163_v15, 0.0  ;;  %v2171_v16 = vmul.f32 0.2, %v2163_v15 }
 0x3f9   : > { %v2175_v19 = vsel %vm2167_vm13, %v2163_v15, %v2171_v16 }
 0x3fa   : > { %v4227_v11 = vadd.f32 %v2180_v17, %v2175_v19 }
 0x3fc   : > { %v2136_v21 = vpop.permute.xlu0 %2135  ;;  %v2186_v48 = vsel %vm2185_vm1, %v4227_v11, -inf }
 0x3fd   : > { %v2164_v32 = vadd.f32 %v2156_v4, %v2136_v21 }
 0x3ff   : > { %vm2168_vm15 = vcmp.gt.f32.partialorder %v2164_v32, 0.0  ;;  %v2172_v18 = vmul.f32 0.2, %v2164_v32 }
 0x401   : > { %v2176_v34 = vsel %vm2168_vm15, %v2164_v32, %v2172_v18 }
 0x402   : > { %v4230_v35 = vadd.f32 %v2180_v17, %v2176_v34 }
 0x404   : > { %v2143_v36 = vpop.permute.xlu0 %2142  ;;  %v2189_v37 = vsel %vm2185_vm1, %v4230_v35, -inf }
 0x405   : > { %v2165_v38 = vadd.f32 %v2157_v31, %v2143_v36  ;;  %2190 = vmax.xlane.f32.xlu0 %v2189_v37 }
 0x407   : > { %vm2169_vm2 = vcmp.gt.f32.partialorder %v2165_v38, 0.0  ;;  %v2173_v3 = vmul.f32 0.2, %v2165_v38 }
 0x409   : > { %v2177_v41 = vsel %vm2169_vm2, %v2165_v38, %v2173_v3 }
 0x40a   : > { %v2183_v42 = vadd.f32 %v2180_v17, %v2177_v41 }
 0x40c   : > { %v2150_v44 = vpop.permute.xlu0 %2149  ;;  %v2192_v25 = vsel %vm2185_vm1, %v2183_v42, -inf }
 0x40d   : > { %v2166_v47 = vadd.f32 %v2158_v43, %v2150_v44  ;;  %2193 = vmax.xlane.f32.xlu1 %v2192_v25 }
 0x40f   : > { %vm2170_vm3 = vcmp.gt.f32.partialorder %v2166_v47, 0.0  ;;  %v2174_v33 = vmul.f32 0.2, %v2166_v47 }
 0x411   : > { %v2178_v49 = vsel %vm2170_vm3, %v2166_v47, %v2174_v33  ;;  %v4278_v33 = vpop.f32.mrf.mxu2 }
 0x412   : > { %v2184_v50 = vadd.f32 %v2180_v17, %v2178_v49 }
 0x414   : > { %v2195_v51 = vsel %vm2185_vm1, %v2184_v50, -inf }
 0x415   : > { %2196 = vmax.xlane.f32.xlu0 %v2195_v51 }
 0x429   : > { %2797 = vrot.lane.b32.xlu0 %v967_v52, %s3772_s21  ;;  %s3774_s21 = smov 120  }
 0x436   : > { %v1831_v53 = vpop.xlane.xlu2 %1830 }
 0x437   : > { %v1839_v39 = vsub.f32 %v4182_v46, %v1831_v53 }
 0x439   : > { %v1844_v55 = vmul.f32 1.442695, %v1839_v39 }
 0x43b   : > { %3551 = vpow2.f32 %v1844_v55 }
 0x43e   : > { %v1834_v58 = vpop.xlane.xlu1 %1833 }
 0x43f   : > { %v1840_v59 = vsub.f32 %v4188_v54, %v1834_v58 }
 0x441   : > { %v3552_v60 = vpop.eup %3551  ;;  %v1846_v61 = vmul.f32 1.442695, %v1840_v59 }
 0x442   : > { %v1851_v62 = vmul.f32 %v3552_v60, %v4060_v20  ;;  %v4280_v60 = vpop.f32.mrf.mxu2 }
 0x443   : > { %3553 = vpow2.f32 %v1846_v61 }
 0x444   : > { %3422 = vmatmul.msk.f32.vlgmr.msrb.gmra.mxu1 %vm1202_vm7, %v1851_v62  ;;  %v1857_v0 = vsel %vm1825_vm14, %v1851_v62, 0.0 }
 0x445   : > { %1858 = vadd.xlane.f32.xlu2 %v1857_v0  ;;  %v1311_v0 = vpop.f32.mrf.mxu3 }
 0x446   : > { %v1837_v7 = vpop.xlane.xlu2 %1836 }
 0x447   : > { %v1841_v2 = vsub.f32 %v4193_v63, %v1837_v7  ;;  %2448 = vxpose.xlu1.b32.start.end [1/1] (short) (narrow) %v967_v52, 8  ;;  %v4247_v45 = vpop.xlane.xlu1 %1137 }
 0x449   : > { %v3554_v46 = vpop.eup %3553  ;;  %v1848_v6 = vmul.f32 1.442695, %v1841_v2 }
 0x44a   : > { %v1852_v8 = vmul.f32 %v3554_v46, %v4060_v20 }
 0x44b   : > { %3555 = vpow2.f32 %v1848_v6 }
 0x44c   : > { %3424 = vmatmul.msk.f32.vlgmr.msrb.gmra.mxu2 %vm1202_vm7, %v1852_v8  ;;  %v1860_v54 = vsel %vm1825_vm14, %v1852_v8, 0.0 }
 0x44d   : > { %1861 = vadd.xlane.f32.xlu2 %v1860_v54 }
 0x44f   : > { %v4252_v10 = vpop.xlane.xlu1 %1493 }
 0x451   : > { %v3556_v9 = vpop.eup %3555 }
 0x452   : > { %v1853_v5 = vmul.f32 %v3556_v9, %v4060_v20  ;;  %v4260_v20 = vpop.xlane.xlu2 %1131 }
 0x454   : > { %3426 = vmatmul.msk.f32.vlgmr.msrb.gmra.mxu3 %vm1202_vm7, %v1853_v5  ;;  %v1863_v63 = vsel %vm1825_vm14, %v1853_v5, 0.0  ;;  %v1644_v5 = vpop.f32.mrf.mxu2 }
 0x455   : > { %1864 = vadd.xlane.f32.xlu2 %v1863_v63 }
 0x457   : > { %v4256_v57 = vpop.xlane.xlu1 %1496 }
 0x45a   : > { %v4267_v4 = vpop.xlane.xlu2 %1134 }
 0x45d   : > { %2187 = vmax.xlane.f32.xlu2 %v2186_v48 }
 0x45f   : > { %v1500_v12 = vpop.xlane.xlu1 %1499 }
 0x460   : > { %v1506_v38 = vmax.f32 %v1500_v12, 1e-30 }
 0x462   : > { %v1141_v34 = vpop.xlane.xlu2 %1140  ;;  %v1547_v7 = vand.u32 2147483648, %v1506_v38  ;;  %vm1541_vm12 = vweird.f32 %v1506_v38  ;;  %v1545_v46 = vand.u32 2147483647, %v1506_v38 }
 0x463   : > { %v1145_v31 = vmax.f32 %v1141_v34, 1e-30 }
 0x464   : > { %v1548_v54 = vor.u32 1.1754944e-38, %v1547_v7  ;;  %vm1546_vm13 = vcmp.eq.f32.partialorder %v1545_v46, 8.507059e+37 }
 0x465   : > { %v1199_v52 = vand.u32 2147483648, %v1145_v31  ;;  %vm1193_vm5 = vweird.f32 %v1145_v31  ;;  %v1197_v53 = vand.u32 2147483647, %v1145_v31 }
 0x467   : > { %v4258_v13 = vpop.xlane.xlu1 %1502  ;;  %v1200_v59 = vor.u32 1.1754944e-38, %v1199_v52  ;;  %vm1198_vm10 = vcmp.eq.f32.partialorder %v1197_v53, 8.507059e+37  ;;  %v1144_v52 = vmax.f32 %v4247_v45, 1e-30 }
 0x468   : > { %v1507_v7 = vmax.f32 %v4258_v13, 1e-30 }
 0x46a   : > { %v4276_v25 = vpop.xlane.xlu2 %1855 }
 0x478   : > { %v4262_v1 = vpop.xlane.xlu0 %2190 }
 0x480   : > { %v2194_v14 = vpop.xlane.xlu1 %2193 }
 0x481   : > { %v2200_v15 = vsub.f32 %v2183_v42, %v2194_v14  ;;  %v2199_v14 = vsub.f32 %v4230_v35, %v4262_v1  ;;  %v1143_v35 = vmax.f32 %v4267_v4, 1e-30 }
 0x483   : > { %v2206_v16 = vmul.f32 1.442695, %v2200_v15 }
 0x485   : > { %3557 = vpow2.f32 %v2206_v16 }
 0x488   : > { %v2197_v21 = vpop.xlane.xlu0 %2196 }
 0x489   : > { %v2201_v18 = vsub.f32 %v2184_v50, %v2197_v21 }
 0x48b   : > { %v3558_v17 = vpop.eup %3557  ;;  %v2208_v29 = vmul.f32 1.442695, %v2201_v18  ;;  %v4292_v18 = vpop.f32.mrf.mxu0 }
 0x48c   : > { %v4265_v19 = vmul.f32 %v3558_v17, %v4217_v56  ;;  %v2204_v17 = vmul.f32 1.442695, %v2199_v14 }
 0x48d   : > { %3559 = vpow2.f32 %v2208_v29 }
 0x48e   : > { %v2220_v32 = vsel %vm2185_vm1, %v4265_v19, 0.0  ;;  %3561 = vrcp.f32 %v1145_v31 }
 0x48f   : > { %2221 = vadd.xlane.f32.xlu2 %v2220_v32  ;;  %3563 = vrcp.f32 %v1506_v38 }
 0x493   : > { %v3560_v36 = vpop.eup %3559 }
 0x494   : > { %v4272_v37 = vmul.f32 %v3560_v36, %v4217_v56  ;;  %v3562_v3 = vpop.eup %3561 }
 0x495   : > { %v1189_v41 = vmul.f32 %v3562_v3, %v1145_v31  ;;  %v3564_v43 = vpop.eup %3563  ;;  %vm1194_vm14 = vweird.f32 %v3562_v3  ;;  %v1505_v31 = vmax.f32 %v4256_v57, 1e-30 }
 0x496   : > { %v2223_v40 = vsel %vm2185_vm1, %v4272_v37, 0.0  ;;  %v1537_v44 = vmul.f32 %v3564_v43, %v1506_v38  ;;  %vm1195_vm6 = vmor %vm1193_vm5, %vm1194_vm14  ;;  %vm1542_vm11 = vweird.f32 %v3564_v43 }
 0x497   : > { %v1190_v42 = vsub.f32 1.0, %v1189_v41  ;;  %vm1543_vm9 = vmor %vm1541_vm12, %vm1542_vm11  ;;  %vm1527_vm5 = vweird.f32 %v1505_v31 }
 0x498   : > { %v1538_v49 = vsub.f32 1.0, %v1537_v44 }
 0x499   : > { %v1191_v47 = vmul.f32 %v3562_v3, %v1190_v42 }
 0x49a   : > { %v1539_v58 = vmul.f32 %v3564_v43, %v1538_v49  ;;  %v1169_v49 = vand.u32 2147483647, %v1143_v35 }
 0x49b   : > { %v1192_v50 = vadd.f32 %v3562_v3, %v1191_v47  ;;  %v2798_v51 = vpop.permute.xlu0 %2797  ;;  %v1171_v47 = vand.u32 2147483648, %v1143_v35 }
 0x49c   : > { %v1540_v62 = vadd.f32 %v3564_v43, %v1539_v58  ;;  %vm1170_vm3 = vcmp.eq.f32.partialorder %v1169_v49, 8.507059e+37  ;;  %v1255_v58 = vpop.f32.mrf.mxu1 }
 0x49d   : > { %v1196_v55 = vsel %vm1195_vm6, %v3562_v3, %v1192_v50  ;;  %v1172_v53 = vor.u32 1.1754944e-38, %v1171_v47  ;;  %v1561_v47 = vand.u32 2147483648, %v1507_v7 }
 0x49e   : > { %v1201_v61 = vsel %vm1198_vm10, %v1200_v59, %v1196_v55  ;;  %v1544_v8 = vsel %vm1543_vm9, %v3564_v43, %v1540_v62  ;;  %v1533_v59 = vand.u32 2147483648, %v1505_v31  ;;  %v1531_v62 = vand.u32 2147483647, %v1505_v31 }
 0x49f   : > { %v1314_v2 = vmul.f32 %v1311_v0, %v1201_v61  ;;  %v1549_v9 = vsel %vm1546_vm13, %v1548_v54, %v1544_v8 }
 0x4a0   : > { %v1647_v63 = vmul.f32 %v1644_v5, %v1549_v9  ;;  %v1534_v45 = vor.u32 1.1754944e-38, %v1533_v59  ;;  %vm1532_vm10 = vcmp.eq.f32.partialorder %v1531_v62, 8.507059e+37 }
 0x4a4   : > { %v1616_v54 = vpop.f32.mrf.mxu1 }
 0x4a7   : > { %2224 = vadd.xlane.f32.xlu1 %v2223_v40 }
 0x4b8   : > { %2800 = vxpose.xlu2.b32.start.end [1/1] (short) (narrow) %v2798_v51, 8  ;;  %v1859_v39 = vpop.xlane.xlu2 %1858 }
 0x4b9   : > { %v1867_v3 = vmax.f32 %v1859_v39, 1e-30 }
 0x4bb   : > { %v1895_v9 = vand.u32 2147483648, %v1867_v3  ;;  %vm1889_vm12 = vweird.f32 %v1867_v3 }
 0x4bd   : > { %v1896_v13 = vor.u32 1.1754944e-38, %v1895_v9 }
 0x4c0   : > { %1324 = vrot.lane.b32.xlu1 %v1314_v2, %s4626_s24  ;;  %v4283_v6 = vpop.xlane.xlu2 %1861 }
 0x4c8   : > { %1681 = vrot.lane.b32.xlu1 %v1647_v63, %s3767_s22  ;;  %v4286_v48 = vpop.xlane.xlu2 %1864  ;;  %v1893_v63 = vand.u32 2147483647, %v1867_v3 }
 0x4ca   : > { %vm1894_vm13 = vcmp.eq.f32.partialorder %v1893_v63, 8.507059e+37 }
 0x4d0   : > { %v2188_v12 = vpop.xlane.xlu2 %2187 }
 0x4d1   : > { %v2198_v15 = vsub.f32 %v4227_v11, %v2188_v12 }
 0x4d3   : > { %v2202_v16 = vmul.f32 1.442695, %v2198_v15  ;;  %v1868_v15 = vmax.f32 %v4283_v6, 1e-30  ;;  %v1183_v6 = vand.u32 2147483647, %v1144_v52 }
 0x4d5   : > { %3565 = vpow2.f32 %v2202_v16  ;;  %v1909_v59 = vand.u32 2147483648, %v1868_v15 }
 0x4d6   : > { %3567 = vpow2.f32 %v2204_v17 }
 0x4d7   : > { %3569 = vrcp.f32 %v1143_v35 }
 0x4d8   : > { %3571 = vrcp.f32 %v1505_v31 }
 0x4d9   : > { %3573 = vrcp.f32 %v1867_v3 }
 0x4da   : > { %3575 = vrcp.f32 %v1144_v52 }
 0x4db   : > { %v3566_v21 = vpop.eup %3565  ;;  %3577 = vrcp.f32 %v1507_v7 }
 0x4dc   : > { %v2210_v32 = vmul.f32 %v3566_v21, %v4217_v56  ;;  %v3568_v34 = vpop.eup %3567  ;;  %3579 = vrcp.f32 %v1868_v15 }
 0x4dd   : > { %v4299_v11 = vmul.f32 %v3568_v34, %v4217_v56  ;;  %v3570_v36 = vpop.eup %3569 }
 0x4de   : > { %3428 = vmatmul.msk.f32.vlgmr.msra.gmra.mxu0 %vm1564_vm8, %v2210_v32  ;;  %v2214_v29 = vsel %vm2185_vm1, %v2210_v32, 0.0  ;;  %v1161_v38 = vmul.f32 %v3570_v36, %v1143_v35  ;;  %v3572_v41 = vpop.eup %3571  ;;  %vm1166_vm15 = vweird.f32 %v3570_v36  ;;  %v1977_v32 = vpop.f32.mrf.mxu1 }
 0x4df   : > { %2215 = vadd.xlane.f32.xlu0 %v2214_v29  ;;  %3443 = vmatpush.msk.msra.mxu0 %vm664_vm0, %v4292_v18  ;;  %v2217_v1 = vsel %vm2185_vm1, %v4299_v11, 0.0  ;;  %v1523_v42 = vmul.f32 %v3572_v41, %v1505_v31  ;;  %v3574_v44 = vpop.eup %3573  ;;  %vm1165_vm1 = vweird.f32 %v1143_v35  ;;  %vm1528_vm14 = vweird.f32 %v3572_v41 }
 0x4e0   : > { %v1162_v40 = vsub.f32 1.0, %v1161_v38  ;;  %vm1167_vm2 = vmor %vm1165_vm1, %vm1166_vm15  ;;  %v1885_v57 = vmul.f32 %v3574_v44, %v1867_v3  ;;  %v3576_v2 = vpop.eup %3575  ;;  %vm1890_vm11 = vweird.f32 %v3574_v44  ;;  %v1185_v3 = vand.u32 2147483648, %v1144_v52 }
 0x4e1   : > { %v1524_v4 = vsub.f32 1.0, %v1523_v42  ;;  %vm1529_vm6 = vmor %vm1527_vm5, %vm1528_vm14  ;;  %v1175_v5 = vmul.f32 %v3576_v2, %v1144_v52  ;;  %v3578_v17 = vpop.eup %3577  ;;  %vm1180_vm15 = vweird.f32 %v3576_v2  ;;  %vm1179_vm1 = vweird.f32 %v1144_v52 }
 0x4e2   : > { %v1163_v56 = vmul.f32 %v3570_v36, %v1162_v40  ;;  %vm1891_vm9 = vmor %vm1889_vm12, %vm1890_vm11  ;;  %v1551_v29 = vmul.f32 %v3578_v17, %v1507_v7  ;;  %v3580_v38 = vpop.eup %3579  ;;  %vm1556_vm14 = vweird.f32 %v3578_v17  ;;  %vm1555_vm5 = vweird.f32 %v1507_v7 }
 0x4e3   : > { %v1525_v51 = vmul.f32 %v3572_v41, %v1524_v4  ;;  %v1176_v16 = vsub.f32 1.0, %v1175_v5  ;;  %v1899_v40 = vmul.f32 %v3580_v38, %v1868_v15  ;;  %vm1904_vm11 = vweird.f32 %v3580_v38 }
 0x4e4   : > { %v1164_v43 = vadd.f32 %v3570_v36, %v1163_v56  ;;  %v1552_v31 = vsub.f32 1.0, %v1551_v29  ;;  %v1186_v56 = vor.u32 1.1754944e-38, %v1185_v3  ;;  %vm1903_vm12 = vweird.f32 %v1868_v15 }
 0x4e5   : > { %v1526_v55 = vadd.f32 %v3572_v41, %v1525_v51  ;;  %v1177_v35 = vmul.f32 %v3576_v2, %v1176_v16  ;;  %v1504_v16 = vmax.f32 %v4252_v10, 1e-30 }
 0x4e6   : > { %v1168_v50 = vsel %vm1167_vm2, %v3570_v36, %v1164_v43  ;;  %vm1181_vm2 = vmor %vm1179_vm1, %vm1180_vm15  ;;  %v1553_v42 = vmul.f32 %v3578_v17, %v1552_v31  ;;  %v1900_v43 = vsub.f32 1.0, %v1899_v40 }
 0x4e7   : > { %2218 = vadd.xlane.f32.xlu0 %v2217_v1  ;;  %v1173_v39 = vsel %vm1170_vm3, %v1172_v53, %v1168_v50  ;;  %v1869_v1 = vmax.f32 %v4286_v48, 1e-30  ;;  %v1178_v36 = vadd.f32 %v3576_v2, %v1177_v35  ;;  %vm1184_vm3 = vcmp.eq.f32.partialorder %v1183_v6, 8.507059e+37 }
 0x4e8   : > { %v1258_v61 = vmul.f32 %v1255_v58, %v1173_v39  ;;  %v1554_v48 = vadd.f32 %v3578_v17, %v1553_v42  ;;  %v1901_v50 = vmul.f32 %v3580_v38, %v1900_v43  ;;  %v1562_v53 = vor.u32 1.1754944e-38, %v1561_v47  ;;  %v1672_v58 = vpop.f32.mrf.mxu3 }
 0x4e9   : > { %3581 = vrcp.f32 %v1869_v1  ;;  %vm1917_vm1 = vweird.f32 %v1869_v1 }
 0x4fb   : > { %2413 = vrot.lane.b32.xlu0 %v3994_v24, %s3774_s21  ;;  %v1886_v24 = vsub.f32 1.0, %v1885_v57  ;;  %v1559_v57 = vand.u32 2147483647, %v1507_v7 }
 0x4fd   : > { %v1887_v0 = vmul.f32 %v3574_v44, %v1886_v24  ;;  %v1902_v24 = vadd.f32 %v3580_v38, %v1901_v50  ;;  %v1519_v50 = vand.u32 2147483648, %v1504_v16 }
 0x4ff   : > { %v1888_v8 = vadd.f32 %v3574_v44, %v1887_v0 }
 0x501   : > { %v1892_v14 = vsel %vm1891_vm9, %v3574_v44, %v1888_v8  ;;  %v3582_v44 = vpop.eup %3581  ;;  %vm1905_vm9 = vmor %vm1903_vm12, %vm1904_vm11  ;;  %vm1513_vm12 = vweird.f32 %v1504_v16 }
 0x502   : > { %v1897_v21 = vsel %vm1894_vm13, %v1896_v13, %v1892_v14  ;;  %v1913_v51 = vmul.f32 %v3582_v44, %v1869_v1  ;;  %vm1918_vm15 = vweird.f32 %v3582_v44  ;;  %v1142_v13 = vmax.f32 %v4260_v20, 1e-30 }
 0x503   : > { %2761 = vrot.lane.b32.xlu0 %v4009_v28, %s3774_s21  ;;  %v1530_v28 = vsel %vm1529_vm6, %v3572_v41, %v1526_v55  ;;  %v1980_v34 = vmul.f32 %v1977_v32, %v1897_v21  ;;  %v1182_v41 = vsel %vm1181_vm2, %v3576_v2, %v1178_v36  ;;  %vm1557_vm6 = vmor %vm1555_vm5, %vm1556_vm14  ;;  %v2005_v2 = vpop.f32.mrf.mxu2  ;;  %v4327_v32 = vpop.xlane.xlu2 %2221 }
 0x504   : > { %v1535_v46 = vsel %vm1532_vm10, %v1534_v45, %v1530_v28  ;;  %v1187_v4 = vsel %vm1184_vm3, %v1186_v56, %v1182_v41  ;;  %v1558_v52 = vsel %vm1557_vm6, %v3578_v17, %v1554_v48  ;;  %vm1560_vm10 = vcmp.eq.f32.partialorder %v1559_v57, 8.507059e+37  ;;  %vm1919_vm2 = vmor %vm1917_vm1, %vm1918_vm15 }
 0x505   : > { %v1619_v12 = vmul.f32 %v1616_v54, %v1535_v46  ;;  %v1286_v49 = vmul.f32 %v4280_v60, %v1187_v4  ;;  %v1563_v39 = vsel %vm1560_vm10, %v1562_v53, %v1558_v52  ;;  %v1914_v55 = vsub.f32 1.0, %v1913_v51  ;;  %v1227_v4 = vpop.f32.mrf.mxu0 }
 0x506   : > { %v1675_v62 = vmul.f32 %v1672_v58, %v1563_v39  ;;  %v1906_v60 = vsel %vm1905_vm9, %v3580_v38, %v1902_v24  ;;  %v1910_v28 = vor.u32 1.1754944e-38, %v1909_v59  ;;  %v1923_v46 = vand.u32 2147483648, %v1869_v1 }
 0x507   : > { %v1915_v0 = vmul.f32 %v3582_v44, %v1914_v55  ;;  %v1921_v54 = vand.u32 2147483647, %v1869_v1  ;;  %3583 = vrcp.f32 %v1142_v13  ;;  %v4329_v1 = vpop.trf.xlu1  ;;  %v1157_v42 = vand.u32 2147483648, %v1142_v13 }
 0x508   : > { %v1924_v5 = vor.u32 1.1754944e-38, %v1923_v46  ;;  %3585 = vrcp.f32 %v1504_v16  ;;  %vm1151_vm5 = vweird.f32 %v1142_v13  ;;  %v1155_v56 = vand.u32 2147483647, %v1142_v13 }
 0x509   : > { %v1916_v45 = vadd.f32 %v3582_v44, %v1915_v0  ;;  %vm1922_vm3 = vcmp.eq.f32.partialorder %v1921_v54, 8.507059e+37  ;;  %v1517_v52 = vand.u32 2147483647, %v1504_v16  ;;  %v3775_v53 = vmov 0  }
 0x50a   : > { %vm1156_vm11 = vcmp.eq.f32.partialorder %v1155_v56, 8.507059e+37  ;;  %3532 = vset.pattern.permute.xlu1 %v3775_v53  ;;  %v1520_v58 = vor.u32 1.1754944e-38, %v1519_v50  ;;  %vm1329_vm15 = vcmask 523264  }
 0x50b   : > { %1316 = vrot.lane.b32.xlu0 %v1258_v61, %s4627_s25  ;;  %v1907_v61 = vand.u32 2147483647, %v1868_v15  ;;  %v1920_v9 = vsel %vm1919_vm2, %v3582_v44, %v1916_v45  ;;  %vm1518_vm1 = vcmp.eq.f32.partialorder %v1517_v52, 8.507059e+37  ;;  %vm1331_vm2 = vcmask 785408  }
 0x50c   : > { %v1925_v63 = vsel %vm1922_vm3, %v1924_v5, %v1920_v9 }
 0x50d   : > { %vm1908_vm13 = vcmp.eq.f32.partialorder %v1907_v61, 8.507059e+37  ;;  %v3584_v21 = vpop.eup %3583 }
 0x50e   : > { %v1911_v7 = vsel %vm1908_vm13, %v1910_v28, %v1906_v60  ;;  %v1147_v29 = vmul.f32 %v3584_v21, %v1142_v13  ;;  %vm1152_vm14 = vweird.f32 %v3584_v21  ;;  %vm1327_vm13 = vcmask 261120   ;;  %v1588_v60 = vpop.f32.mrf.mxu0 }
 0x50f   : > { %v2008_v8 = vmul.f32 %v2005_v2, %v1911_v7  ;;  %vm4335_vm6 = vmor %vm1151_vm5, %vm1152_vm14  ;;  %v2483_v13 = vrot.slane %v4329_v1, 3  ;;  %vm2885_vm5 = vcmask 16384  }
 0x510   : > { %v1148_v31 = vsub.f32 1.0, %v1147_v29 }
 0x512   : > { %v1149_v20 = vmul.f32 %v3584_v21, %v1148_v31 }
 0x513   : > { %1677 = vrot.lane.b32.xlu0 %v1619_v12, %s4627_s25  ;;  %v2033_v12 = vpop.f32.mrf.mxu3 }
 0x514   : > { %v2036_v14 = vmul.f32 %v2033_v12, %v1925_v63  ;;  %v1150_v41 = vadd.f32 %v3584_v21, %v1149_v20 }
 0x516   : > { %v1154_v44 = vsel %vm4335_vm6, %v3584_v21, %v1150_v41 }
 0x51a   : > { %v4333_v40 = vpop.xlane.xlu1 %2224  ;;  %3530 = vset.pattern.permute.xlu2 %v3775_v53 }
 0x51b   : > { %2038 = vrot.lane.b32.xlu0 %v1980_v34, %s4627_s25  ;;  %v3586_v34 = vpop.eup %3585 }
 0x51c   : > { %v1509_v36 = vmul.f32 %v3586_v34, %v1504_v16  ;;  %vm1514_vm10 = vweird.f32 %v3586_v34  ;;  %v2481_v16 = vrot.slane %v4329_v1, 1 }
 0x51d   : > { %vm1515_vm9 = vmor %vm1513_vm12, %vm1514_vm10 }
 0x51e   : > { %v1510_v3 = vsub.f32 1.0, %v1509_v36 }
 0x520   : > { %v1511_v10 = vmul.f32 %v3586_v34, %v1510_v3 }
 0x521   : > { %2313 = vrot.lane.b32.xlu2 %v4164_v26, %s4626_s24 }
 0x522   : > { %v1512_v47 = vadd.f32 %v3586_v34, %v1511_v10 }
 0x524   : > { %v1516_v55 = vsel %vm1515_vm9, %v3586_v34, %v1512_v47 }
 0x525   : > { %v1521_v61 = vsel %vm1518_vm1, %v1520_v58, %v1516_v55 }
 0x526   : > { %v1591_v7 = vmul.f32 %v1588_v60, %v1521_v61 }
 0x529   : > { %1320 = vrot.lane.b32.xlu2 %v1286_v49, %s3767_s22  ;;  %v1158_v49 = vor.u32 1.1754944e-38, %v1157_v42 }
 0x52b   : > { %v1159_v39 = vsel %vm1156_vm11, %v1158_v49, %v1154_v44  ;;  %vm2533_vm11 = vcmask 32768  }
 0x52c   : > { %v1230_v59 = vmul.f32 %v1227_v4, %v1159_v39 }
 0x531   : > { %1685 = vrot.lane.b32.xlu2 %v1675_v62, %s4626_s24 }
 0x532   : > { %v1325_v24 = vpop.permute.xlu1 %1324 }
 0x539   : > { %2042 = vrot.lane.b32.xlu2 %v2008_v8, %s3767_s22 }
 0x53a   : > { %v1682_v46 = vpop.permute.xlu1 %1681 }
 0x541   : > { %2046 = vrot.lane.b32.xlu2 %v2036_v14, %s4626_s24  ;;  %v2482_v14 = vrot.slane %v4329_v1, 2 }
 0x551   : > { %v4331_v38 = vpop.trf.xlu2 }
 0x552   : > { %v4321_v15 = vpop.xlane.xlu0 %2215  ;;  %v2835_v51 = vrot.slane %v4331_v38, 3 }
 0x554   : > { %2859 = vperm.xlu2 %3530, %v2835_v51  }
 0x55a   : > { %v4325_v17 = vpop.xlane.xlu0 %2218 }
 0x56d   : > { %v2414_v35 = vpop.permute.xlu0 %2413 }
 0x56e   : > { %2416 = vxpose.xlu0.b32.start.end [1/1] (short) (narrow) %v2414_v35, 8 }
 0x575   : > { %v2762_v6 = vpop.permute.xlu0 %2761 }
 0x576   : > { %2764 = vxpose.xlu0.b32.start.end [1/1] (short) (narrow) %v2762_v6, 8  ;;  %v4378_v6 = vld [vmem:[%s635_s20] sm:$0x1] }
 0x577   : > { %vm2879_vm14 = vcmp.gt.f32.partialorder %v4378_v6, 0.0 }
 0x578   : > { %v4382_v42 = vsel %vm2879_vm14, 0.0, %v3773_v30 }
 0x57b   : > { %v2314_v43 = vpop.permute.xlu2 %2313 }
 0x57c   : > { %3429 = vmatpush.msk.msra.mxu1 %vm664_vm0, %v2314_v43  ;;  %v4397_v43 = vld [vmem:[%s632_s27] sm:$0x1]  ;;  %s3709_s27 = scalar_lea.hbm %s4606_s14, 4 }
 0x57d   : > { %3430 = vmatmul.msk.f32.vlgmr.msra.gmra.mxu1 %vm1564_vm8, %v4299_v11  ;;  %v1317_v57 = vpop.permute.xlu0 %1316  ;;  %vm2527_vm6 = vcmp.gt.f32.partialorder %v4397_v43, 0.0 }
 0x57e   : > { %v1328_v62 = vsel %vm1327_vm13, %v1230_v59, %v1317_v57  ;;  %v2528_v50 = vsel %vm2527_vm6, 0.0, %v3773_v30 }
 0x583   : > { %v1321_v11 = vpop.permute.xlu2 %1320 }
 0x584   : > { %v1330_v0 = vsel %vm1329_vm15, %v1328_v62, %v1321_v11 }
 0x585   : > { %v1678_v28 = vpop.permute.xlu0 %1677  ;;  %v1332_v45 = vsel %vm1331_vm2, %v1330_v0, %v1325_v24 }
 0x586   : > { %v1688_v2 = vsel %vm1327_vm13, %v1591_v7, %v1678_v28  ;;  %v3112_v9 = vadd.f32 %v1332_v45, %v3990_v23  ;;  %v2833_v23 = vrot.slane %v4331_v38, 1  ;;  %v2834_v28 = vrot.slane %v4331_v38, 2 }
 0x587   : > { %v1689_v54 = vsel %vm1329_vm15, %v1688_v2, %v1682_v46 }
 0x58b   : > { %v1686_v8 = vpop.permute.xlu2 %1685 }
 0x58c   : > { %v1690_v5 = vsel %vm1331_vm2, %v1689_v54, %v1686_v8 }
 0x58d   : > { %v3113_v63 = vadd.f32 %v3112_v9, %v1690_v5  ;;  %v4361_v21 = vpop.permute.xlu0 %2038 }
 0x58f   : > { %v3118_v12 = vmax.f32 %v3113_v63, 0.0 }
 0x591   : > { %3121 = vst [vmem:[%s639_s19] sm:$0x1f] %v3118_v12  ;;  %s3149_s19 = sshll.u32 %s602_s15, 4  ;;  %s3150_s19 = int_to_ptr.vmem [resolvable:$true] %s3149_s19 }
 0x593   : > { %v4363_v29 = vpop.permute.xlu2 %2042 }
 0x59b   : > { %v4369_v35 = vpop.permute.xlu2 %2046 }
 0x5ae   : > { %v2860_v36 = vpop.permute.xlu2 %2859 }
 0x5af   : > { %v2862_v3 = vperm.slane %v2860_v36, 0 }
 0x5dd   : > { %3531 = vset.pattern.permute.xlu0 %v3775_v53 }
 0x5e4   : > { %2502 = vperm.xlu0 %3531, %v2482_v14  }
 0x5ec   : > { %2507 = vperm.xlu0 %3531, %v2483_v13  }
 0x5f4   : > { %2497 = vperm.xlu0 %3531, %v2481_v16  }
 0x5fc   : > { %2849 = vperm.xlu0 %3531, %v2833_v23  }
 0x604   : > { %2492 = vperm.xlu0 %3531, %v4329_v1  }
 0x60c   : > { %2369 = vrot.lane.b32.xlu0 %v4164_v26, %s4627_s25 }
 0x612   : > { %v4367_v34 = vpop.trf.xlu0 }
 0x613   : > { %v2486_v44 = vrot.slane %v4367_v34, 2  ;;  %v2487_v39 = vrot.slane %v4367_v34, 3  ;;  %v2485_v5 = vrot.slane %v4367_v34, 1 }
 0x61a   : > { %v4371_v31 = vpop.trf.xlu0 }
 0x61b   : > { %v2839_v20 = vrot.slane %v4371_v31, 3 }
 0x61d   : > { %v2866_v1 = vadd.f32 %v2862_v3, %v2839_v20 }
 0x61f   : > { %v2874_v10 = vmul.f32 0.2, %v2866_v1  ;;  %vm2870_vm3 = vcmp.gt.f32.partialorder %v2866_v1, 0.0 }
 0x621   : > { %v2878_v41 = vsel %vm2870_vm3, %v2866_v1, %v2874_v10 }
 0x622   : > { %v4385_v56 = vadd.f32 %v4382_v42, %v2878_v41 }
 0x624   : > { %v2895_v4 = vsel %vm2885_vm5, %v4385_v56, -inf }
 0x636   : > { %2896 = vmax.xlane.f32.xlu0 %v2895_v4  ;;  %v2838_v4 = vrot.slane %v4371_v31, 2 }
 0x64a   : > { %2717 = vrot.lane.b32.xlu0 %v4162_v22, %s4627_s25 }
 0x652   : > { %3013 = vrot.lane.b32.xlu0 %v4292_v18, %s4626_s24 }
 0x656   : > { %v2503_v48 = vpop.permute.xlu0 %2502 }
 0x657   : > { %v2505_v47 = vperm.slane %v2503_v48, 0 }
 0x659   : > { %v2513_v49 = vadd.f32 %v2505_v47, %v2486_v44 }
 0x65b   : > { %v2521_v57 = vmul.f32 0.2, %v2513_v49  ;;  %vm2517_vm10 = vcmp.gt.f32.partialorder %v2513_v49, 0.0 }
 0x65d   : > { %v2525_v51 = vsel %vm2517_vm10, %v2513_v49, %v2521_v57 }
 0x65e   : > { %v2508_v52 = vpop.permute.xlu0 %2507  ;;  %v4402_v53 = vadd.f32 %v2528_v50, %v2525_v51 }
 0x65f   : > { %v2510_v24 = vperm.slane %v2508_v52, 0 }
 0x660   : > { %v2540_v55 = vsel %vm2533_vm11, %v4402_v53, -inf }
 0x661   : > { %v2514_v58 = vadd.f32 %v2510_v24, %v2487_v39  ;;  %2541 = vmax.xlane.f32.xlu1 %v2540_v55 }
 0x663   : > { %v2522_v59 = vmul.f32 0.2, %v2514_v58  ;;  %vm2518_vm12 = vcmp.gt.f32.partialorder %v2514_v58, 0.0 }
 0x665   : > { %v2526_v11 = vsel %vm2518_vm12, %v2514_v58, %v2522_v59 }
 0x666   : > { %v2498_v61 = vpop.permute.xlu0 %2497  ;;  %v2532_v62 = vadd.f32 %v2528_v50, %v2526_v11 }
 0x667   : > { %v2500_v9 = vperm.slane %v2498_v61, 0 }
 0x668   : > { %v2543_v30 = vsel %vm2533_vm11, %v2532_v62, -inf }
 0x669   : > { %2544 = vmax.xlane.f32.xlu2 %v2543_v30  ;;  %v2512_v63 = vadd.f32 %v2500_v9, %v2485_v5 }
 0x66b   : > { %v2520_v12 = vmul.f32 0.2, %v2512_v63  ;;  %vm2516_vm1 = vcmp.gt.f32.partialorder %v2512_v63, 0.0 }
 0x66d   : > { %v2524_v14 = vsel %vm2516_vm1, %v2512_v63, %v2520_v12 }
 0x66e   : > { %v2850_v60 = vpop.permute.xlu0 %2849  ;;  %v4419_v13 = vadd.f32 %v2528_v50, %v2524_v14 }
 0x66f   : > { %v2852_v10 = vperm.slane %v2850_v60, 0 }
 0x670   : > { %v2537_v16 = vsel %vm2533_vm11, %v4419_v13, -inf }
 0x676   : > { %v2493_v0 = vpop.permute.xlu0 %2492 }
 0x677   : > { %v2495_v7 = vperm.slane %v2493_v0, 0 }
 0x679   : > { %v2511_v45 = vadd.f32 %v2495_v7, %v4367_v34 }
 0x67a   : > { %2854 = vperm.xlu1 %3532, %v2834_v28  }
 0x67b   : > { %v2519_v2 = vmul.f32 0.2, %v2511_v45  ;;  %vm2515_vm9 = vcmp.gt.f32.partialorder %v2511_v45, 0.0 }
 0x67d   : > { %v2523_v46 = vsel %vm2515_vm9, %v2511_v45, %v2519_v2 }
 0x67e   : > { %v2370_v8 = vpop.permute.xlu0 %2369  ;;  %v4410_v54 = vadd.f32 %v2528_v50, %v2523_v46 }
 0x67f   : > { %3433 = vmatpush.msk.msra.mxu3 %vm664_vm0, %v2370_v8 }
 0x680   : > { %3434 = vmatmul.msk.f32.vlgmr.msra.gmra.mxu3 %vm1564_vm8, %v4272_v37 }
 0x681   : > { %2341 = vrot.lane.b32.xlu2 %v4164_v26, %s3767_s22 }
 0x682   : > { %2844 = vperm.xlu1 %3532, %v4331_v38  }
 0x6a9   : > { %v2897_v23 = vpop.xlane.xlu0 %2896 }
 0x6aa   : > { %v2901_v11 = vsub.f32 %v4385_v56, %v2897_v23 }
 0x6ac   : > { %2538 = vmax.xlane.f32.xlu1 %v2537_v16  ;;  %v2908_v60 = vmul.f32 1.442695, %v2901_v11 }
 0x6bc   : > { %v2718_v37 = vpop.permute.xlu0 %2717 }
 0x6bd   : > { %3441 = vmatpush.msk.msrb.mxu3 %vm1206_vm4, %v2718_v37 }
 0x6c5   : > { %2689 = vrot.lane.b32.xlu1 %v4162_v22, %s3767_s22 }
 0x6cd   : > { %3041 = vrot.lane.b32.xlu1 %v4292_v18, %s3767_s22 }
 0x6d4   : > { %v2542_v36 = vpop.xlane.xlu1 %2541 }
 0x6d5   : > { %3069 = vrot.lane.b32.xlu1 %v4292_v18, %s4627_s25  ;;  %v2837_v18 = vrot.slane %v4371_v31, 1  ;;  %v2548_v57 = vsub.f32 %v4402_v53, %v2542_v36 }
 0x6d7   : > { %v2864_v44 = vadd.f32 %v2852_v10, %v2837_v18  ;;  %v2554_v24 = vmul.f32 1.442695, %v2548_v57 }
 0x6d9   : > { %v2872_v50 = vmul.f32 0.2, %v2864_v44  ;;  %vm2868_vm14 = vcmp.gt.f32.partialorder %v2864_v44, 0.0 }
 0x6db   : > { %v2876_v59 = vsel %vm2868_vm14, %v2864_v44, %v2872_v50 }
 0x6dc   : > { %v2545_v26 = vpop.xlane.xlu2 %2544  ;;  %v2882_v53 = vadd.f32 %v4382_v42, %v2876_v59 }
 0x6dd   : > { %v2549_v38 = vsub.f32 %v2532_v62, %v2545_v26 }
 0x6de   : > { %v2889_v0 = vsel %vm2885_vm5, %v2882_v53, -inf }
 0x6df   : > { %v2556_v34 = vmul.f32 1.442695, %v2549_v38 }
 0x6e1   : > { %3587 = vpow2.f32 %v2556_v34 }
 0x6e2   : > { %3589 = vpow2.f32 %v2554_v24 }
 0x6e3   : > { %3591 = vpow2.f32 %v2908_v60 }
 0x6e4   : > { %v2342_v20 = vpop.permute.xlu2 %2341 }
 0x6e5   : > { %3431 = vmatpush.msk.msra.mxu2 %vm664_vm0, %v2342_v20 }
 0x6e6   : > { %3432 = vmatmul.msk.f32.vlgmr.msra.gmra.mxu2 %vm1564_vm8, %v4265_v19 }
 0x6e7   : > { %v3588_v3 = vpop.eup %3587 }
 0x6e8   : > { %v2561_v1 = vmul.f32 %v3588_v3, %v4397_v43  ;;  %v3590_v7 = vpop.eup %3589 }
 0x6e9   : > { %v2560_v56 = vmul.f32 %v3590_v7, %v4397_v43  ;;  %v3592_v2 = vpop.eup %3591 }
 0x6ea   : > { %3442 = vmatmul.msk.f32.vlgmr.msrb.gmra.mxu3 %vm1202_vm7, %v2561_v1  ;;  %v2571_v45 = vsel %vm2533_vm11, %v2561_v1, 0.0  ;;  %v2913_v46 = vmul.f32 %v3592_v2, %v4378_v6 }
 0x6ec   : > { %v2855_v41 = vpop.permute.xlu1 %2854  ;;  %v2923_v8 = vsel %vm2885_vm5, %v2913_v46, 0.0 }
 0x6ed   : > { %v2857_v48 = vperm.slane %v2855_v41, 0 }
 0x6ef   : > { %v2865_v47 = vadd.f32 %v2857_v48, %v2838_v4 }
 0x6f1   : > { %v2873_v49 = vmul.f32 0.2, %v2865_v47  ;;  %vm2869_vm3 = vcmp.gt.f32.partialorder %v2865_v47, 0.0 }
 0x6f3   : > { %v2877_v19 = vsel %vm2869_vm3, %v2865_v47, %v2873_v49 }
 0x6f4   : > { %v2845_v51 = vpop.permute.xlu1 %2844  ;;  %v2883_v52 = vadd.f32 %v4382_v42, %v2877_v19 }
 0x6f5   : > { %v2847_v39 = vperm.slane %v2845_v51, 0 }
 0x6f6   : > { %v2892_v55 = vsel %vm2885_vm5, %v2883_v52, -inf }
 0x6f7   : > { %v2863_v58 = vadd.f32 %v2847_v39, %v4371_v31  ;;  %2893 = vmax.xlane.f32.xlu2 %v2892_v55  ;;  %v2534_v31 = vsel %vm2533_vm11, %v4410_v54, -inf  ;;  %v2228_v55 = vmax.f32 %v4327_v32, 1e-30 }
 0x6f9   : > { %v2871_v61 = vmul.f32 0.2, %v2863_v58  ;;  %vm2867_vm6 = vcmp.gt.f32.partialorder %v2863_v58, 0.0 }
 0x6fb   : > { %v2875_v62 = vsel %vm2867_vm6, %v2863_v58, %v2871_v61 }
 0x6fc   : > { %v2881_v30 = vadd.f32 %v4382_v42, %v2875_v62  ;;  %v2568_v42 = vsel %vm2533_vm11, %v2560_v56, 0.0 }
 0x6fe   : > { %v2886_v28 = vsel %vm2885_vm5, %v2881_v30, -inf }
 0x6ff   : > { %2890 = vmax.xlane.f32.xlu2 %v2889_v0  ;;  %2887 = vmax.xlane.f32.xlu0 %v2886_v28 }
 0x700   : > { %2535 = vmax.xlane.f32.xlu1 %v2534_v31 }
 0x703   : > { %v4480_v0 = vpop.f32.mrf.mxu3 }
 0x707   : > { %2572 = vadd.xlane.f32.xlu0 %v2571_v45 }
 0x708   : > { %2569 = vadd.xlane.f32.xlu1 %v2568_v42 }
 0x70f   : > { %2924 = vadd.xlane.f32.xlu0 %v2923_v8 }
 0x717   : > { %2661 = vrot.lane.b32.xlu2 %v4162_v22, %s4626_s24 }
 0x71f   : > { %v2539_v9 = vpop.xlane.xlu1 %2538 }
 0x720   : > { %v2547_v5 = vsub.f32 %v4419_v13, %v2539_v9  ;;  %v3014_v13 = vpop.permute.xlu0 %3013 }
 0x722   : > { %v2552_v63 = vmul.f32 1.442695, %v2547_v5 }
 0x724   : > { %3593 = vpow2.f32 %v2552_v63  ;;  %v2269_v63 = vand.u32 2147483648, %v2228_v55 }
 0x72a   : > { %v3594_v14 = vpop.eup %3593 }
 0x72b   : > { %v2559_v16 = vmul.f32 %v3594_v14, %v4397_v43 }
 0x72d   : > { %v2565_v37 = vsel %vm2533_vm11, %v2559_v16, 0.0 }
 0x737   : > { %v2690_v12 = vpop.permute.xlu1 %2689 }
 0x738   : > { %3439 = vmatpush.msk.msrb.mxu2 %vm1206_vm4, %v2690_v12  ;;  %v2267_v12 = vand.u32 2147483647, %v2228_v55 }
 0x739   : > { %3440 = vmatmul.msk.f32.vlgmr.msrb.gmra.mxu2 %vm1202_vm7, %v2560_v56 }
 0x73a   : > { %vm2268_vm12 = vcmp.eq.f32.partialorder %v2267_v12, 8.507059e+37 }
 0x73f   : > { %v3042_v23 = vpop.permute.xlu1 %3041 }
 0x740   : > { %2566 = vadd.xlane.f32.xlu2 %v2565_v37  ;;  %3447 = vmatpush.msk.msra.mxu2 %vm664_vm0, %v3042_v23  ;;  %v2270_v23 = vor.u32 1.1754944e-38, %v2269_v63 }
 0x747   : > { %v3070_v22 = vpop.permute.xlu1 %3069 }
 0x748   : > { %3449 = vmatpush.msk.msra.mxu3 %vm664_vm0, %v3070_v22 }
 0x749   : > { %3450 = vmatmul.msk.f32.vlgmr.msra.gmra.mxu3 %vm1564_vm8, %v2913_v46 }
 0x769   : > { %v2365_v37 = vpop.f32.mrf.mxu2 }
 0x76a   : > { %v2894_v26 = vpop.xlane.xlu2 %2893 }
 0x76b   : > { %v2900_v38 = vsub.f32 %v2883_v52, %v2894_v26  ;;  %v2227_v26 = vmax.f32 %v4325_v17, 1e-30 }
 0x76d   : > { %v2906_v34 = vmul.f32 1.442695, %v2900_v38  ;;  %v2741_v46 = vpop.f32.mrf.mxu3 }
 0x76f   : > { %3595 = vpow2.f32 %v2906_v34 }
 0x772   : > { %v2891_v36 = vpop.xlane.xlu2 %2890  ;;  %v2888_v20 = vpop.xlane.xlu0 %2887 }
 0x773   : > { %v2899_v3 = vsub.f32 %v2882_v53, %v2891_v36  ;;  %v2898_v1 = vsub.f32 %v2881_v30, %v2888_v20  ;;  %v2536_v10 = vpop.xlane.xlu1 %2535 }
 0x774   : > { %v2546_v41 = vsub.f32 %v4410_v54, %v2536_v10 }
 0x775   : > { %v3596_v18 = vpop.eup %3595  ;;  %v2904_v4 = vmul.f32 1.442695, %v2899_v3  ;;  %v2902_v48 = vmul.f32 1.442695, %v2898_v1 }
 0x776   : > { %v2912_v44 = vmul.f32 %v3596_v18, %v4378_v6  ;;  %v2550_v47 = vmul.f32 1.442695, %v2546_v41 }
 0x777   : > { %3597 = vpow2.f32 %v2904_v4 }
 0x778   : > { %3599 = vpow2.f32 %v2902_v48  ;;  %3448 = vmatmul.msk.f32.vlgmr.msra.gmra.mxu2 %vm1564_vm8, %v2912_v44  ;;  %v2920_v49 = vsel %vm2885_vm5, %v2912_v44, 0.0 }
 0x779   : > { %3601 = vpow2.f32 %v2550_v47  ;;  %2921 = vadd.xlane.f32.xlu1 %v2920_v49 }
 0x77a   : > { %v2662_v57 = vpop.permute.xlu2 %2661  ;;  %v2573_v50 = vpop.xlane.xlu0 %2572 }
 0x77b   : > { %v2577_v19 = vmax.f32 %v2573_v50, 1e-30  ;;  %3437 = vmatpush.msk.msrb.mxu1 %vm1206_vm4, %v2662_v57  ;;  %v2570_v9 = vpop.xlane.xlu1 %2569 }
 0x77c   : > { %3438 = vmatmul.msk.f32.vlgmr.msrb.gmra.mxu1 %vm1202_vm7, %v2559_v16  ;;  %v2576_v14 = vmax.f32 %v2570_v9, 1e-30 }
 0x77d   : > { %v3598_v54 = vpop.eup %3597  ;;  %3603 = vrcp.f32 %v2577_v19  ;;  %3445 = vmatpush.msk.msra.mxu1 %vm664_vm0, %v3014_v13  ;;  %v2631_v28 = vand.u32 2147483648, %v2577_v19  ;;  %vm2625_vm4 = vweird.f32 %v2577_v19  ;;  %v2629_v7 = vand.u32 2147483647, %v2577_v19 }
 0x77e   : > { %v3600_v51 = vpop.eup %3599  ;;  %v2911_v52 = vmul.f32 %v3598_v54, %v4378_v6  ;;  %3605 = vrcp.f32 %v2228_v55  ;;  %v2617_v44 = vand.u32 2147483648, %v2576_v14  ;;  %vm2611_vm1 = vweird.f32 %v2576_v14 }
 0x77f   : > { %v3602_v39 = vpop.eup %3601  ;;  %v2910_v24 = vmul.f32 %v3600_v51, %v4378_v6  ;;  %v2632_v45 = vor.u32 1.1754944e-38, %v2631_v28  ;;  %3607 = vrcp.f32 %v2576_v14  ;;  %v2615_v47 = vand.u32 2147483647, %v2576_v14 }
 0x780   : > { %v2558_v58 = vmul.f32 %v3602_v39, %v4397_v43  ;;  %v2917_v59 = vsel %vm2885_vm5, %v2911_v52, 0.0  ;;  %3609 = vrcp.f32 %v2227_v26  ;;  %v2618_v50 = vor.u32 1.1754944e-38, %v2617_v44 }
 0x781   : > { %2918 = vadd.xlane.f32.xlu2 %v2917_v59  ;;  %v2914_v11 = vsel %vm2885_vm5, %v2910_v24, 0.0  ;;  %vm2630_vm5 = vcmp.eq.f32.partialorder %v2629_v7, 8.507059e+37  ;;  %vm2616_vm14 = vcmp.eq.f32.partialorder %v2615_v47, 8.507059e+37 }
 0x782   : > { %3436 = vmatmul.msk.f32.vlgmr.msrb.gmra.mxu0 %vm1202_vm7, %v2558_v58  ;;  %2915 = vadd.xlane.f32.xlu1 %v2914_v11  ;;  %v2562_v6 = vsel %vm2533_vm11, %v2558_v58, 0.0  ;;  %v2925_v34 = vpop.xlane.xlu0 %2924 }
 0x783   : > { %v3604_v61 = vpop.eup %3603  ;;  %v2929_v20 = vmax.f32 %v2925_v34, 1e-30 }
 0x784   : > { %v2621_v53 = vmul.f32 %v3604_v61, %v2577_v19  ;;  %3446 = vmatmul.msk.f32.vlgmr.msra.gmra.mxu1 %vm1564_vm8, %v2911_v52  ;;  %v3606_v32 = vpop.eup %3605  ;;  %vm2626_vm0 = vweird.f32 %v3604_v61 }
 0x785   : > { %v2259_v30 = vmul.f32 %v3606_v32, %v2228_v55  ;;  %vm2627_vm7 = vmor %vm2625_vm4, %vm2626_vm0  ;;  %vm2264_vm10 = vweird.f32 %v3606_v32  ;;  %v3608_v38 = vpop.eup %3607  ;;  %3611 = vrcp.f32 %v2929_v20  ;;  %vm2249_vm0 = vweird.f32 %v2227_v26 }
 0x786   : > { %v2622_v62 = vsub.f32 1.0, %v2621_v53  ;;  %v2607_v36 = vmul.f32 %v3608_v38, %v2576_v14  ;;  %v3610_v1 = vpop.eup %3609  ;;  %vm2612_vm9 = vweird.f32 %v3608_v38 }
 0x787   : > { %v2260_v31 = vsub.f32 1.0, %v2259_v30  ;;  %v2245_v10 = vmul.f32 %v3610_v1, %v2227_v26  ;;  %vm2613_vm3 = vmor %vm2611_vm1, %vm2612_vm9  ;;  %vm2250_vm6 = vweird.f32 %v3610_v1 }
 0x788   : > { %v2623_v43 = vmul.f32 %v3604_v61, %v2622_v62  ;;  %v2608_v3 = vsub.f32 1.0, %v2607_v36  ;;  %vm2251_vm4 = vmor %vm2249_vm0, %vm2250_vm6 }
 0x789   : > { %2563 = vadd.xlane.f32.xlu2 %v2562_v6  ;;  %v2261_v2 = vmul.f32 %v3606_v32, %v2260_v31  ;;  %v2246_v18 = vsub.f32 1.0, %v2245_v10 }
 0x78a   : > { %3444 = vmatmul.msk.f32.vlgmr.msra.gmra.mxu0 %vm1564_vm8, %v2910_v24  ;;  %v2624_v60 = vadd.f32 %v3604_v61, %v2623_v43  ;;  %vm2263_vm8 = vweird.f32 %v2228_v55  ;;  %v2609_v41 = vmul.f32 %v3608_v38, %v2608_v3  ;;  %v2255_v24 = vand.u32 2147483648, %v2227_v26 }
 0x78b   : > { %v2262_v8 = vadd.f32 %v3606_v32, %v2261_v2  ;;  %vm2265_vm11 = vmor %vm2263_vm8, %vm2264_vm10  ;;  %v3612_v48 = vpop.eup %3611  ;;  %v2247_v49 = vmul.f32 %v3610_v1, %v2246_v18  ;;  %v2253_v55 = vand.u32 2147483647, %v2227_v26  ;;  %vm2977_vm10 = vweird.f32 %v2929_v20 }
 0x78c   : > { %v2628_v56 = vsel %vm2627_vm7, %v3604_v61, %v2624_v60  ;;  %v2610_v4 = vadd.f32 %v3608_v38, %v2609_v41  ;;  %v2973_v57 = vmul.f32 %v3612_v48, %v2929_v20  ;;  %v2256_v11 = vor.u32 1.1754944e-38, %v2255_v24  ;;  %v2337_v61 = vpop.f32.mrf.mxu1 }
 0x78d   : > { %v2633_v42 = vsel %vm2630_vm5, %v2632_v45, %v2628_v56  ;;  %v2266_v16 = vsel %vm2265_vm11, %v3606_v32, %v2262_v8  ;;  %v2248_v51 = vadd.f32 %v3610_v1, %v2247_v49  ;;  %vm2254_vm7 = vcmp.eq.f32.partialorder %v2253_v55, 8.507059e+37 }
 0x78e   : > { %v2744_v5 = vmul.f32 %v2741_v46, %v2633_v42  ;;  %v2271_v22 = vsel %vm2268_vm12, %v2270_v23, %v2266_v16  ;;  %v2614_v17 = vsel %vm2613_vm3, %v3608_v38, %v2610_v4  ;;  %v2974_v39 = vsub.f32 1.0, %v2973_v57 }
 0x78f   : > { %v2368_v13 = vmul.f32 %v2365_v37, %v2271_v22  ;;  %v2619_v19 = vsel %vm2616_vm14, %v2618_v50, %v2614_v17  ;;  %v2252_v58 = vsel %vm2251_vm4, %v3610_v1, %v2248_v51  ;;  %vm2978_vm5 = vweird.f32 %v3612_v48 }
 0x790   : > { %v2975_v59 = vmul.f32 %v3612_v48, %v2974_v39  ;;  %v2257_v53 = vsel %vm2254_vm7, %v2256_v11, %v2252_v58  ;;  %v2983_v32 = vand.u32 2147483648, %v2929_v20  ;;  %v2981_v43 = vand.u32 2147483647, %v2929_v20  ;;  %vm2979_vm8 = vmor %vm2977_vm10, %vm2978_vm5 }
 0x791   : > { %v2340_v62 = vmul.f32 %v2337_v61, %v2257_v53 }
 0x792   : > { %v2976_v6 = vadd.f32 %v3612_v48, %v2975_v59  ;;  %v2984_v60 = vor.u32 1.1754944e-38, %v2983_v32  ;;  %vm2982_vm11 = vcmp.eq.f32.partialorder %v2981_v43, 8.507059e+37 }
 0x794   : > { %v2980_v30 = vsel %vm2979_vm8, %v3612_v48, %v2976_v6 }
 0x795   : > { %v2985_v28 = vsel %vm2982_vm11, %v2984_v60, %v2980_v30 }
 0x79b   : > { %2754 = vrot.lane.b32.xlu1 %v2744_v5, %s4626_s24 }
 0x7a3   : > { %2402 = vrot.lane.b32.xlu1 %v2368_v13, %s3767_s22  ;;  %v2229_v13 = vmax.f32 %v4333_v40, 1e-30 }
 0x7a5   : > { %v2283_v6 = vand.u32 2147483648, %v2229_v13  ;;  %v2281_v32 = vand.u32 2147483647, %v2229_v13 }
 0x7a7   : > { %v2284_v30 = vor.u32 1.1754944e-38, %v2283_v6 }
 0x7b3   : > { %v2567_v56 = vpop.xlane.xlu2 %2566 }
 0x7b4   : > { %v2575_v45 = vmax.f32 %v2567_v56, 1e-30 }
 0x7b6   : > { %3613 = vrcp.f32 %v2575_v45  ;;  %v2603_v12 = vand.u32 2147483648, %v2575_v45  ;;  %vm2597_vm9 = vweird.f32 %v2575_v45  ;;  %v2601_v16 = vand.u32 2147483647, %v2575_v45 }
 0x7b8   : > { %v2604_v26 = vor.u32 1.1754944e-38, %v2603_v12  ;;  %vm2602_vm3 = vcmp.eq.f32.partialorder %v2601_v16, 8.507059e+37 }
 0x7bc   : > { %v2713_v54 = vpop.f32.mrf.mxu2  ;;  %v3614_v2 = vpop.eup %3613 }
 0x7bd   : > { %v2716_v52 = vmul.f32 %v2713_v54, %v2619_v19  ;;  %v2593_v42 = vmul.f32 %v3614_v2, %v2575_v45  ;;  %vm2598_vm12 = vweird.f32 %v3614_v2 }
 0x7be   : > { %vm2599_vm1 = vmor %vm2597_vm9, %vm2598_vm12  ;;  %vm2277_vm12 = vweird.f32 %v2229_v13 }
 0x7bf   : > { %2750 = vrot.lane.b32.xlu2 %v2716_v52, %s3767_s22  ;;  %v2594_v46 = vsub.f32 1.0, %v2593_v42  ;;  %v4495_v42 = vmax.f32 %v4276_v25, 1e-30 }
 0x7c1   : > { %v2595_v5 = vmul.f32 %v3614_v2, %v2594_v46  ;;  %v4498_v46 = vmax.f32 %v4321_v15, 1e-30 }
 0x7c3   : > { %v2596_v63 = vadd.f32 %v3614_v2, %v2595_v5 }
 0x7c5   : > { %v2600_v37 = vsel %vm2599_vm1, %v3614_v2, %v2596_v63  ;;  %vm2282_vm1 = vcmp.eq.f32.partialorder %v2281_v32, 8.507059e+37 }
 0x7c6   : > { %v2605_v38 = vsel %vm2602_vm3, %v2604_v26, %v2600_v37 }
 0x7c7   : > { %2398 = vrot.lane.b32.xlu2 %v2340_v62, %s4627_s25 }
 0x7cc   : > { %v3093_v31 = vpop.f32.mrf.mxu3 }
 0x7cd   : > { %v3096_v7 = vmul.f32 %v3093_v31, %v2985_v28 }
 0x7cf   : > { %3106 = vrot.lane.b32.xlu2 %v3096_v7, %s4626_s24 }
 0x7ec   : > { %v2922_v8 = vpop.xlane.xlu1 %2921 }
 0x7ed   : > { %v2928_v9 = vmax.f32 %v2922_v8, 1e-30 }
 0x7ef   : > { %3615 = vrcp.f32 %v2928_v9  ;;  %v2969_v19 = vand.u32 2147483648, %v2928_v9  ;;  %vm2963_vm5 = vweird.f32 %v2928_v9  ;;  %v2967_v39 = vand.u32 2147483647, %v2928_v9 }
 0x7f1   : > { %v2970_v58 = vor.u32 1.1754944e-38, %v2969_v19  ;;  %vm2968_vm8 = vcmp.eq.f32.partialorder %v2967_v39, 8.507059e+37  ;;  %v1881_v19 = vand.u32 2147483648, %v4495_v42 }
 0x7f3   : > { %v1882_v6 = vor.u32 1.1754944e-38, %v1881_v19 }
 0x7f4   : > { %v2919_v14 = vpop.xlane.xlu2 %2918 }
 0x7f5   : > { %v2927_v23 = vmax.f32 %v2919_v14, 1e-30  ;;  %v3616_v22 = vpop.eup %3615  ;;  %v2916_v56 = vpop.xlane.xlu1 %2915 }
 0x7f6   : > { %v2959_v20 = vmul.f32 %v3616_v22, %v2928_v9  ;;  %vm2964_vm4 = vweird.f32 %v3616_v22  ;;  %v2926_v45 = vmax.f32 %v2916_v56, 1e-30  ;;  %v4501_v9 = vpop.f32.mrf.mxu0 }
 0x7f7   : > { %3617 = vrcp.f32 %v2927_v23  ;;  %v2955_v4 = vand.u32 2147483648, %v2927_v23  ;;  %v2953_v40 = vand.u32 2147483647, %v2927_v23  ;;  %vm2949_vm6 = vweird.f32 %v2927_v23  ;;  %vm2965_vm10 = vmor %vm2963_vm5, %vm2964_vm4 }
 0x7f8   : > { %3619 = vrcp.f32 %v2229_v13  ;;  %v2960_v1 = vsub.f32 1.0, %v2959_v20  ;;  %vm2935_vm5 = vweird.f32 %v2926_v45 }
 0x7f9   : > { %v2685_v34 = vpop.f32.mrf.mxu1  ;;  %v2956_v17 = vor.u32 1.1754944e-38, %v2955_v4  ;;  %vm2954_vm7 = vcmp.eq.f32.partialorder %v2953_v40, 8.507059e+37  ;;  %v2941_v40 = vand.u32 2147483648, %v2926_v45 }
 0x7fa   : > { %v2688_v36 = vmul.f32 %v2685_v34, %v2605_v38  ;;  %v2961_v48 = vmul.f32 %v3616_v22, %v2960_v1 }
 0x7fb   : > { %v3065_v61 = vpop.f32.mrf.mxu2 }
 0x7fc   : > { %2746 = vrot.lane.b32.xlu0 %v2688_v36, %s4627_s25  ;;  %v2962_v57 = vadd.f32 %v3616_v22, %v2961_v48  ;;  %v2564_v31 = vpop.xlane.xlu2 %2563 }
 0x7fd   : > { %v3618_v3 = vpop.eup %3617  ;;  %v2574_v7 = vmax.f32 %v2564_v31, 1e-30 }
 0x7fe   : > { %v2945_v10 = vmul.f32 %v3618_v3, %v2927_v23  ;;  %v3620_v18 = vpop.eup %3619  ;;  %vm2950_vm14 = vweird.f32 %v3618_v3  ;;  %v2966_v55 = vsel %vm2965_vm10, %v3616_v22, %v2962_v57  ;;  %v4507_v23 = vpop.f32.mrf.mxu0 }
 0x7ff   : > { %v2273_v47 = vmul.f32 %v3620_v18, %v2229_v13  ;;  %vm2951_vm0 = vmor %vm2949_vm6, %vm2950_vm14  ;;  %v2971_v11 = vsel %vm2968_vm8, %v2970_v58, %v2966_v55  ;;  %vm2278_vm11 = vweird.f32 %v3620_v18  ;;  %3621 = vrcp.f32 %v2574_v7 }
 0x800   : > { %v2946_v41 = vsub.f32 1.0, %v2945_v10  ;;  %v3068_v62 = vmul.f32 %v3065_v61, %v2971_v11  ;;  %vm2279_vm9 = vmor %vm2277_vm12, %vm2278_vm11  ;;  %3623 = vrcp.f32 %v2926_v45  ;;  %v2589_v13 = vand.u32 2147483648, %v2574_v7 }
 0x801   : > { %v3037_v51 = vpop.f32.mrf.mxu1  ;;  %v2274_v52 = vsub.f32 1.0, %v2273_v47  ;;  %3625 = vrcp.f32 %v4495_v42  ;;  %vm2583_vm14 = vweird.f32 %v2574_v7  ;;  %v2587_v34 = vand.u32 2147483647, %v2574_v7 }
 0x802   : > { %v2947_v44 = vmul.f32 %v3618_v3, %v2946_v41  ;;  %3627 = vrcp.f32 %v4498_v46  ;;  %v2590_v10 = vor.u32 1.1754944e-38, %v2589_v13  ;;  %vm1875_vm8 = vweird.f32 %v4495_v42 }
 0x803   : > { %v2275_v59 = vmul.f32 %v3620_v18, %v2274_v52  ;;  %v1879_v55 = vand.u32 2147483647, %v4495_v42  ;;  %v2942_v58 = vor.u32 1.1754944e-38, %v2941_v40  ;;  %v2239_v61 = vand.u32 2147483647, %v4498_v46 }
 0x804   : > { %v2948_v49 = vadd.f32 %v3618_v3, %v2947_v44 }
 0x805   : > { %v2276_v53 = vadd.f32 %v3620_v18, %v2275_v59  ;;  %v3622_v2 = vpop.eup %3621  ;;  %v2241_v59 = vand.u32 2147483648, %v4498_v46 }
 0x806   : > { %v2952_v50 = vsel %vm2951_vm0, %v3618_v3, %v2948_v49  ;;  %v2579_v8 = vmul.f32 %v3622_v2, %v2574_v7  ;;  %v3624_v5 = vpop.eup %3623  ;;  %vm2584_vm3 = vweird.f32 %v3622_v2  ;;  %vm2588_vm0 = vcmp.eq.f32.partialorder %v2587_v34, 8.507059e+37  ;;  %v2657_v4 = vpop.f32.mrf.mxu0 }
 0x807   : > { %v2957_v54 = vsel %vm2954_vm7, %v2956_v17, %v2952_v50  ;;  %v2280_v43 = vsel %vm2279_vm9, %v3620_v18, %v2276_v53  ;;  %v3626_v63 = vpop.eup %3625  ;;  %v2931_v14 = vmul.f32 %v3624_v5, %v2926_v45  ;;  %vm2585_vm6 = vmor %vm2583_vm14, %vm2584_vm3  ;;  %vm2936_vm4 = vweird.f32 %v3624_v5 }
 0x808   : > { %v3040_v24 = vmul.f32 %v3037_v51, %v2957_v54  ;;  %v2285_v60 = vsel %vm2282_vm1, %v2284_v30, %v2280_v43  ;;  %v4504_v16 = vpop.eup %3627  ;;  %v1871_v25 = vmul.f32 %v3626_v63, %v4495_v42  ;;  %vm1876_vm7 = vweird.f32 %v3626_v63  ;;  %vm4512_vm10 = vmor %vm2935_vm5, %vm2936_vm4 }
 0x809   : > { %v2396_v28 = vmul.f32 %v4480_v0, %v2285_v60  ;;  %v2580_v0 = vsub.f32 1.0, %v2579_v8  ;;  %v2932_v37 = vsub.f32 1.0, %v2931_v14  ;;  %v2231_v22 = vmul.f32 %v4504_v16, %v4498_v46  ;;  %vm4524_vm12 = vmor %vm1875_vm8, %vm1876_vm7 }
 0x80a   : > { %3098 = vrot.lane.b32.xlu0 %v3040_v24, %s4627_s25  ;;  %v1872_v38 = vsub.f32 1.0, %v1871_v25  ;;  %v2939_v17 = vand.u32 2147483647, %v2926_v45  ;;  %vm2236_vm11 = vweird.f32 %v4504_v16  ;;  %vm2235_vm1 = vweird.f32 %v4498_v46  ;;  %s3147_s25 = scalar_lea.hbm %s4606_s14, %s3872_s17  ;;  %s3133_s17 = scalar_lea.sflag [#allocation4], %s601_s29 }
 0x80b   : > { %v2581_v12 = vmul.f32 %v3622_v2, %v2580_v0  ;;  %v2933_v20 = vmul.f32 %v3624_v5, %v2932_v37  ;;  %v2232_v1 = vsub.f32 1.0, %v2231_v22  ;;  %vm2237_vm3 = vmor %vm2235_vm1, %vm2236_vm11  ;;  %vm1880_vm14 = vcmp.eq.f32.partialorder %v1879_v55, 8.507059e+37  ;;  %s4547_s3 = sshll.u32 %s3147_s25, 4  ;;  %s3152_s3 = int_to_ptr.hbm [resolvable:$true] %s4547_s3 }
 0x80c   : > { %v1873_v41 = vmul.f32 %v3626_v63, %v1872_v38  ;;  %vm2940_vm9 = vcmp.eq.f32.partialorder %v2939_v17, 8.507059e+37  ;;  %v2242_v60 = vor.u32 1.1754944e-38, %v2241_v59  ;;  %s3703_s18 = sshra.s32 %s3152_s3, 4  ;;  %s3704_s18 = int_to_ptr.hbm [resolvable:$true] %s3703_s18 }
 0x80d   : > { %v2582_v15 = vadd.f32 %v3622_v2, %v2581_v12  ;;  %v2934_v48 = vadd.f32 %v3624_v5, %v2933_v20  ;;  %v2233_v44 = vmul.f32 %v4504_v16, %v2232_v1  ;;  %v2755_v30 = vpop.permute.xlu1 %2754  ;;  %s3705_s20 = scalar_lea.hbm %s3704_s18, 1  ;;  %p3710_p3 = scmp.lt.s32.totalorder %s3704_s18, %s4606_s14 }
 0x80e   : > { %v1874_v47 = vadd.f32 %v3626_v63, %v1873_v41  ;;  %v3009_v43 = vpop.f32.mrf.mxu0  ;;  %p3706_p0 = scmp.ne.s32.totalorder %s3704_s18, %s3705_s20  ;;  %p3711_p4 = scmp.lt.s32.totalorder %s3709_s27, %s3705_s20 }
 0x80f   : > { %v2586_v36 = vsel %vm2585_vm6, %v3622_v2, %v2582_v15  ;;  %v2938_v54 = vsel %vm4512_vm10, %v3624_v5, %v2934_v48  ;;  %v2234_v39 = vadd.f32 %v4504_v16, %v2233_v44  ;;  %vm2240_vm6 = vcmp.eq.f32.partialorder %v2239_v61, 8.507059e+37 }
 0x810   : > { %v2591_v18 = vsel %vm2588_vm0, %v2590_v10, %v2586_v36  ;;  %v1878_v11 = vsel %vm4524_vm12, %v3626_v63, %v1874_v47  ;;  %v2943_v53 = vsel %vm2940_vm9, %v2942_v58, %v2938_v54  ;;  %p3707_p1 = pnand %p3706_p0, %p3889_p5  ;;  %p3712_p7 = por %p3711_p4, %p3710_p3 }
 0x811   : > { %v2660_v49 = vmul.f32 %v2657_v4, %v2591_v18  ;;  %v2238_v32 = vsel %vm2237_vm3, %v4504_v16, %v2234_v39  ;;  %v3012_v31 = vmul.f32 %v3009_v43, %v2943_v53 }
 0x812   : > { %3102 = vrot.lane.b32.xlu0 %v3068_v62, %s3767_s22  ;;  %v2243_v56 = vsel %vm2240_vm6, %v2242_v60, %v2238_v32  ;;  %p3708_p2 = pneg %p3707_p1 }
 0x813   : > { %v2312_v63 = vmul.f32 %v4507_v23, %v2243_v56 }
 0x814   : > { %p3713_p8 = pnand %p3712_p7, %p3708_p2 }
 0x815   : > { %v2403_v15 = vpop.permute.xlu1 %2402 }
 0x819   : > { %v2751_v26 = vpop.permute.xlu2 %2750 }
 0x81a   : > { %2406 = vrot.lane.b32.xlu0 %v2396_v28, %s4626_s24  ;;  %v1883_v28 = vsel %vm1880_vm14, %v1882_v6, %v1878_v11 }
 0x81b   : > { %v1952_v42 = vmul.f32 %v4501_v9, %v1883_v28 }
 0x81d   : > { %v2049_v12 = vsel %vm1327_vm13, %v1952_v42, %v4361_v21 }
 0x81e   : > { %v2050_v9 = vsel %vm1329_vm15, %v2049_v12, %v4363_v29 }
 0x821   : > { %v2399_v50 = vpop.permute.xlu2 %2398 }
 0x822   : > { %v2409_v16 = vsel %vm1327_vm13, %v2312_v63, %v2399_v50 }
 0x823   : > { %v2410_v21 = vsel %vm1329_vm15, %v2409_v16, %v2403_v15 }
 0x829   : > { %v3107_v46 = vpop.permute.xlu2 %3106 }
 0x86e   : > { %v2747_v3 = vpop.permute.xlu0 %2746 }
 0x86f   : > { %v2757_v51 = vsel %vm1327_vm13, %v2660_v49, %v2747_v3 }
 0x870   : > { %v2758_v62 = vsel %vm1329_vm15, %v2757_v51, %v2751_v26 }
 0x871   : > { %v2759_v7 = vsel %vm1331_vm2, %v2758_v62, %v2755_v30 }
 0x872   : > { %v3116_v0 = vadd.f32 %v2759_v7, %v4278_v33  ;;  %v2051_v33 = vsel %vm1331_vm2, %v2050_v9, %v4369_v35 }
 0x873   : > { %v3114_v23 = vadd.f32 %v2051_v33, %v4006_v27 }
 0x87c   : > { %v3099_v52 = vpop.permute.xlu0 %3098 }
 0x87d   : > { %v3109_v45 = vsel %vm1327_vm13, %v3012_v31, %v3099_v52 }
 0x884   : > { %v3103_v2 = vpop.permute.xlu0 %3102 }
 0x885   : > { %v3110_v8 = vsel %vm1329_vm15, %v3109_v45, %v3103_v2 }
 0x886   : > { %v3111_v5 = vsel %vm1331_vm2, %v3110_v8, %v3107_v46 }
 0x887   : > { %v3117_v14 = vadd.f32 %v3116_v0, %v3111_v5 }
 0x889   : > { %v3120_v25 = vmax.f32 %v3117_v14, 0.0 }
 0x88b   : > { %3123 = vst [vmem:[%s602_s15] sm:$0x1] %v3120_v25 }
 0x88c   : > { %v2407_v37 = vpop.permute.xlu0 %2406 }
 0x88d   : > { %3716 = shalt.err (!%p3713_p8)
}
 0x88e   : > { %3461 = dma.vmem_to_hbm [thread:$0]  (%p3889_p5), %s3150_s19, 16, %s3152_s3, %s3133_s17   ;;  %v2411_v27 = vsel %vm1331_vm2, %v2410_v21, %v2407_v37 }
 0x88f   : > { %v3115_v29 = vadd.f32 %v3114_v23, %v2411_v27  ;;  %s643_s15 = scalar_lea.vmem %s4605_s13, %s3948_s28 }
 0x891   : > { %v3119_v35 = vmax.f32 %v3115_v29, 0.0 }
 0x893   : > { %3122 = vst [vmem:[%s643_s15] sm:$0x7] %v3119_v35 }
 0x894 PF: > { %s4634_s18 = sld [smem:[#allocation11_spill]]  ;;  %p3478_p9 = scmp.ge.s32.totalorder %s3759_s16, 2 }
 0x896   : > { %p3471_p10 = pnand %p3478_p9, %p3893_p6 }
 0x898   : > { %p3472_p11 = pneg %p3471_p10 }
 0x89a   : > { %s3177_s26 = sand.u32 1, %s4634_s18  }
 0x89b   : > { %s3178_s23 = scalar_lea.sflag [#allocation4], %s3177_s26 }
 0x89c   : > { %3742 = dma.done.wait (%p3472_p11), %s3178_s23, 16  }
 0x89d   : > { %3744 = vsyncadd (%p3472_p11), %s3178_s23, 4294967280  ;;  %s4636_s16 = sld [smem:[#allocation13_spill]]  ;;  %s4639_s29 = smov %s3751_s30 }
 0x89e   : > { %s4637_s19 = sld [smem:[#allocation12_spill]] }
 0x89f   : > { %s4638_s15 = sld [smem:[#allocation14_spill]] }
 0x8a3   : > { %p27_p5 = scmp.ge.s32.totalorder %s4636_s16, 6  }
 0x8a4   : > { %s4640_s30 = smov %s4637_s19 }
 0x8a5   :  { %29 = sbr.rel (!%p27_p5) target bundleno = 7 (0x7), region = 160 }
 0x8aa   :  { %3183 = vsyncpa [#allocation3], 1 }
 0x8ab   :  { %3185 = vsyncpa [#allocation3 + $0x1], 1 }
 0x8ac   :  { %3186 = vsyncpa [#allocation6], 1 }
 0x8ad   :  { %3187 = vsyncpa [#allocation4], 1 }
 0x8ae   :  { %3189 = vsyncpa [#allocation4 + $0x1], 1 }

</bundles_post_ra>
